<compile_context>
chip_gen: v7x
topology: tpu7x:2x2x1
jax: 0.10.0
libtpu: 0.0.40
codegen_flags: <defaults>
</compile_context>

<pallas_src>
import functools
import math

import jax
import jax.numpy as jnp
from jax import lax
from jax.experimental import pallas as pl
from jax.experimental.pallas import tpu as pltpu

N_KERNELS = 16
RNN_UNITS = 16
CONV_KSIZE = 6
IN_CHANNELS = 2
FC_OUT = 2


# -----------------------------------------------------------------------------
# Kernel 1: conv as (OC, K) @ (K, OH*OW) per frame, lane-dense output,
# fused-ReLU epilogue.  Grid is tiled over groups of frames; "parallel" lets
# v7x shard it across its two TensorCores (no-op on v5e/v6e).
# -----------------------------------------------------------------------------
def _conv_mm_kernel(p_ref, w_ref, b_ref, conv_ref, flat_ref, *, frames):
    w = w_ref[...]                           # (OC, K) bf16, VMEM resident
    b = b_ref[...]                           # (OC, 1) f32
    for f in range(frames):                  # static unroll, tiny trip count
        acc = lax.dot_general(               # (OC, K) @ (K, OH*OW) -> (OC, OH*OW)
            w, p_ref[f], (((1,), (0,)), ((), ())),
            preferred_element_type=jnp.float32) + b
        conv_ref[f] = acc
        flat_ref[f] = jnp.maximum(acc, 0.0)  # fused ReLU for out_flat


def _frames_per_step(n, cap=8):
    """Largest divisor of n that is <= cap (keeps per-step VMEM small and the
    grid short; avoids the old full-array fallback)."""
    for d in range(min(cap, n), 0, -1):
        if n % d == 0:
            return d
    return 1


def conv2d_forward(x_nchw, conv_w, conv_b):
    """VALID conv, stride 1.  Returns (out_conv, relu(out_conv)) shaped
    (N, OC, OH*OW) f32, channel-major (lane-dense writes)."""
    n, c, h, w = x_nchw.shape
    oc, _, kh, kw = conv_w.shape
    oh, ow = h - kh + 1, w - kw + 1
    k = c * kh * kw
    m = oh * ow

    # Patch extraction (layout plumbing): one XLA op, bf16, feature order is
    # (C, KH, KW) which matches conv_w.reshape(OC, C*KH*KW); no transposes.
    patches = lax.conv_general_dilated_patches(
        x_nchw.astype(jnp.bfloat16), (kh, kw), (1, 1), "VALID",
        dimension_numbers=("NCHW", "OIHW", "NCHW"),
    ).reshape(n, k, m)                                   # (N, K, OH*OW) bf16

    wmat = conv_w.reshape(oc, k).astype(jnp.bfloat16)    # (OC, K) bf16
    bias = conv_b.reshape(oc, 1)                         # (OC, 1) f32

    fr = _frames_per_step(n)
    kernel = functools.partial(_conv_mm_kernel, frames=fr)
    out_conv, out_flat = pl.pallas_call(
        kernel,
        out_shape=(jax.ShapeDtypeStruct((n, oc, m), jnp.float32),
                   jax.ShapeDtypeStruct((n, oc, m), jnp.float32)),
        grid=(n // fr,),
        in_specs=[
            pl.BlockSpec((fr, k, m), lambda i: (i, 0, 0)),
            pl.BlockSpec((oc, k), lambda i: (0, 0)),
            pl.BlockSpec((oc, 1), lambda i: (0, 0)),
        ],
        out_specs=[
            pl.BlockSpec((fr, oc, m), lambda i: (i, 0, 0)),
            pl.BlockSpec((fr, oc, m), lambda i: (i, 0, 0)),
        ],
        compiler_params=pltpu.CompilerParams(dimension_semantics=("parallel",)),
    )(patches, wmat, bias)
    return out_conv, out_flat


# -----------------------------------------------------------------------------
# Kernel 2: fused input-projection + ReLU-RNN recurrence + FC head.
# Single invocation; everything VMEM resident; batch-major rows in and out.
# -----------------------------------------------------------------------------
def _rnn_fc_kernel(xflat_ref, wih_ref, whh_ref, b_ref, wfc_ref, bfc_ref,
                   out_rnn_ref, out_fc_ref, xproj_s, *, seq_len, batch):
    # Hoisted input projection for ALL (batch, time) rows in one MXU matmul,
    # batch-major rows (row = b*seq_len + t), fused (b_ih + b_hh) bias.
    # Weights contracted along their last dim (untransposed in HBM).
    xproj_s[...] = lax.dot_general(
        xflat_ref[...], wih_ref[...], (((1,), (1,)), ((), ())),
        preferred_element_type=jnp.float32) + b_ref[...]

    whh = whh_ref[...]                                   # (H, H) f32, resident
    h = jnp.zeros((batch, whh.shape[0]), jnp.float32)
    for t in range(seq_len):                             # static unroll
        # Gather timestep-t rows from the batch-major projection (tiny, all in
        # VMEM) -- this replaces the old 1.5 MB HBM time-major transpose.
        xp_t = jnp.concatenate(
            [xproj_s[pl.ds(b * seq_len + t, 1), :] for b in range(batch)],
            axis=0)                                      # (B, H)
        h = jnp.maximum(
            xp_t + lax.dot_general(h, whh, (((1,), (1,)), ((), ())),
                                   preferred_element_type=jnp.float32),
            0.0)
        for b in range(batch):                           # scatter back batch-major
            out_rnn_ref[pl.ds(b * seq_len + t, 1), :] = h[b:b + 1, :]

    # FC head over all rows in one matmul (out_rnn block is VMEM resident).
    out_fc_ref[...] = lax.dot_general(
        out_rnn_ref[...], wfc_ref[...], (((1,), (1,)), ((), ())),
        preferred_element_type=jnp.float32) + bfc_ref[...]


def rnn_fc_forward(x_flat_bm, w_ih, w_hh, b_ih, b_hh, w_fc, b_fc,
                   seq_len, batch):
    """x_flat_bm: (batch*seq_len, input) rows ordered batch-major (b*seq+t)."""
    hidden = w_ih.shape[0]
    kernel = functools.partial(_rnn_fc_kernel, seq_len=seq_len, batch=batch)
    out_rnn, out_fc = pl.pallas_call(
        kernel,
        out_shape=(
            jax.ShapeDtypeStruct((batch * seq_len, hidden), jnp.float32),
            jax.ShapeDtypeStruct((batch * seq_len, w_fc.shape[0]), jnp.float32),
        ),
        scratch_shapes=[pltpu.VMEM((batch * seq_len, hidden), jnp.float32)],
    )(
        x_flat_bm,
        w_ih,                                # (H, I)  untransposed
        w_hh,                                # (H, H)  untransposed
        (b_ih + b_hh).reshape(1, hidden),    # fused RNN bias
        w_fc,                                # (2, H)  untransposed
        b_fc.reshape(1, -1),                 # (1, 2)
    )
    return out_rnn, out_fc


# -----------------------------------------------------------------------------
# Full Model_n forward
# -----------------------------------------------------------------------------
def model_n_forward(x, params):
    """x: (B, F, 2, 32, 32).  Mirrors Model_n.forward."""
    b, f, c, h, w = x.shape
    oc, _, kh, kw = params["conv_w"].shape
    oh, ow = h - kh + 1, w - kw + 1

    # Conv applied frame-by-frame == conv on the merged (B*F) batch.
    conv_cm, flat_cm = conv2d_forward(
        x.reshape(b * f, c, h, w), params["conv_w"], params["conv_b"])

    out_conv = conv_cm.reshape(b, f, oc, oh, ow)          # free reshape
    out_flat = flat_cm.reshape(b, f, oc * oh * ow)        # free reshape (== nn.Flatten+ReLU)

    # RNN + FC consume the flat features batch-major; the kernel does the
    # per-timestep reordering internally and emits batch-major rows.
    out_rnn_flat, out_fc_flat = rnn_fc_forward(
        flat_cm.reshape(b * f, oc * oh * ow),
        params["w_ih"], params["w_hh"], params["b_ih"], params["b_hh"],
        params["fc_w"], params["fc_b"], seq_len=f, batch=b)

    out_rnn = out_rnn_flat.reshape(b, f, -1)              # (B, F, H)
    out_fc = out_fc_flat.reshape(b, f, -1)                # (B, F, 2)
    return out_fc, out_conv, out_flat, out_rnn


# -----------------------------------------------------------------------------
# Pure-JAX f32 reference mirroring the PyTorch module
# -----------------------------------------------------------------------------
def model_n_reference(x, params):
    b, f, _, _, _ = x.shape
    hp = jax.lax.Precision.HIGHEST

    def conv(frame):
        y = jax.lax.conv_general_dilated(
            frame, params["conv_w"], window_strides=(1, 1), padding="VALID",
            dimension_numbers=("NCHW", "OIHW", "NCHW"), precision=hp)
        return y + params["conv_b"][None, :, None, None]

    out_conv = jnp.stack([conv(x[:, i]) for i in range(f)], axis=1)
    out_flat = jnp.maximum(out_conv.reshape(b, f, -1), 0.0)

    xs = out_flat.transpose(1, 0, 2)                      # (F, B, K)

    def step(hx, x_t):
        pre = (jnp.dot(x_t, params["w_ih"].T, precision=hp) + params["b_ih"]
               + jnp.dot(hx, params["w_hh"].T, precision=hp) + params["b_hh"])
        hx = jnp.maximum(pre, 0.0)
        return hx, hx

    h0 = jnp.zeros((b, params["w_hh"].shape[0]), jnp.float32)
    _, out_rnn = jax.lax.scan(step, h0, xs)               # (F, B, H)
    out_fc = jnp.dot(out_rnn, params["fc_w"].T, precision=hp) + params["fc_b"]
    return (out_fc.transpose(1, 0, 2), out_conv, out_flat,
            out_rnn.transpose(1, 0, 2))


if __name__ == "__main__":
    # Spatial must be 32x32: the module hard-codes RNN input_size = 27*27*16.
    batch, frames = 8, 4
    height = width = 32
    input_size = 27 * 27 * N_KERNELS

    key = jax.random.PRNGKey(0)
    ks = jax.random.split(key, 9)

    kconv = 1.0 / math.sqrt(IN_CHANNELS * CONV_KSIZE * CONV_KSIZE)
    kfc = 1.0 / math.sqrt(RNN_UNITS)

    params = dict(
        conv_w=jax.random.uniform(ks[0], (N_KERNELS, IN_CHANNELS, CONV_KSIZE,
                                          CONV_KSIZE), jnp.float32, -kconv, kconv),
        conv_b=jax.random.uniform(ks[1], (N_KERNELS,), jnp.float32, -kconv, kconv),
        # SimpleRNN_n.reset_parameters(): uniform(-0.1, 0.1)
        w_ih=jax.random.uniform(ks[2], (RNN_UNITS, input_size), jnp.float32,
                                -0.1, 0.1),
        w_hh=jax.random.uniform(ks[3], (RNN_UNITS, RNN_UNITS), jnp.float32,
                                -0.1, 0.1),
        b_ih=jax.random.uniform(ks[4], (RNN_UNITS,), jnp.float32, -0.1, 0.1),
        b_hh=jax.random.uniform(ks[5], (RNN_UNITS,), jnp.float32, -0.1, 0.1),
        fc_w=jax.random.uniform(ks[6], (FC_OUT, RNN_UNITS), jnp.float32, -kfc, kfc),
        fc_b=jax.random.uniform(ks[7], (FC_OUT,), jnp.float32, -kfc, kfc),
    )

    x = jax.random.normal(ks[8], (batch, frames, IN_CHANNELS, height, width),
                          jnp.float32)

    fwd = jax.jit(model_n_forward)
    outs = jax.block_until_ready(fwd(x, params))
    out_fc, out_conv, out_flat, out_rnn = outs

    assert out_fc.shape == (batch, frames, FC_OUT)
    assert out_conv.shape == (batch, frames, N_KERNELS, 27, 27)
    assert out_flat.shape == (batch, frames, input_size)
    assert out_rnn.shape == (batch, frames, RNN_UNITS)

    ref_fc, ref_conv, ref_flat, ref_rnn = model_n_reference(x, params)
    # bf16 matmul operands vs f32 reference: conv error ~3e-3 max; the RNN sees
    # that propagated through an 11664-wide f32 contraction -> ~3e-2 max.
    assert jnp.allclose(out_conv, ref_conv, atol=2e-2, rtol=2e-2)
    assert jnp.allclose(out_flat, ref_flat, atol=2e-2, rtol=2e-2)
    assert jnp.allclose(out_rnn, ref_rnn, atol=5e-2, rtol=5e-2)
    assert jnp.allclose(out_fc, ref_fc, atol=5e-2, rtol=5e-2)

    print("KERNEL_OK")
</pallas_src>

<mosaic_0001>
module attributes {stable_mosaic.version = 11 : i64} {
  func.func @_conv_mm_kernel(%arg0: i32, %arg1: memref<8x72x729xbf16, #tpu.memory_space<vmem>>, %arg2: memref<16x72xbf16, #tpu.memory_space<vmem>>, %arg3: memref<16x1xf32, #tpu.memory_space<vmem>>, %arg4: memref<8x16x729xf32, #tpu.memory_space<vmem>>, %arg5: memref<8x16x729xf32, #tpu.memory_space<vmem>>) attributes {dimension_semantics = [#tpu.dimension_semantics<parallel>], iteration_bounds = array<i64: 4>, scalar_prefetch = 0 : i64, scratch_operands = 0 : i64, tpu.core_type = #tpu.core_type<tc>, window_params = [{transform_indices = @transform_0, window_bounds = array<i64: 8, 72, 729>}, {pipeline_mode = #tpu.pipeline_mode<synchronous>, transform_indices = @transform_1, window_bounds = array<i64: 16, 72>}, {pipeline_mode = #tpu.pipeline_mode<synchronous>, transform_indices = @transform_2, window_bounds = array<i64: 16, 1>}, {transform_indices = @transform_3, window_bounds = array<i64: 8, 16, 729>}, {transform_indices = @transform_4, window_bounds = array<i64: 8, 16, 729>}]} {
    %c0 = arith.constant 0 : index
    %c0_0 = arith.constant 0 : index
    %0 = vector.load %arg2[%c0, %c0_0] : memref<16x72xbf16, #tpu.memory_space<vmem>>, vector<16x72xbf16>
    %c0_1 = arith.constant 0 : index
    %c0_2 = arith.constant 0 : index
    %1 = vector.load %arg3[%c0_1, %c0_2] : memref<16x1xf32, #tpu.memory_space<vmem>>, vector<16x1xf32>
    %c0_3 = arith.constant 0 : index
    %c0_4 = arith.constant 0 : index
    %c0_5 = arith.constant 0 : index
    %2 = vector.load %arg1[%c0_3, %c0_4, %c0_5] : memref<8x72x729xbf16, #tpu.memory_space<vmem>>, vector<1x72x729xbf16>
    %3 = vector.shape_cast %2 : vector<1x72x729xbf16> to vector<72x729xbf16>
    %cst = arith.constant dense<0.000000e+00> : vector<16x729xf32>
    %4 = tpu.matmul %0, %3, %cst {dimension_numbers = #tpu.dot_dimension_numbers<[1], [0], [0], [1], [0, 0, 1, 1], [], []>} : vector<16x72xbf16>, vector<72x729xbf16>, vector<16x729xf32> -> vector<16x729xf32>
    %5 = vector.broadcast %1 : vector<16x1xf32> to vector<16x729xf32>
    %6 = arith.addf %4, %5 : vector<16x729xf32>
    %c0_6 = arith.constant 0 : index
    %c0_7 = arith.constant 0 : index
    %c0_8 = arith.constant 0 : index
    %7 = vector.load %arg4[%c0_6, %c0_7, %c0_8] : memref<8x16x729xf32, #tpu.memory_space<vmem>>, vector<1x16x729xf32>
    %8 = vector.shape_cast %7 : vector<1x16x729xf32> to vector<16x729xf32>
    %9 = vector.shape_cast %6 : vector<16x729xf32> to vector<1x16x729xf32>
    tpu.vector_store %arg4[%c0_6, %c0_7, %c0_8], %9 {strides = array<i32>} : memref<8x16x729xf32, #tpu.memory_space<vmem>>, vector<1x16x729xf32>,
    %cst_9 = arith.constant 0.000000e+00 : f32
    %10 = vector.broadcast %cst_9 : f32 to vector<16x729xf32>
    %11 = arith.maximumf %6, %10 : vector<16x729xf32>
    %c0_10 = arith.constant 0 : index
    %c0_11 = arith.constant 0 : index
    %c0_12 = arith.constant 0 : index
    %12 = vector.load %arg5[%c0_10, %c0_11, %c0_12] : memref<8x16x729xf32, #tpu.memory_space<vmem>>, vector<1x16x729xf32>
    %13 = vector.shape_cast %12 : vector<1x16x729xf32> to vector<16x729xf32>
    %14 = vector.shape_cast %11 : vector<16x729xf32> to vector<1x16x729xf32>
    tpu.vector_store %arg5[%c0_10, %c0_11, %c0_12], %14 {strides = array<i32>} : memref<8x16x729xf32, #tpu.memory_space<vmem>>, vector<1x16x729xf32>,
    %c1 = arith.constant 1 : index
    %c0_13 = arith.constant 0 : index
    %c0_14 = arith.constant 0 : index
    %15 = vector.load %arg1[%c1, %c0_13, %c0_14] : memref<8x72x729xbf16, #tpu.memory_space<vmem>>, vector<1x72x729xbf16>
    %16 = vector.shape_cast %15 : vector<1x72x729xbf16> to vector<72x729xbf16>
    %cst_15 = arith.constant dense<0.000000e+00> : vector<16x729xf32>
    %17 = tpu.matmul %0, %16, %cst_15 {dimension_numbers = #tpu.dot_dimension_numbers<[1], [0], [0], [1], [0, 0, 1, 1], [], []>} : vector<16x72xbf16>, vector<72x729xbf16>, vector<16x729xf32> -> vector<16x729xf32>
    %18 = vector.broadcast %1 : vector<16x1xf32> to vector<16x729xf32>
    %19 = arith.addf %17, %18 : vector<16x729xf32>
    %c1_16 = arith.constant 1 : index
    %c0_17 = arith.constant 0 : index
    %c0_18 = arith.constant 0 : index
    %20 = vector.load %arg4[%c1_16, %c0_17, %c0_18] : memref<8x16x729xf32, #tpu.memory_space<vmem>>, vector<1x16x729xf32>
    %21 = vector.shape_cast %20 : vector<1x16x729xf32> to vector<16x729xf32>
    %22 = vector.shape_cast %19 : vector<16x729xf32> to vector<1x16x729xf32>
    tpu.vector_store %arg4[%c1_16, %c0_17, %c0_18], %22 {strides = array<i32>} : memref<8x16x729xf32, #tpu.memory_space<vmem>>, vector<1x16x729xf32>,
    %cst_19 = arith.constant 0.000000e+00 : f32
    %23 = vector.broadcast %cst_19 : f32 to vector<16x729xf32>
    %24 = arith.maximumf %19, %23 : vector<16x729xf32>
    %c1_20 = arith.constant 1 : index
    %c0_21 = arith.constant 0 : index
    %c0_22 = arith.constant 0 : index
    %25 = vector.load %arg5[%c1_20, %c0_21, %c0_22] : memref<8x16x729xf32, #tpu.memory_space<vmem>>, vector<1x16x729xf32>
    %26 = vector.shape_cast %25 : vector<1x16x729xf32> to vector<16x729xf32>
    %27 = vector.shape_cast %24 : vector<16x729xf32> to vector<1x16x729xf32>
    tpu.vector_store %arg5[%c1_20, %c0_21, %c0_22], %27 {strides = array<i32>} : memref<8x16x729xf32, #tpu.memory_space<vmem>>, vector<1x16x729xf32>,
    %c2 = arith.constant 2 : index
    %c0_23 = arith.constant 0 : index
    %c0_24 = arith.constant 0 : index
    %28 = vector.load %arg1[%c2, %c0_23, %c0_24] : memref<8x72x729xbf16, #tpu.memory_space<vmem>>, vector<1x72x729xbf16>
    %29 = vector.shape_cast %28 : vector<1x72x729xbf16> to vector<72x729xbf16>
    %cst_25 = arith.constant dense<0.000000e+00> : vector<16x729xf32>
    %30 = tpu.matmul %0, %29, %cst_25 {dimension_numbers = #tpu.dot_dimension_numbers<[1], [0], [0], [1], [0, 0, 1, 1], [], []>} : vector<16x72xbf16>, vector<72x729xbf16>, vector<16x729xf32> -> vector<16x729xf32>
    %31 = vector.broadcast %1 : vector<16x1xf32> to vector<16x729xf32>
    %32 = arith.addf %30, %31 : vector<16x729xf32>
    %c2_26 = arith.constant 2 : index
    %c0_27 = arith.constant 0 : index
    %c0_28 = arith.constant 0 : index
    %33 = vector.load %arg4[%c2_26, %c0_27, %c0_28] : memref<8x16x729xf32, #tpu.memory_space<vmem>>, vector<1x16x729xf32>
    %34 = vector.shape_cast %33 : vector<1x16x729xf32> to vector<16x729xf32>
    %35 = vector.shape_cast %32 : vector<16x729xf32> to vector<1x16x729xf32>
    tpu.vector_store %arg4[%c2_26, %c0_27, %c0_28], %35 {strides = array<i32>} : memref<8x16x729xf32, #tpu.memory_space<vmem>>, vector<1x16x729xf32>,
    %cst_29 = arith.constant 0.000000e+00 : f32
    %36 = vector.broadcast %cst_29 : f32 to vector<16x729xf32>
    %37 = arith.maximumf %32, %36 : vector<16x729xf32>
    %c2_30 = arith.constant 2 : index
    %c0_31 = arith.constant 0 : index
    %c0_32 = arith.constant 0 : index
    %38 = vector.load %arg5[%c2_30, %c0_31, %c0_32] : memref<8x16x729xf32, #tpu.memory_space<vmem>>, vector<1x16x729xf32>
    %39 = vector.shape_cast %38 : vector<1x16x729xf32> to vector<16x729xf32>
    %40 = vector.shape_cast %37 : vector<16x729xf32> to vector<1x16x729xf32>
    tpu.vector_store %arg5[%c2_30, %c0_31, %c0_32], %40 {strides = array<i32>} : memref<8x16x729xf32, #tpu.memory_space<vmem>>, vector<1x16x729xf32>,
    %c3 = arith.constant 3 : index
    %c0_33 = arith.constant 0 : index
    %c0_34 = arith.constant 0 : index
    %41 = vector.load %arg1[%c3, %c0_33, %c0_34] : memref<8x72x729xbf16, #tpu.memory_space<vmem>>, vector<1x72x729xbf16>
    %42 = vector.shape_cast %41 : vector<1x72x729xbf16> to vector<72x729xbf16>
    %cst_35 = arith.constant dense<0.000000e+00> : vector<16x729xf32>
    %43 = tpu.matmul %0, %42, %cst_35 {dimension_numbers = #tpu.dot_dimension_numbers<[1], [0], [0], [1], [0, 0, 1, 1], [], []>} : vector<16x72xbf16>, vector<72x729xbf16>, vector<16x729xf32> -> vector<16x729xf32>
    %44 = vector.broadcast %1 : vector<16x1xf32> to vector<16x729xf32>
    %45 = arith.addf %43, %44 : vector<16x729xf32>
    %c3_36 = arith.constant 3 : index
    %c0_37 = arith.constant 0 : index
    %c0_38 = arith.constant 0 : index
    %46 = vector.load %arg4[%c3_36, %c0_37, %c0_38] : memref<8x16x729xf32, #tpu.memory_space<vmem>>, vector<1x16x729xf32>
    %47 = vector.shape_cast %46 : vector<1x16x729xf32> to vector<16x729xf32>
    %48 = vector.shape_cast %45 : vector<16x729xf32> to vector<1x16x729xf32>
    tpu.vector_store %arg4[%c3_36, %c0_37, %c0_38], %48 {strides = array<i32>} : memref<8x16x729xf32, #tpu.memory_space<vmem>>, vector<1x16x729xf32>,
    %cst_39 = arith.constant 0.000000e+00 : f32
    %49 = vector.broadcast %cst_39 : f32 to vector<16x729xf32>
    %50 = arith.maximumf %45, %49 : vector<16x729xf32>
    %c3_40 = arith.constant 3 : index
    %c0_41 = arith.constant 0 : index
    %c0_42 = arith.constant 0 : index
    %51 = vector.load %arg5[%c3_40, %c0_41, %c0_42] : memref<8x16x729xf32, #tpu.memory_space<vmem>>, vector<1x16x729xf32>
    %52 = vector.shape_cast %51 : vector<1x16x729xf32> to vector<16x729xf32>
    %53 = vector.shape_cast %50 : vector<16x729xf32> to vector<1x16x729xf32>
    tpu.vector_store %arg5[%c3_40, %c0_41, %c0_42], %53 {strides = array<i32>} : memref<8x16x729xf32, #tpu.memory_space<vmem>>, vector<1x16x729xf32>,
    %c4 = arith.constant 4 : index
    %c0_43 = arith.constant 0 : index
    %c0_44 = arith.constant 0 : index
    %54 = vector.load %arg1[%c4, %c0_43, %c0_44] : memref<8x72x729xbf16, #tpu.memory_space<vmem>>, vector<1x72x729xbf16>
    %55 = vector.shape_cast %54 : vector<1x72x729xbf16> to vector<72x729xbf16>
    %cst_45 = arith.constant dense<0.000000e+00> : vector<16x729xf32>
    %56 = tpu.matmul %0, %55, %cst_45 {dimension_numbers = #tpu.dot_dimension_numbers<[1], [0], [0], [1], [0, 0, 1, 1], [], []>} : vector<16x72xbf16>, vector<72x729xbf16>, vector<16x729xf32> -> vector<16x729xf32>
    %57 = vector.broadcast %1 : vector<16x1xf32> to vector<16x729xf32>
    %58 = arith.addf %56, %57 : vector<16x729xf32>
    %c4_46 = arith.constant 4 : index
    %c0_47 = arith.constant 0 : index
    %c0_48 = arith.constant 0 : index
    %59 = vector.load %arg4[%c4_46, %c0_47, %c0_48] : memref<8x16x729xf32, #tpu.memory_space<vmem>>, vector<1x16x729xf32>
    %60 = vector.shape_cast %59 : vector<1x16x729xf32> to vector<16x729xf32>
    %61 = vector.shape_cast %58 : vector<16x729xf32> to vector<1x16x729xf32>
    tpu.vector_store %arg4[%c4_46, %c0_47, %c0_48], %61 {strides = array<i32>} : memref<8x16x729xf32, #tpu.memory_space<vmem>>, vector<1x16x729xf32>,
    %cst_49 = arith.constant 0.000000e+00 : f32
    %62 = vector.broadcast %cst_49 : f32 to vector<16x729xf32>
    %63 = arith.maximumf %58, %62 : vector<16x729xf32>
    %c4_50 = arith.constant 4 : index
    %c0_51 = arith.constant 0 : index
    %c0_52 = arith.constant 0 : index
    %64 = vector.load %arg5[%c4_50, %c0_51, %c0_52] : memref<8x16x729xf32, #tpu.memory_space<vmem>>, vector<1x16x729xf32>
    %65 = vector.shape_cast %64 : vector<1x16x729xf32> to vector<16x729xf32>
    %66 = vector.shape_cast %63 : vector<16x729xf32> to vector<1x16x729xf32>
    tpu.vector_store %arg5[%c4_50, %c0_51, %c0_52], %66 {strides = array<i32>} : memref<8x16x729xf32, #tpu.memory_space<vmem>>, vector<1x16x729xf32>,
    %c5 = arith.constant 5 : index
    %c0_53 = arith.constant 0 : index
    %c0_54 = arith.constant 0 : index
    %67 = vector.load %arg1[%c5, %c0_53, %c0_54] : memref<8x72x729xbf16, #tpu.memory_space<vmem>>, vector<1x72x729xbf16>
    %68 = vector.shape_cast %67 : vector<1x72x729xbf16> to vector<72x729xbf16>
    %cst_55 = arith.constant dense<0.000000e+00> : vector<16x729xf32>
    %69 = tpu.matmul %0, %68, %cst_55 {dimension_numbers = #tpu.dot_dimension_numbers<[1], [0], [0], [1], [0, 0, 1, 1], [], []>} : vector<16x72xbf16>, vector<72x729xbf16>, vector<16x729xf32> -> vector<16x729xf32>
    %70 = vector.broadcast %1 : vector<16x1xf32> to vector<16x729xf32>
    %71 = arith.addf %69, %70 : vector<16x729xf32>
    %c5_56 = arith.constant 5 : index
    %c0_57 = arith.constant 0 : index
    %c0_58 = arith.constant 0 : index
    %72 = vector.load %arg4[%c5_56, %c0_57, %c0_58] : memref<8x16x729xf32, #tpu.memory_space<vmem>>, vector<1x16x729xf32>
    %73 = vector.shape_cast %72 : vector<1x16x729xf32> to vector<16x729xf32>
    %74 = vector.shape_cast %71 : vector<16x729xf32> to vector<1x16x729xf32>
    tpu.vector_store %arg4[%c5_56, %c0_57, %c0_58], %74 {strides = array<i32>} : memref<8x16x729xf32, #tpu.memory_space<vmem>>, vector<1x16x729xf32>,
    %cst_59 = arith.constant 0.000000e+00 : f32
    %75 = vector.broadcast %cst_59 : f32 to vector<16x729xf32>
    %76 = arith.maximumf %71, %75 : vector<16x729xf32>
    %c5_60 = arith.constant 5 : index
    %c0_61 = arith.constant 0 : index
    %c0_62 = arith.constant 0 : index
    %77 = vector.load %arg5[%c5_60, %c0_61, %c0_62] : memref<8x16x729xf32, #tpu.memory_space<vmem>>, vector<1x16x729xf32>
    %78 = vector.shape_cast %77 : vector<1x16x729xf32> to vector<16x729xf32>
    %79 = vector.shape_cast %76 : vector<16x729xf32> to vector<1x16x729xf32>
    tpu.vector_store %arg5[%c5_60, %c0_61, %c0_62], %79 {strides = array<i32>} : memref<8x16x729xf32, #tpu.memory_space<vmem>>, vector<1x16x729xf32>,
    %c6 = arith.constant 6 : index
    %c0_63 = arith.constant 0 : index
    %c0_64 = arith.constant 0 : index
    %80 = vector.load %arg1[%c6, %c0_63, %c0_64] : memref<8x72x729xbf16, #tpu.memory_space<vmem>>, vector<1x72x729xbf16>
    %81 = vector.shape_cast %80 : vector<1x72x729xbf16> to vector<72x729xbf16>
    %cst_65 = arith.constant dense<0.000000e+00> : vector<16x729xf32>
    %82 = tpu.matmul %0, %81, %cst_65 {dimension_numbers = #tpu.dot_dimension_numbers<[1], [0], [0], [1], [0, 0, 1, 1], [], []>} : vector<16x72xbf16>, vector<72x729xbf16>, vector<16x729xf32> -> vector<16x729xf32>
    %83 = vector.broadcast %1 : vector<16x1xf32> to vector<16x729xf32>
    %84 = arith.addf %82, %83 : vector<16x729xf32>
    %c6_66 = arith.constant 6 : index
    %c0_67 = arith.constant 0 : index
    %c0_68 = arith.constant 0 : index
    %85 = vector.load %arg4[%c6_66, %c0_67, %c0_68] : memref<8x16x729xf32, #tpu.memory_space<vmem>>, vector<1x16x729xf32>
    %86 = vector.shape_cast %85 : vector<1x16x729xf32> to vector<16x729xf32>
    %87 = vector.shape_cast %84 : vector<16x729xf32> to vector<1x16x729xf32>
    tpu.vector_store %arg4[%c6_66, %c0_67, %c0_68], %87 {strides = array<i32>} : memref<8x16x729xf32, #tpu.memory_space<vmem>>, vector<1x16x729xf32>,
    %cst_69 = arith.constant 0.000000e+00 : f32
    %88 = vector.broadcast %cst_69 : f32 to vector<16x729xf32>
    %89 = arith.maximumf %84, %88 : vector<16x729xf32>
    %c6_70 = arith.constant 6 : index
    %c0_71 = arith.constant 0 : index
    %c0_72 = arith.constant 0 : index
    %90 = vector.load %arg5[%c6_70, %c0_71, %c0_72] : memref<8x16x729xf32, #tpu.memory_space<vmem>>, vector<1x16x729xf32>
    %91 = vector.shape_cast %90 : vector<1x16x729xf32> to vector<16x729xf32>
    %92 = vector.shape_cast %89 : vector<16x729xf32> to vector<1x16x729xf32>
    tpu.vector_store %arg5[%c6_70, %c0_71, %c0_72], %92 {strides = array<i32>} : memref<8x16x729xf32, #tpu.memory_space<vmem>>, vector<1x16x729xf32>,
    %c7 = arith.constant 7 : index
    %c0_73 = arith.constant 0 : index
    %c0_74 = arith.constant 0 : index
    %93 = vector.load %arg1[%c7, %c0_73, %c0_74] : memref<8x72x729xbf16, #tpu.memory_space<vmem>>, vector<1x72x729xbf16>
    %94 = vector.shape_cast %93 : vector<1x72x729xbf16> to vector<72x729xbf16>
    %cst_75 = arith.constant dense<0.000000e+00> : vector<16x729xf32>
    %95 = tpu.matmul %0, %94, %cst_75 {dimension_numbers = #tpu.dot_dimension_numbers<[1], [0], [0], [1], [0, 0, 1, 1], [], []>} : vector<16x72xbf16>, vector<72x729xbf16>, vector<16x729xf32> -> vector<16x729xf32>
    %96 = vector.broadcast %1 : vector<16x1xf32> to vector<16x729xf32>
    %97 = arith.addf %95, %96 : vector<16x729xf32>
    %c7_76 = arith.constant 7 : index
    %c0_77 = arith.constant 0 : index
    %c0_78 = arith.constant 0 : index
    %98 = vector.load %arg4[%c7_76, %c0_77, %c0_78] : memref<8x16x729xf32, #tpu.memory_space<vmem>>, vector<1x16x729xf32>
    %99 = vector.shape_cast %98 : vector<1x16x729xf32> to vector<16x729xf32>
    %100 = vector.shape_cast %97 : vector<16x729xf32> to vector<1x16x729xf32>
    tpu.vector_store %arg4[%c7_76, %c0_77, %c0_78], %100 {strides = array<i32>} : memref<8x16x729xf32, #tpu.memory_space<vmem>>, vector<1x16x729xf32>,
    %cst_79 = arith.constant 0.000000e+00 : f32
    %101 = vector.broadcast %cst_79 : f32 to vector<16x729xf32>
    %102 = arith.maximumf %97, %101 : vector<16x729xf32>
    %c7_80 = arith.constant 7 : index
    %c0_81 = arith.constant 0 : index
    %c0_82 = arith.constant 0 : index
    %103 = vector.load %arg5[%c7_80, %c0_81, %c0_82] : memref<8x16x729xf32, #tpu.memory_space<vmem>>, vector<1x16x729xf32>
    %104 = vector.shape_cast %103 : vector<1x16x729xf32> to vector<16x729xf32>
    %105 = vector.shape_cast %102 : vector<16x729xf32> to vector<1x16x729xf32>
    tpu.vector_store %arg5[%c7_80, %c0_81, %c0_82], %105 {strides = array<i32>} : memref<8x16x729xf32, #tpu.memory_space<vmem>>, vector<1x16x729xf32>,
    return
  }
  func.func @transform_0(%arg0: i32) -> (i32, i32, i32) {
    %c0_i32 = arith.constant 0 : i32
    %c0_i32_0 = arith.constant 0 : i32
    %c0_i32_1 = arith.constant 0 : i32
    return %arg0, %c0_i32, %c0_i32_0 : i32, i32, i32
  }
  func.func @transform_1(%arg0: i32) -> (i32, i32) {
    %c0_i32 = arith.constant 0 : i32
    %c0_i32_0 = arith.constant 0 : i32
    %c0_i32_1 = arith.constant 0 : i32
    return %c0_i32, %c0_i32_0 : i32, i32
  }
  func.func @transform_2(%arg0: i32) -> (i32, i32) {
    %c0_i32 = arith.constant 0 : i32
    %c0_i32_0 = arith.constant 0 : i32
    %c0_i32_1 = arith.constant 0 : i32
    return %c0_i32, %c0_i32_0 : i32, i32
  }
  func.func @transform_3(%arg0: i32) -> (i32, i32, i32) {
    %c0_i32 = arith.constant 0 : i32
    %c0_i32_0 = arith.constant 0 : i32
    %c0_i32_1 = arith.constant 0 : i32
    return %arg0, %c0_i32, %c0_i32_0 : i32, i32, i32
  }
  func.func @transform_4(%arg0: i32) -> (i32, i32, i32) {
    %c0_i32 = arith.constant 0 : i32
    %c0_i32_0 = arith.constant 0 : i32
    %c0_i32_1 = arith.constant 0 : i32
    return %arg0, %c0_i32, %c0_i32_0 : i32, i32, i32
  }
}

module attributes {stable_mosaic.version = 11 : i64} {
  func.func @_rnn_fc_kernel(%arg0: memref<32x11664xf32, #tpu.memory_space<vmem>>, %arg1: memref<16x11664xf32, #tpu.memory_space<vmem>>, %arg2: memref<16x16xf32, #tpu.memory_space<vmem>>, %arg3: memref<1x16xf32, #tpu.memory_space<vmem>>, %arg4: memref<2x16xf32, #tpu.memory_space<vmem>>, %arg5: memref<1x2xf32, #tpu.memory_space<vmem>>, %arg6: memref<32x16xf32, #tpu.memory_space<vmem>>, %arg7: memref<32x2xf32, #tpu.memory_space<vmem>>, %arg8: memref<32x16xf32, #tpu.memory_space<vmem>>) attributes {dimension_semantics = [], scalar_prefetch = 0 : i64, scratch_operands = 1 : i64, tpu.core_type = #tpu.core_type<tc>} {
    %c0 = arith.constant 0 : index
    %c0_0 = arith.constant 0 : index
    %0 = vector.load %arg0[%c0, %c0_0] : memref<32x11664xf32, #tpu.memory_space<vmem>>, vector<32x11664xf32>
    %c0_1 = arith.constant 0 : index
    %c0_2 = arith.constant 0 : index
    %1 = vector.load %arg1[%c0_1, %c0_2] : memref<16x11664xf32, #tpu.memory_space<vmem>>, vector<16x11664xf32>
    %cst = arith.constant dense<0.000000e+00> : vector<32x16xf32>
    %2 = tpu.matmul %0, %1, %cst {dimension_numbers = #tpu.dot_dimension_numbers<[1], [1], [0], [0], [0, 0, 1, 0], [], []>} : vector<32x11664xf32>, vector<16x11664xf32>, vector<32x16xf32> -> vector<32x16xf32>
    %c0_3 = arith.constant 0 : index
    %c0_4 = arith.constant 0 : index
    %3 = vector.load %arg3[%c0_3, %c0_4] : memref<1x16xf32, #tpu.memory_space<vmem>>, vector<1x16xf32>
    %4 = vector.broadcast %3 : vector<1x16xf32> to vector<32x16xf32>
    %5 = arith.addf %2, %4 : vector<32x16xf32>
    %c0_5 = arith.constant 0 : index
    %c0_6 = arith.constant 0 : index
    %6 = vector.load %arg8[%c0_5, %c0_6] : memref<32x16xf32, #tpu.memory_space<vmem>>, vector<32x16xf32>
    tpu.vector_store %arg8[%c0_5, %c0_6], %5 {strides = array<i32>} : memref<32x16xf32, #tpu.memory_space<vmem>>, vector<32x16xf32>,
    %c0_7 = arith.constant 0 : index
    %c0_8 = arith.constant 0 : index
    %7 = vector.load %arg2[%c0_7, %c0_8] : memref<16x16xf32, #tpu.memory_space<vmem>>, vector<16x16xf32>
    %cst_9 = arith.constant 0.000000e+00 : f32
    %8 = vector.broadcast %cst_9 : f32 to vector<8x16xf32>
    %c0_10 = arith.constant 0 : index
    %c0_11 = arith.constant 0 : index
    %9 = vector.load %arg8[%c0_10, %c0_11] : memref<32x16xf32, #tpu.memory_space<vmem>>, vector<1x16xf32>
    %c4 = arith.constant 4 : index
    %c0_12 = arith.constant 0 : index
    %10 = vector.load %arg8[%c4, %c0_12] : memref<32x16xf32, #tpu.memory_space<vmem>>, vector<1x16xf32>
    %c8 = arith.constant 8 : index
    %c0_13 = arith.constant 0 : index
    %11 = vector.load %arg8[%c8, %c0_13] : memref<32x16xf32, #tpu.memory_space<vmem>>, vector<1x16xf32>
    %c12 = arith.constant 12 : index
    %c0_14 = arith.constant 0 : index
    %12 = vector.load %arg8[%c12, %c0_14] : memref<32x16xf32, #tpu.memory_space<vmem>>, vector<1x16xf32>
    %c16 = arith.constant 16 : index
    %c0_15 = arith.constant 0 : index
    %13 = vector.load %arg8[%c16, %c0_15] : memref<32x16xf32, #tpu.memory_space<vmem>>, vector<1x16xf32>
    %c20 = arith.constant 20 : index
    %c0_16 = arith.constant 0 : index
    %14 = vector.load %arg8[%c20, %c0_16] : memref<32x16xf32, #tpu.memory_space<vmem>>, vector<1x16xf32>
    %c24 = arith.constant 24 : index
    %c0_17 = arith.constant 0 : index
    %15 = vector.load %arg8[%c24, %c0_17] : memref<32x16xf32, #tpu.memory_space<vmem>>, vector<1x16xf32>
    %c28 = arith.constant 28 : index
    %c0_18 = arith.constant 0 : index
    %16 = vector.load %arg8[%c28, %c0_18] : memref<32x16xf32, #tpu.memory_space<vmem>>, vector<1x16xf32>
    %17 = tpu.concatenate %9, %10, %11, %12, %13, %14, %15, %16 in 0 : vector<1x16xf32>, vector<1x16xf32>, vector<1x16xf32>, vector<1x16xf32>, vector<1x16xf32>, vector<1x16xf32>, vector<1x16xf32>, vector<1x16xf32> -> vector<8x16xf32>
    %cst_19 = arith.constant dense<0.000000e+00> : vector<8x16xf32>
    %18 = tpu.matmul %8, %7, %cst_19 {dimension_numbers = #tpu.dot_dimension_numbers<[1], [1], [0], [0], [0, 0, 1, 0], [], []>} : vector<8x16xf32>, vector<16x16xf32>, vector<8x16xf32> -> vector<8x16xf32>
    %19 = arith.addf %17, %18 : vector<8x16xf32>
    %cst_20 = arith.constant 0.000000e+00 : f32
    %20 = vector.broadcast %cst_20 : f32 to vector<8x16xf32>
    %21 = arith.maximumf %19, %20 : vector<8x16xf32>
    %22 = vector.extract_strided_slice %21 {offsets = [0, 0], sizes = [1, 16], strides = [1, 1]} : vector<8x16xf32> to vector<1x16xf32>
    %c0_21 = arith.constant 0 : index
    %c0_22 = arith.constant 0 : index
    %23 = vector.load %arg6[%c0_21, %c0_22] : memref<32x16xf32, #tpu.memory_space<vmem>>, vector<1x16xf32>
    tpu.vector_store %arg6[%c0_21, %c0_22], %22 {strides = array<i32>} : memref<32x16xf32, #tpu.memory_space<vmem>>, vector<1x16xf32>,
    %24 = vector.extract_strided_slice %21 {offsets = [1, 0], sizes = [1, 16], strides = [1, 1]} : vector<8x16xf32> to vector<1x16xf32>
    %c4_23 = arith.constant 4 : index
    %c0_24 = arith.constant 0 : index
    %25 = vector.load %arg6[%c4_23, %c0_24] : memref<32x16xf32, #tpu.memory_space<vmem>>, vector<1x16xf32>
    tpu.vector_store %arg6[%c4_23, %c0_24], %24 {strides = array<i32>} : memref<32x16xf32, #tpu.memory_space<vmem>>, vector<1x16xf32>,
    %26 = vector.extract_strided_slice %21 {offsets = [2, 0], sizes = [1, 16], strides = [1, 1]} : vector<8x16xf32> to vector<1x16xf32>
    %c8_25 = arith.constant 8 : index
    %c0_26 = arith.constant 0 : index
    %27 = vector.load %arg6[%c8_25, %c0_26] : memref<32x16xf32, #tpu.memory_space<vmem>>, vector<1x16xf32>
    tpu.vector_store %arg6[%c8_25, %c0_26], %26 {strides = array<i32>} : memref<32x16xf32, #tpu.memory_space<vmem>>, vector<1x16xf32>,
    %28 = vector.extract_strided_slice %21 {offsets = [3, 0], sizes = [1, 16], strides = [1, 1]} : vector<8x16xf32> to vector<1x16xf32>
    %c12_27 = arith.constant 12 : index
    %c0_28 = arith.constant 0 : index
    %29 = vector.load %arg6[%c12_27, %c0_28] : memref<32x16xf32, #tpu.memory_space<vmem>>, vector<1x16xf32>
    tpu.vector_store %arg6[%c12_27, %c0_28], %28 {strides = array<i32>} : memref<32x16xf32, #tpu.memory_space<vmem>>, vector<1x16xf32>,
    %30 = vector.extract_strided_slice %21 {offsets = [4, 0], sizes = [1, 16], strides = [1, 1]} : vector<8x16xf32> to vector<1x16xf32>
    %c16_29 = arith.constant 16 : index
    %c0_30 = arith.constant 0 : index
    %31 = vector.load %arg6[%c16_29, %c0_30] : memref<32x16xf32, #tpu.memory_space<vmem>>, vector<1x16xf32>
    tpu.vector_store %arg6[%c16_29, %c0_30], %30 {strides = array<i32>} : memref<32x16xf32, #tpu.memory_space<vmem>>, vector<1x16xf32>,
    %32 = vector.extract_strided_slice %21 {offsets = [5, 0], sizes = [1, 16], strides = [1, 1]} : vector<8x16xf32> to vector<1x16xf32>
    %c20_31 = arith.constant 20 : index
    %c0_32 = arith.constant 0 : index
    %33 = vector.load %arg6[%c20_31, %c0_32] : memref<32x16xf32, #tpu.memory_space<vmem>>, vector<1x16xf32>
    tpu.vector_store %arg6[%c20_31, %c0_32], %32 {strides = array<i32>} : memref<32x16xf32, #tpu.memory_space<vmem>>, vector<1x16xf32>,
    %34 = vector.extract_strided_slice %21 {offsets = [6, 0], sizes = [1, 16], strides = [1, 1]} : vector<8x16xf32> to vector<1x16xf32>
    %c24_33 = arith.constant 24 : index
    %c0_34 = arith.constant 0 : index
    %35 = vector.load %arg6[%c24_33, %c0_34] : memref<32x16xf32, #tpu.memory_space<vmem>>, vector<1x16xf32>
    tpu.vector_store %arg6[%c24_33, %c0_34], %34 {strides = array<i32>} : memref<32x16xf32, #tpu.memory_space<vmem>>, vector<1x16xf32>,
    %36 = vector.extract_strided_slice %21 {offsets = [7, 0], sizes = [1, 16], strides = [1, 1]} : vector<8x16xf32> to vector<1x16xf32>
    %c28_35 = arith.constant 28 : index
    %c0_36 = arith.constant 0 : index
    %37 = vector.load %arg6[%c28_35, %c0_36] : memref<32x16xf32, #tpu.memory_space<vmem>>, vector<1x16xf32>
    tpu.vector_store %arg6[%c28_35, %c0_36], %36 {strides = array<i32>} : memref<32x16xf32, #tpu.memory_space<vmem>>, vector<1x16xf32>,
    %c1 = arith.constant 1 : index
    %c0_37 = arith.constant 0 : index
    %38 = vector.load %arg8[%c1, %c0_37] : memref<32x16xf32, #tpu.memory_space<vmem>>, vector<1x16xf32>
    %c5 = arith.constant 5 : index
    %c0_38 = arith.constant 0 : index
    %39 = vector.load %arg8[%c5, %c0_38] : memref<32x16xf32, #tpu.memory_space<vmem>>, vector<1x16xf32>
    %c9 = arith.constant 9 : index
    %c0_39 = arith.constant 0 : index
    %40 = vector.load %arg8[%c9, %c0_39] : memref<32x16xf32, #tpu.memory_space<vmem>>, vector<1x16xf32>
    %c13 = arith.constant 13 : index
    %c0_40 = arith.constant 0 : index
    %41 = vector.load %arg8[%c13, %c0_40] : memref<32x16xf32, #tpu.memory_space<vmem>>, vector<1x16xf32>
    %c17 = arith.constant 17 : index
    %c0_41 = arith.constant 0 : index
    %42 = vector.load %arg8[%c17, %c0_41] : memref<32x16xf32, #tpu.memory_space<vmem>>, vector<1x16xf32>
    %c21 = arith.constant 21 : index
    %c0_42 = arith.constant 0 : index
    %43 = vector.load %arg8[%c21, %c0_42] : memref<32x16xf32, #tpu.memory_space<vmem>>, vector<1x16xf32>
    %c25 = arith.constant 25 : index
    %c0_43 = arith.constant 0 : index
    %44 = vector.load %arg8[%c25, %c0_43] : memref<32x16xf32, #tpu.memory_space<vmem>>, vector<1x16xf32>
    %c29 = arith.constant 29 : index
    %c0_44 = arith.constant 0 : index
    %45 = vector.load %arg8[%c29, %c0_44] : memref<32x16xf32, #tpu.memory_space<vmem>>, vector<1x16xf32>
    %46 = tpu.concatenate %38, %39, %40, %41, %42, %43, %44, %45 in 0 : vector<1x16xf32>, vector<1x16xf32>, vector<1x16xf32>, vector<1x16xf32>, vector<1x16xf32>, vector<1x16xf32>, vector<1x16xf32>, vector<1x16xf32> -> vector<8x16xf32>
    %cst_45 = arith.constant dense<0.000000e+00> : vector<8x16xf32>
    %47 = tpu.matmul %21, %7, %cst_45 {dimension_numbers = #tpu.dot_dimension_numbers<[1], [1], [0], [0], [0, 0, 1, 0], [], []>} : vector<8x16xf32>, vector<16x16xf32>, vector<8x16xf32> -> vector<8x16xf32>
    %48 = arith.addf %46, %47 : vector<8x16xf32>
    %cst_46 = arith.constant 0.000000e+00 : f32
    %49 = vector.broadcast %cst_46 : f32 to vector<8x16xf32>
    %50 = arith.maximumf %48, %49 : vector<8x16xf32>
    %51 = vector.extract_strided_slice %50 {offsets = [0, 0], sizes = [1, 16], strides = [1, 1]} : vector<8x16xf32> to vector<1x16xf32>
    %c1_47 = arith.constant 1 : index
    %c0_48 = arith.constant 0 : index
    %52 = vector.load %arg6[%c1_47, %c0_48] : memref<32x16xf32, #tpu.memory_space<vmem>>, vector<1x16xf32>
    tpu.vector_store %arg6[%c1_47, %c0_48], %51 {strides = array<i32>} : memref<32x16xf32, #tpu.memory_space<vmem>>, vector<1x16xf32>,
    %53 = vector.extract_strided_slice %50 {offsets = [1, 0], sizes = [1, 16], strides = [1, 1]} : vector<8x16xf32> to vector<1x16xf32>
    %c5_49 = arith.constant 5 : index
    %c0_50 = arith.constant 0 : index
    %54 = vector.load %arg6[%c5_49, %c0_50] : memref<32x16xf32, #tpu.memory_space<vmem>>, vector<1x16xf32>
    tpu.vector_store %arg6[%c5_49, %c0_50], %53 {strides = array<i32>} : memref<32x16xf32, #tpu.memory_space<vmem>>, vector<1x16xf32>,
    %55 = vector.extract_strided_slice %50 {offsets = [2, 0], sizes = [1, 16], strides = [1, 1]} : vector<8x16xf32> to vector<1x16xf32>
    %c9_51 = arith.constant 9 : index
    %c0_52 = arith.constant 0 : index
    %56 = vector.load %arg6[%c9_51, %c0_52] : memref<32x16xf32, #tpu.memory_space<vmem>>, vector<1x16xf32>
    tpu.vector_store %arg6[%c9_51, %c0_52], %55 {strides = array<i32>} : memref<32x16xf32, #tpu.memory_space<vmem>>, vector<1x16xf32>,
    %57 = vector.extract_strided_slice %50 {offsets = [3, 0], sizes = [1, 16], strides = [1, 1]} : vector<8x16xf32> to vector<1x16xf32>
    %c13_53 = arith.constant 13 : index
    %c0_54 = arith.constant 0 : index
    %58 = vector.load %arg6[%c13_53, %c0_54] : memref<32x16xf32, #tpu.memory_space<vmem>>, vector<1x16xf32>
    tpu.vector_store %arg6[%c13_53, %c0_54], %57 {strides = array<i32>} : memref<32x16xf32, #tpu.memory_space<vmem>>, vector<1x16xf32>,
    %59 = vector.extract_strided_slice %50 {offsets = [4, 0], sizes = [1, 16], strides = [1, 1]} : vector<8x16xf32> to vector<1x16xf32>
    %c17_55 = arith.constant 17 : index
    %c0_56 = arith.constant 0 : index
    %60 = vector.load %arg6[%c17_55, %c0_56] : memref<32x16xf32, #tpu.memory_space<vmem>>, vector<1x16xf32>
    tpu.vector_store %arg6[%c17_55, %c0_56], %59 {strides = array<i32>} : memref<32x16xf32, #tpu.memory_space<vmem>>, vector<1x16xf32>,
    %61 = vector.extract_strided_slice %50 {offsets = [5, 0], sizes = [1, 16], strides = [1, 1]} : vector<8x16xf32> to vector<1x16xf32>
    %c21_57 = arith.constant 21 : index
    %c0_58 = arith.constant 0 : index
    %62 = vector.load %arg6[%c21_57, %c0_58] : memref<32x16xf32, #tpu.memory_space<vmem>>, vector<1x16xf32>
    tpu.vector_store %arg6[%c21_57, %c0_58], %61 {strides = array<i32>} : memref<32x16xf32, #tpu.memory_space<vmem>>, vector<1x16xf32>,
    %63 = vector.extract_strided_slice %50 {offsets = [6, 0], sizes = [1, 16], strides = [1, 1]} : vector<8x16xf32> to vector<1x16xf32>
    %c25_59 = arith.constant 25 : index
    %c0_60 = arith.constant 0 : index
    %64 = vector.load %arg6[%c25_59, %c0_60] : memref<32x16xf32, #tpu.memory_space<vmem>>, vector<1x16xf32>
    tpu.vector_store %arg6[%c25_59, %c0_60], %63 {strides = array<i32>} : memref<32x16xf32, #tpu.memory_space<vmem>>, vector<1x16xf32>,
    %65 = vector.extract_strided_slice %50 {offsets = [7, 0], sizes = [1, 16], strides = [1, 1]} : vector<8x16xf32> to vector<1x16xf32>
    %c29_61 = arith.constant 29 : index
    %c0_62 = arith.constant 0 : index
    %66 = vector.load %arg6[%c29_61, %c0_62] : memref<32x16xf32, #tpu.memory_space<vmem>>, vector<1x16xf32>
    tpu.vector_store %arg6[%c29_61, %c0_62], %65 {strides = array<i32>} : memref<32x16xf32, #tpu.memory_space<vmem>>, vector<1x16xf32>,
    %c2 = arith.constant 2 : index
    %c0_63 = arith.constant 0 : index
    %67 = vector.load %arg8[%c2, %c0_63] : memref<32x16xf32, #tpu.memory_space<vmem>>, vector<1x16xf32>
    %c6 = arith.constant 6 : index
    %c0_64 = arith.constant 0 : index
    %68 = vector.load %arg8[%c6, %c0_64] : memref<32x16xf32, #tpu.memory_space<vmem>>, vector<1x16xf32>
    %c10 = arith.constant 10 : index
    %c0_65 = arith.constant 0 : index
    %69 = vector.load %arg8[%c10, %c0_65] : memref<32x16xf32, #tpu.memory_space<vmem>>, vector<1x16xf32>
    %c14 = arith.constant 14 : index
    %c0_66 = arith.constant 0 : index
    %70 = vector.load %arg8[%c14, %c0_66] : memref<32x16xf32, #tpu.memory_space<vmem>>, vector<1x16xf32>
    %c18 = arith.constant 18 : index
    %c0_67 = arith.constant 0 : index
    %71 = vector.load %arg8[%c18, %c0_67] : memref<32x16xf32, #tpu.memory_space<vmem>>, vector<1x16xf32>
    %c22 = arith.constant 22 : index
    %c0_68 = arith.constant 0 : index
    %72 = vector.load %arg8[%c22, %c0_68] : memref<32x16xf32, #tpu.memory_space<vmem>>, vector<1x16xf32>
    %c26 = arith.constant 26 : index
    %c0_69 = arith.constant 0 : index
    %73 = vector.load %arg8[%c26, %c0_69] : memref<32x16xf32, #tpu.memory_space<vmem>>, vector<1x16xf32>
    %c30 = arith.constant 30 : index
    %c0_70 = arith.constant 0 : index
    %74 = vector.load %arg8[%c30, %c0_70] : memref<32x16xf32, #tpu.memory_space<vmem>>, vector<1x16xf32>
    %75 = tpu.concatenate %67, %68, %69, %70, %71, %72, %73, %74 in 0 : vector<1x16xf32>, vector<1x16xf32>, vector<1x16xf32>, vector<1x16xf32>, vector<1x16xf32>, vector<1x16xf32>, vector<1x16xf32>, vector<1x16xf32> -> vector<8x16xf32>
    %cst_71 = arith.constant dense<0.000000e+00> : vector<8x16xf32>
    %76 = tpu.matmul %50, %7, %cst_71 {dimension_numbers = #tpu.dot_dimension_numbers<[1], [1], [0], [0], [0, 0, 1, 0], [], []>} : vector<8x16xf32>, vector<16x16xf32>, vector<8x16xf32> -> vector<8x16xf32>
    %77 = arith.addf %75, %76 : vector<8x16xf32>
    %cst_72 = arith.constant 0.000000e+00 : f32
    %78 = vector.broadcast %cst_72 : f32 to vector<8x16xf32>
    %79 = arith.maximumf %77, %78 : vector<8x16xf32>
    %80 = vector.extract_strided_slice %79 {offsets = [0, 0], sizes = [1, 16], strides = [1, 1]} : vector<8x16xf32> to vector<1x16xf32>
    %c2_73 = arith.constant 2 : index
    %c0_74 = arith.constant 0 : index
    %81 = vector.load %arg6[%c2_73, %c0_74] : memref<32x16xf32, #tpu.memory_space<vmem>>, vector<1x16xf32>
    tpu.vector_store %arg6[%c2_73, %c0_74], %80 {strides = array<i32>} : memref<32x16xf32, #tpu.memory_space<vmem>>, vector<1x16xf32>,
    %82 = vector.extract_strided_slice %79 {offsets = [1, 0], sizes = [1, 16], strides = [1, 1]} : vector<8x16xf32> to vector<1x16xf32>
    %c6_75 = arith.constant 6 : index
    %c0_76 = arith.constant 0 : index
    %83 = vector.load %arg6[%c6_75, %c0_76] : memref<32x16xf32, #tpu.memory_space<vmem>>, vector<1x16xf32>
    tpu.vector_store %arg6[%c6_75, %c0_76], %82 {strides = array<i32>} : memref<32x16xf32, #tpu.memory_space<vmem>>, vector<1x16xf32>,
    %84 = vector.extract_strided_slice %79 {offsets = [2, 0], sizes = [1, 16], strides = [1, 1]} : vector<8x16xf32> to vector<1x16xf32>
    %c10_77 = arith.constant 10 : index
    %c0_78 = arith.constant 0 : index
    %85 = vector.load %arg6[%c10_77, %c0_78] : memref<32x16xf32, #tpu.memory_space<vmem>>, vector<1x16xf32>
    tpu.vector_store %arg6[%c10_77, %c0_78], %84 {strides = array<i32>} : memref<32x16xf32, #tpu.memory_space<vmem>>, vector<1x16xf32>,
    %86 = vector.extract_strided_slice %79 {offsets = [3, 0], sizes = [1, 16], strides = [1, 1]} : vector<8x16xf32> to vector<1x16xf32>
    %c14_79 = arith.constant 14 : index
    %c0_80 = arith.constant 0 : index
    %87 = vector.load %arg6[%c14_79, %c0_80] : memref<32x16xf32, #tpu.memory_space<vmem>>, vector<1x16xf32>
    tpu.vector_store %arg6[%c14_79, %c0_80], %86 {strides = array<i32>} : memref<32x16xf32, #tpu.memory_space<vmem>>, vector<1x16xf32>,
    %88 = vector.extract_strided_slice %79 {offsets = [4, 0], sizes = [1, 16], strides = [1, 1]} : vector<8x16xf32> to vector<1x16xf32>
    %c18_81 = arith.constant 18 : index
    %c0_82 = arith.constant 0 : index
    %89 = vector.load %arg6[%c18_81, %c0_82] : memref<32x16xf32, #tpu.memory_space<vmem>>, vector<1x16xf32>
    tpu.vector_store %arg6[%c18_81, %c0_82], %88 {strides = array<i32>} : memref<32x16xf32, #tpu.memory_space<vmem>>, vector<1x16xf32>,
    %90 = vector.extract_strided_slice %79 {offsets = [5, 0], sizes = [1, 16], strides = [1, 1]} : vector<8x16xf32> to vector<1x16xf32>
    %c22_83 = arith.constant 22 : index
    %c0_84 = arith.constant 0 : index
    %91 = vector.load %arg6[%c22_83, %c0_84] : memref<32x16xf32, #tpu.memory_space<vmem>>, vector<1x16xf32>
    tpu.vector_store %arg6[%c22_83, %c0_84], %90 {strides = array<i32>} : memref<32x16xf32, #tpu.memory_space<vmem>>, vector<1x16xf32>,
    %92 = vector.extract_strided_slice %79 {offsets = [6, 0], sizes = [1, 16], strides = [1, 1]} : vector<8x16xf32> to vector<1x16xf32>
    %c26_85 = arith.constant 26 : index
    %c0_86 = arith.constant 0 : index
    %93 = vector.load %arg6[%c26_85, %c0_86] : memref<32x16xf32, #tpu.memory_space<vmem>>, vector<1x16xf32>
    tpu.vector_store %arg6[%c26_85, %c0_86], %92 {strides = array<i32>} : memref<32x16xf32, #tpu.memory_space<vmem>>, vector<1x16xf32>,
    %94 = vector.extract_strided_slice %79 {offsets = [7, 0], sizes = [1, 16], strides = [1, 1]} : vector<8x16xf32> to vector<1x16xf32>
    %c30_87 = arith.constant 30 : index
    %c0_88 = arith.constant 0 : index
    %95 = vector.load %arg6[%c30_87, %c0_88] : memref<32x16xf32, #tpu.memory_space<vmem>>, vector<1x16xf32>
    tpu.vector_store %arg6[%c30_87, %c0_88], %94 {strides = array<i32>} : memref<32x16xf32, #tpu.memory_space<vmem>>, vector<1x16xf32>,
    %c3 = arith.constant 3 : index
    %c0_89 = arith.constant 0 : index
    %96 = vector.load %arg8[%c3, %c0_89] : memref<32x16xf32, #tpu.memory_space<vmem>>, vector<1x16xf32>
    %c7 = arith.constant 7 : index
    %c0_90 = arith.constant 0 : index
    %97 = vector.load %arg8[%c7, %c0_90] : memref<32x16xf32, #tpu.memory_space<vmem>>, vector<1x16xf32>
    %c11 = arith.constant 11 : index
    %c0_91 = arith.constant 0 : index
    %98 = vector.load %arg8[%c11, %c0_91] : memref<32x16xf32, #tpu.memory_space<vmem>>, vector<1x16xf32>
    %c15 = arith.constant 15 : index
    %c0_92 = arith.constant 0 : index
    %99 = vector.load %arg8[%c15, %c0_92] : memref<32x16xf32, #tpu.memory_space<vmem>>, vector<1x16xf32>
    %c19 = arith.constant 19 : index
    %c0_93 = arith.constant 0 : index
    %100 = vector.load %arg8[%c19, %c0_93] : memref<32x16xf32, #tpu.memory_space<vmem>>, vector<1x16xf32>
    %c23 = arith.constant 23 : index
    %c0_94 = arith.constant 0 : index
    %101 = vector.load %arg8[%c23, %c0_94] : memref<32x16xf32, #tpu.memory_space<vmem>>, vector<1x16xf32>
    %c27 = arith.constant 27 : index
    %c0_95 = arith.constant 0 : index
    %102 = vector.load %arg8[%c27, %c0_95] : memref<32x16xf32, #tpu.memory_space<vmem>>, vector<1x16xf32>
    %c31 = arith.constant 31 : index
    %c0_96 = arith.constant 0 : index
    %103 = vector.load %arg8[%c31, %c0_96] : memref<32x16xf32, #tpu.memory_space<vmem>>, vector<1x16xf32>
    %104 = tpu.concatenate %96, %97, %98, %99, %100, %101, %102, %103 in 0 : vector<1x16xf32>, vector<1x16xf32>, vector<1x16xf32>, vector<1x16xf32>, vector<1x16xf32>, vector<1x16xf32>, vector<1x16xf32>, vector<1x16xf32> -> vector<8x16xf32>
    %cst_97 = arith.constant dense<0.000000e+00> : vector<8x16xf32>
    %105 = tpu.matmul %79, %7, %cst_97 {dimension_numbers = #tpu.dot_dimension_numbers<[1], [1], [0], [0], [0, 0, 1, 0], [], []>} : vector<8x16xf32>, vector<16x16xf32>, vector<8x16xf32> -> vector<8x16xf32>
    %106 = arith.addf %104, %105 : vector<8x16xf32>
    %cst_98 = arith.constant 0.000000e+00 : f32
    %107 = vector.broadcast %cst_98 : f32 to vector<8x16xf32>
    %108 = arith.maximumf %106, %107 : vector<8x16xf32>
    %109 = vector.extract_strided_slice %108 {offsets = [0, 0], sizes = [1, 16], strides = [1, 1]} : vector<8x16xf32> to vector<1x16xf32>
    %c3_99 = arith.constant 3 : index
    %c0_100 = arith.constant 0 : index
    %110 = vector.load %arg6[%c3_99, %c0_100] : memref<32x16xf32, #tpu.memory_space<vmem>>, vector<1x16xf32>
    tpu.vector_store %arg6[%c3_99, %c0_100], %109 {strides = array<i32>} : memref<32x16xf32, #tpu.memory_space<vmem>>, vector<1x16xf32>,
    %111 = vector.extract_strided_slice %108 {offsets = [1, 0], sizes = [1, 16], strides = [1, 1]} : vector<8x16xf32> to vector<1x16xf32>
    %c7_101 = arith.constant 7 : index
    %c0_102 = arith.constant 0 : index
    %112 = vector.load %arg6[%c7_101, %c0_102] : memref<32x16xf32, #tpu.memory_space<vmem>>, vector<1x16xf32>
    tpu.vector_store %arg6[%c7_101, %c0_102], %111 {strides = array<i32>} : memref<32x16xf32, #tpu.memory_space<vmem>>, vector<1x16xf32>,
    %113 = vector.extract_strided_slice %108 {offsets = [2, 0], sizes = [1, 16], strides = [1, 1]} : vector<8x16xf32> to vector<1x16xf32>
    %c11_103 = arith.constant 11 : index
    %c0_104 = arith.constant 0 : index
    %114 = vector.load %arg6[%c11_103, %c0_104] : memref<32x16xf32, #tpu.memory_space<vmem>>, vector<1x16xf32>
    tpu.vector_store %arg6[%c11_103, %c0_104], %113 {strides = array<i32>} : memref<32x16xf32, #tpu.memory_space<vmem>>, vector<1x16xf32>,
    %115 = vector.extract_strided_slice %108 {offsets = [3, 0], sizes = [1, 16], strides = [1, 1]} : vector<8x16xf32> to vector<1x16xf32>
    %c15_105 = arith.constant 15 : index
    %c0_106 = arith.constant 0 : index
    %116 = vector.load %arg6[%c15_105, %c0_106] : memref<32x16xf32, #tpu.memory_space<vmem>>, vector<1x16xf32>
    tpu.vector_store %arg6[%c15_105, %c0_106], %115 {strides = array<i32>} : memref<32x16xf32, #tpu.memory_space<vmem>>, vector<1x16xf32>,
    %117 = vector.extract_strided_slice %108 {offsets = [4, 0], sizes = [1, 16], strides = [1, 1]} : vector<8x16xf32> to vector<1x16xf32>
    %c19_107 = arith.constant 19 : index
    %c0_108 = arith.constant 0 : index
    %118 = vector.load %arg6[%c19_107, %c0_108] : memref<32x16xf32, #tpu.memory_space<vmem>>, vector<1x16xf32>
    tpu.vector_store %arg6[%c19_107, %c0_108], %117 {strides = array<i32>} : memref<32x16xf32, #tpu.memory_space<vmem>>, vector<1x16xf32>,
    %119 = vector.extract_strided_slice %108 {offsets = [5, 0], sizes = [1, 16], strides = [1, 1]} : vector<8x16xf32> to vector<1x16xf32>
    %c23_109 = arith.constant 23 : index
    %c0_110 = arith.constant 0 : index
    %120 = vector.load %arg6[%c23_109, %c0_110] : memref<32x16xf32, #tpu.memory_space<vmem>>, vector<1x16xf32>
    tpu.vector_store %arg6[%c23_109, %c0_110], %119 {strides = array<i32>} : memref<32x16xf32, #tpu.memory_space<vmem>>, vector<1x16xf32>,
    %121 = vector.extract_strided_slice %108 {offsets = [6, 0], sizes = [1, 16], strides = [1, 1]} : vector<8x16xf32> to vector<1x16xf32>
    %c27_111 = arith.constant 27 : index
    %c0_112 = arith.constant 0 : index
    %122 = vector.load %arg6[%c27_111, %c0_112] : memref<32x16xf32, #tpu.memory_space<vmem>>, vector<1x16xf32>
    tpu.vector_store %arg6[%c27_111, %c0_112], %121 {strides = array<i32>} : memref<32x16xf32, #tpu.memory_space<vmem>>, vector<1x16xf32>,
    %123 = vector.extract_strided_slice %108 {offsets = [7, 0], sizes = [1, 16], strides = [1, 1]} : vector<8x16xf32> to vector<1x16xf32>
    %c31_113 = arith.constant 31 : index
    %c0_114 = arith.constant 0 : index
    %124 = vector.load %arg6[%c31_113, %c0_114] : memref<32x16xf32, #tpu.memory_space<vmem>>, vector<1x16xf32>
    tpu.vector_store %arg6[%c31_113, %c0_114], %123 {strides = array<i32>} : memref<32x16xf32, #tpu.memory_space<vmem>>, vector<1x16xf32>,
    %c0_115 = arith.constant 0 : index
    %c0_116 = arith.constant 0 : index
    %125 = vector.load %arg6[%c0_115, %c0_116] : memref<32x16xf32, #tpu.memory_space<vmem>>, vector<32x16xf32>
    %c0_117 = arith.constant 0 : index
    %c0_118 = arith.constant 0 : index
    %126 = vector.load %arg4[%c0_117, %c0_118] : memref<2x16xf32, #tpu.memory_space<vmem>>, vector<2x16xf32>
    %cst_119 = arith.constant dense<0.000000e+00> : vector<32x2xf32>
    %127 = tpu.matmul %125, %126, %cst_119 {dimension_numbers = #tpu.dot_dimension_numbers<[1], [1], [0], [0], [0, 0, 1, 0], [], []>} : vector<32x16xf32>, vector<2x16xf32>, vector<32x2xf32> -> vector<32x2xf32>
    %c0_120 = arith.constant 0 : index
    %c0_121 = arith.constant 0 : index
    %128 = vector.load %arg5[%c0_120, %c0_121] : memref<1x2xf32, #tpu.memory_space<vmem>>, vector<1x2xf32>
    %129 = vector.broadcast %128 : vector<1x2xf32> to vector<32x2xf32>
    %130 = arith.addf %127, %129 : vector<32x2xf32>
    %c0_122 = arith.constant 0 : index
    %c0_123 = arith.constant 0 : index
    %131 = vector.load %arg7[%c0_122, %c0_123] : memref<32x2xf32, #tpu.memory_space<vmem>>, vector<32x2xf32>
    tpu.vector_store %arg7[%c0_122, %c0_123], %130 {strides = array<i32>} : memref<32x2xf32, #tpu.memory_space<vmem>>, vector<32x2xf32>,
    return
  }
}

</mosaic_0001>

<bundles_post_ra>
// kernel: model_n_forward.2
= control target key start
LH: loop header
LB: loop body
LE: loop exit
PB: predicated region body
PF: predicated region fallthrough
CT: control target
= control target key end

     0   :  { %s4166_s15 = smov 0   ;;  %s4873_s0 = inlined_call_operand.vmem [shape: bf16[32,72,729], index: 0, kind: input, shape index: {}]   ;;  %s4874_s1 = inlined_call_operand.vmem [shape: bf16[16,72], index: 1, kind: input, shape index: {}]   ;;  %s4875_s2 = inlined_call_operand.vmem [shape: f32[16,1], index: 2, kind: input, shape index: {}]   ;;  %s4876_s3 = inlined_call_operand.vmem [shape: f32[32,16,729], index: 3, kind: output, shape index: {0}]   ;;  %s4877_s4 = inlined_call_operand.vmem [shape: f32[32,16,729], index: 4, kind: output, shape index: {1}]  }
   0x1 LB: > { %s3123_s16 = sadd.s32 4294967295, %s4138_s15   ;;  %p3127_p0 = scmp.ge.s32.totalorder %s4138_s15, 1  ;;  %s4138_s15 = sphi %s4166_s15, %s15_s15  }
   0x2   : > { %p167_p1 = scmp.lt.s32.totalorder %s4138_s15, 5 }
   0x4   : > { %p168_p2 = pnand %p3127_p0, %p167_p1 }
   0x5   : > { %s3128_s17 = sshll.u32 (!%p168_p2), %s3123_s16, 3  ;;  %v4140_v0 = vmov (!%p168_p2), 0   ;;  %v225_v1 = vld [vmem:[%s4875_s2] sm:$0xff] (!%p168_p2)  ;;  %v226_v2 = vld [vmem:[%s4875_s2 + $0x8] sm:$0xff] (!%p168_p2)  ;;  %vm408_vm0 = vcmask (!%p168_p2), 1043456   ;;  %vm404_vm1 = vcmask (!%p168_p2), 588800  }
   0x6   : > { %171 = sbr.rel (%p168_p2) target bundleno = 481 (0x1e1), region = 32  ;;  %p202_p3 = scmp.lt.s32.totalorder (!%p168_p2), %s3128_s17, 31  ;;  %459 = vmatprep.mubr.bf16.mxu0 (!%p168_p2), %v4140_v0  ;;  %502 = vmatprep.mubr.bf16.mxu1 (!%p168_p2), %v4140_v0  ;;  %v4218_v29 = vld [vmem:[%s4874_s1] sm:$0xff] (!%p168_p2)   ;;  %vm561_vm2 = vcmask (!%p168_p2), 728064  }
   0x7   : > { %3793 = vset.pattern.permute.xlu0 (!%p168_p2), %v4140_v0 }
   0x8   : > { %256 = vperm.xlu0 (!%p168_p2), %3793, %v225_v1  }
   0xc   : > { %261 = vperm.xlu0 (!%p168_p2), %3793, %v226_v2  }
   0xd   : > { %s4879_s17 = smov (!%p202_p3, %s3128_s17), 31 }
   0xe   : > { %s3782_s22 = smul.u32 216, %s4879_s17 }
   0xf   : > { %s3783_s30 = smul.u32 96, %s4879_s17 }
  0x10   : > { %s4189_s25 = scalar_lea.vmem %s4873_s0, %s3782_s22 }
  0x11   : > { %v3794_v3 = vld [vmem:[%s4189_s25 + $0x4] ss:$24 sps:$4 sm:$0xff]   ;;  %v3798_v5 = vld [vmem:[%s4189_s25] ss:$24 sps:$4 sm:$0xff]   ;;  %v3800_v7 = vld [vmem:[%s4189_s25 + $0x34] ss:$24 sps:$4 sm:$0xff]   ;;  %s4535_s7 = scalar_lea.vmem %s4876_s3, %s3783_s30  ;;  %s4542_s10 = scalar_lea.vmem %s4877_s4, %s3783_s30 }
  0x12   : > { %v3796_v4 = vld [vmem:[%s4189_s25 + $0xc] ss:$24 sps:$4 sm:$0xff]   ;;  %427 = vmatprep.subr.bf16.mxu0 %v3794_v3  ;;  %v3799_v6 = vld [vmem:[%s4189_s25 + $0x8] ss:$24 sps:$4 sm:$0xff]   ;;  %v3802_v8 = vld [vmem:[%s4189_s25 + $0x3c] ss:$24 sps:$4 sm:$0xff]  }
  0x13   : > { %470 = vmatprep.subr.bf16.mxu1 %v3796_v4  ;;  %428 = vmatpush1.bf16.msra.mxu0 %v3798_v5  ;;  %v3804_v9 = vld [vmem:[%s4189_s25 + $0x30] ss:$24 sps:$4 sm:$0xff]   ;;  %v3806_v11 = vld [vmem:[%s4189_s25 + $0x64] ss:$24 sps:$4 sm:$0xff]   ;;  %v3810_v13 = vld [vmem:[%s4189_s25 + $0x60] ss:$24 sps:$4 sm:$0xff]  }
  0x14   : > { %471 = vmatpush1.bf16.msra.mxu1 %v3799_v6  ;;  %429 = vmatprep.subr.bf16.mxu0 %v3800_v7  ;;  %v3805_v10 = vld [vmem:[%s4189_s25 + $0x38] ss:$24 sps:$4 sm:$0xff]   ;;  %v3808_v12 = vld [vmem:[%s4189_s25 + $0x6c] ss:$24 sps:$4 sm:$0xff]   ;;  %v3811_v14 = vld [vmem:[%s4189_s25 + $0x68] ss:$24 sps:$4 sm:$0xff]  }
  0x15   : > { %472 = vmatprep.subr.bf16.mxu1 %v3802_v8  ;;  %v3812_v15 = vld [vmem:[%s4189_s25 + $0x94] ss:$24 sps:$4 sm:$0xff]   ;;  %v251_v17 = vld [vmem:[%s4189_s25 + $0xc0] sm:$0xff]  ;;  %v3816_v19 = vld [vmem:[%s4189_s25 + $0x90] ss:$24 sps:$4 sm:$0xff]  }
  0x16   : > { %v3814_v16 = vld [vmem:[%s4189_s25 + $0x9c] ss:$24 sps:$4 sm:$0xff]   ;;  %v252_v18 = vld [vmem:[%s4189_s25 + $0xc8] sm:$0xff]  ;;  %v3817_v20 = vld [vmem:[%s4189_s25 + $0x98] ss:$24 sps:$4 sm:$0xff]   ;;  %v3160_v21 = vcombine.high %v251_v17, %v251_v17  ;;  %v3159_v23 = vcombine.low %v251_v17, %v251_v17 }
  0x17   : > { %430 = vmatpush1.bf16.msra.mxu0 %v3804_v9  ;;  %v3162_v22 = vcombine.high %v252_v18, %v252_v18  ;;  %v3161_v24 = vcombine.low %v252_v18, %v252_v18  ;;  %v3825_v25 = vld [vmem:[%s4189_s25 + $0x14] ss:$24 sps:$4 sm:$0xff]   ;;  %v3823_v30 = vld [vmem:[%s4189_s25 + $0x10] ss:$24 sps:$4 sm:$0xff]   ;;  %v3831_v32 = vld [vmem:[%s4189_s25 + $0x44] ss:$24 sps:$4 sm:$0xff]  }
  0x18   : > { %473 = vmatpush1.bf16.msra.mxu1 %v3805_v10  ;;  %431 = vmatprep.subr.bf16.mxu0 %v3806_v11  ;;  %v410_v26 = vsel %vm408_vm0, %v3159_v23, 0  ;;  %v3828_v28 = vld [vmem:[%s4189_s25 + $0xdc] ss:$24 sps:$4 sm:$0xff]   ;;  %v3826_v31 = vld [vmem:[%s4189_s25 + $0xd8] ss:$24 sps:$4 sm:$0xff]   ;;  %v3196_v3 = vld [vmem:[%s4189_s25 + $0x1a0] sm:$0xff] }
  0x19   : > { %474 = vmatprep.subr.bf16.mxu1 %v3808_v12  ;;  %v416_v27 = vsel %vm408_vm0, %v3161_v24, 0  ;;  %v3834_v33 = vld [vmem:[%s4189_s25 + $0x10c] ss:$24 sps:$4 sm:$0xff]   ;;  %v3829_v34 = vld [vmem:[%s4189_s25 + $0x40] ss:$24 sps:$4 sm:$0xff]   ;;  %v253_v42 = vld [vmem:[%s4189_s25 + $0xd0] sm:$0xff]  ;;  %v3225_v7 = vcombine.high %v3196_v3, %v3196_v3  ;;  %v3224_v9 = vcombine.low %v3196_v3, %v3196_v3 }
  0x1a   : > { %v3832_v35 = vld [vmem:[%s4189_s25 + $0x108] ss:$24 sps:$4 sm:$0xff]   ;;  %v3837_v36 = vld [vmem:[%s4189_s25 + $0x74] ss:$24 sps:$4 sm:$0xff]   ;;  %v3838_v39 = vld [vmem:[%s4189_s25 + $0x138] ss:$24 sps:$4 sm:$0xff]   ;;  %v3164_v46 = vcombine.high %v253_v42, %v253_v42  ;;  %v3163_v48 = vcombine.low %v253_v42, %v253_v42 }
  0x1b   : > { %432 = vmatpush1.bf16.msra.mxu0 %v3810_v13  ;;  %v3840_v37 = vld [vmem:[%s4189_s25 + $0x13c] ss:$24 sps:$4 sm:$0xff]   ;;  %v3835_v38 = vld [vmem:[%s4189_s25 + $0x70] ss:$24 sps:$4 sm:$0xff]   ;;  %v3846_v41 = vld [vmem:[%s4189_s25 + $0x16c] ss:$24 sps:$4 sm:$0xff]  }
  0x1c   : > { %475 = vmatpush1.bf16.msra.mxu1 %v3811_v14  ;;  %433 = vmatprep.subr.bf16.mxu0 %v3812_v15  ;;  %v3843_v40 = vld [vmem:[%s4189_s25 + $0xa4] ss:$24 sps:$4 sm:$0xff]   ;;  %v3841_v44 = vld [vmem:[%s4189_s25 + $0xa0] ss:$24 sps:$4 sm:$0xff]   ;;  %v422_v51 = vsel %vm408_vm0, %v3163_v48, 0  ;;  %v3197_v4 = vld [vmem:[%s4189_s25 + $0x1a8] sm:$0xff] }
  0x1d   : > { %476 = vmatprep.subr.bf16.mxu1 %v3814_v16  ;;  %v3195_v43 = vld [vmem:[%s4189_s25 + $0x198] sm:$0xff]  ;;  %v3844_v45 = vld [vmem:[%s4189_s25 + $0x168] ss:$24 sps:$4 sm:$0xff]   ;;  %v3856_v53 = vld [vmem:[%s4189_s25 + $0xec] ss:$24 sps:$4 sm:$0xff]   ;;  %v3227_v8 = vcombine.high %v3197_v4, %v3197_v4  ;;  %v3226_v10 = vcombine.low %v3197_v4, %v3197_v4  ;;  %v763_v12 = vsel %vm408_vm0, %v3224_v9, 0 }
  0x1e   : > { %v3223_v47 = vcombine.high %v3195_v43, %v3195_v43  ;;  %v3222_v49 = vcombine.low %v3195_v43, %v3195_v43  ;;  %v3853_v50 = vld [vmem:[%s4189_s25 + $0xe4] ss:$24 sps:$4 sm:$0xff]   ;;  %v3851_v54 = vld [vmem:[%s4189_s25 + $0xe0] ss:$24 sps:$4 sm:$0xff]   ;;  %v3859_v56 = vld [vmem:[%s4189_s25 + $0x114] ss:$24 sps:$4 sm:$0xff]  }
  0x1f   : > { %434 = vmatpush1.bf16.msra.mxu0 %v3816_v19  ;;  %v3854_v55 = vld [vmem:[%s4189_s25 + $0xe8] ss:$24 sps:$4 sm:$0xff]   ;;  %v3862_v57 = vld [vmem:[%s4189_s25 + $0x11c] ss:$24 sps:$4 sm:$0xff]   ;;  %v3860_v59 = vld [vmem:[%s4189_s25 + $0x118] ss:$24 sps:$4 sm:$0xff]  }
  0x20   : > { %477 = vmatpush1.bf16.msra.mxu1 %v3817_v20  ;;  %3165 = vmatprep.subr.msk.bf16.mxu0 %vm408_vm0, %v3160_v21  ;;  %v757_v52 = vsel %vm408_vm0, %v3222_v49, 0  ;;  %v3857_v58 = vld [vmem:[%s4189_s25 + $0x110] ss:$24 sps:$4 sm:$0xff]   ;;  %v3865_v60 = vld [vmem:[%s4189_s25 + $0x144] ss:$24 sps:$4 sm:$0xff]   ;;  %v769_v13 = vsel %vm408_vm0, %v3226_v10, 0 }
  0x21   : > { %3167 = vmatprep.subr.msk.bf16.mxu1 %vm408_vm0, %v3162_v22  ;;  %v3868_v61 = vld [vmem:[%s4189_s25 + $0x14c] ss:$24 sps:$4 sm:$0xff]   ;;  %v3863_v62 = vld [vmem:[%s4189_s25 + $0x140] ss:$24 sps:$4 sm:$0xff]   ;;  %v3874_v2 = vld [vmem:[%s4189_s25 + $0x17c] ss:$24 sps:$4 sm:$0xff]  }
  0x22   : > { %v3866_v63 = vld [vmem:[%s4189_s25 + $0x148] ss:$24 sps:$4 sm:$0xff]   ;;  %v3871_v1 = vld [vmem:[%s4189_s25 + $0x174] ss:$24 sps:$4 sm:$0xff]   ;;  %v3872_v6 = vld [vmem:[%s4189_s25 + $0x178] ss:$24 sps:$4 sm:$0xff]  }
  0x23   : > { %436 = vmatpush1.bf16.msra.mxu0 %v410_v26  ;;  %v3869_v5 = vld [vmem:[%s4189_s25 + $0x170] ss:$24 sps:$4 sm:$0xff]   ;;  %v3881_v11 = vld [vmem:[%s4189_s25 + $0x1b4] ss:$24 sps:$4 sm:$0xff]   ;;  %v3887_v17 = vld [vmem:[%s4189_s25 + $0x1e4] ss:$24 sps:$4 sm:$0xff]  }
  0x24   : > { %479 = vmatpush1.bf16.msra.mxu1 %v416_v27  ;;  %513 = vmatprep.subr.bf16.mxu0 %v3825_v25  ;;  %v3884_v14 = vld [vmem:[%s4189_s25 + $0x1bc] ss:$24 sps:$4 sm:$0xff]   ;;  %v3879_v15 = vld [vmem:[%s4189_s25 + $0x1b0] ss:$24 sps:$4 sm:$0xff]   ;;  %v3890_v18 = vld [vmem:[%s4189_s25 + $0x1ec] ss:$24 sps:$4 sm:$0xff]  }
  0x25   : > { %774 = vmatprep.subr.bf16.mxu1 %v3828_v28  ;;  %v3882_v16 = vld [vmem:[%s4189_s25 + $0x1b8] ss:$24 sps:$4 sm:$0xff]   ;;  %v3888_v20 = vld [vmem:[%s4189_s25 + $0x1e8] ss:$24 sps:$4 sm:$0xff]   ;;  %v3893_v21 = vld [vmem:[%s4189_s25 + $0x214] ss:$24 sps:$4 sm:$0xff]  }
  0x26   : > { %3166 = vmatmul.mubr.msk.bf16.vlgmr.msra.gmra.mrb[0].mxu0 %vm404_vm1, %v4218_v29  ;;  %v3885_v19 = vld [vmem:[%s4189_s25 + $0x1e0] ss:$24 sps:$4 sm:$0xff]   ;;  %v3896_v22 = vld [vmem:[%s4189_s25 + $0x21c] ss:$24 sps:$4 sm:$0xff]   ;;  %v3891_v23 = vld [vmem:[%s4189_s25 + $0x210] ss:$24 sps:$4 sm:$0xff]  }
  0x27   : > { %3168 = vmatmul.mubr.msk.bf16.vlgmr.msra.gmra.mrb[0].mxu1 %vm404_vm1, %v4218_v29  ;;  %514 = vmatpush1.bf16.msra.mxu0 %v3823_v30  ;;  %v3894_v24 = vld [vmem:[%s4189_s25 + $0x218] ss:$24 sps:$4 sm:$0xff]   ;;  %v3899_v25 = vld [vmem:[%s4189_s25 + $0x244] ss:$24 sps:$4 sm:$0xff]   ;;  %v3915_v42 = vld [vmem:[%s4189_s25 + $0x1f4] ss:$24 sps:$4 sm:$0xff]  }
  0x28   : > { %775 = vmatpush1.bf16.msra.mxu1 %v3826_v31  ;;  %515 = vmatprep.subr.bf16.mxu0 %v3831_v32  ;;  %v3902_v26 = vld [vmem:[%s4189_s25 + $0x24c] ss:$24 sps:$4 sm:$0xff]   ;;  %v3282_v27 = vld [vmem:[%s4189_s25 + $0x270] sm:$0xff]  ;;  %v3283_v28 = vld [vmem:[%s4189_s25 + $0x278] sm:$0xff] }
  0x29   : > { %776 = vmatprep.subr.bf16.mxu1 %v3834_v33  ;;  %545 = vmatprep.mubr.bf16.mxu0 %v4140_v0  ;;  %v3897_v30 = vld [vmem:[%s4189_s25 + $0x240] ss:$24 sps:$4 sm:$0xff]   ;;  %v3310_v32 = vcombine.high %v3282_v27, %v3282_v27  ;;  %v3312_v33 = vcombine.high %v3283_v28, %v3283_v28  ;;  %v3918_v43 = vld [vmem:[%s4189_s25 + $0x2bc] ss:$24 sps:$4 sm:$0xff]   ;;  %v3946_v4 = vld [vmem:[%s4189_s25 + $0x2cc] ss:$24 sps:$4 sm:$0xff]  }
  0x2a   : > { %806 = vmatprep.mubr.bf16.mxu1 %v4140_v0  ;;  %v3900_v31 = vld [vmem:[%s4189_s25 + $0x248] ss:$24 sps:$4 sm:$0xff]   ;;  %v3943_v3 = vld [vmem:[%s4189_s25 + $0x2c4] ss:$24 sps:$4 sm:$0xff]   ;;  %v3950_v10 = vld [vmem:[%s4189_s25 + $0x2f8] ss:$24 sps:$4 sm:$0xff]  }
  0x2b   : > { %516 = vmatpush1.bf16.msra.mxu0 %v3829_v34  ;;  %v3309_v34 = vcombine.low %v3282_v27, %v3282_v27  ;;  %v3919_v48 = vld [vmem:[%s4189_s25 + $0x220] ss:$24 sps:$4 sm:$0xff]   ;;  %v3947_v9 = vld [vmem:[%s4189_s25 + $0x2f0] ss:$24 sps:$4 sm:$0xff]   ;;  %v3971_v27 = vld [vmem:[%s4189_s25 + $0x394] ss:$24 sps:$4 sm:$0xff]  }
  0x2c   : > { %777 = vmatpush1.bf16.msra.mxu1 %v3832_v35  ;;  %517 = vmatprep.subr.bf16.mxu0 %v3837_v36  ;;  %v3311_v35 = vcombine.low %v3283_v28, %v3283_v28  ;;  %v3909_v36 = vld [vmem:[%s4189_s25 + $0x1c4] ss:$24 sps:$4 sm:$0xff]   ;;  %v3922_v49 = vld [vmem:[%s4189_s25 + $0x2e8] ss:$24 sps:$4 sm:$0xff]  }
  0x2d   : > { %778 = vmatprep.subr.bf16.mxu1 %v3840_v37  ;;  %v1105_v37 = vsel %vm408_vm0, %v3309_v34, 0  ;;  %v3974_v28 = vld [vmem:[%s4189_s25 + $0x39c] ss:$24 sps:$4 sm:$0xff]   ;;  %v3975_v34 = vld [vmem:[%s4189_s25 + $0x3c0] ss:$24 sps:$4 sm:$0xff]  }
  0x2f   : > { %518 = vmatpush1.bf16.msra.mxu0 %v3835_v38  ;;  %v1111_v38 = vsel %vm408_vm0, %v3311_v35, 0  ;;  %v3978_v35 = vld [vmem:[%s4189_s25 + $0x3c8] ss:$24 sps:$4 sm:$0xff]  }
  0x30   : > { %779 = vmatpush1.bf16.msra.mxu1 %v3838_v39  ;;  %519 = vmatprep.subr.bf16.mxu0 %v3843_v40  ;;  %v3912_v39 = vld [vmem:[%s4189_s25 + $0x28c] ss:$24 sps:$4 sm:$0xff]   ;;  %v3907_v40 = vld [vmem:[%s4189_s25 + $0x1c0] ss:$24 sps:$4 sm:$0xff]  }
  0x31   : > { %780 = vmatprep.subr.bf16.mxu1 %v3846_v41  ;;  %v3910_v41 = vld [vmem:[%s4189_s25 + $0x288] ss:$24 sps:$4 sm:$0xff]  }
  0x33   : > { %520 = vmatpush1.bf16.msra.mxu0 %v3841_v44  ;;  %v3913_v44 = vld [vmem:[%s4189_s25 + $0x1f0] ss:$24 sps:$4 sm:$0xff]  }
  0x34   : > { %781 = vmatpush1.bf16.msra.mxu1 %v3844_v45  ;;  %3169 = vmatprep.subr.msk.bf16.mxu0 %vm408_vm0, %v3164_v46  ;;  %v3916_v45 = vld [vmem:[%s4189_s25 + $0x2b8] ss:$24 sps:$4 sm:$0xff]   ;;  %v3921_v46 = vld [vmem:[%s4189_s25 + $0x224] ss:$24 sps:$4 sm:$0xff]  }
  0x35   : > { %3228 = vmatprep.subr.msk.bf16.mxu1 %vm408_vm0, %v3223_v47  ;;  %v3924_v47 = vld [vmem:[%s4189_s25 + $0x2ec] ss:$24 sps:$4 sm:$0xff]  }
  0x37   : > { %522 = vmatpush1.bf16.msra.mxu0 %v422_v51  ;;  %v3930_v51 = vld [vmem:[%s4189_s25 + $0x31c] ss:$24 sps:$4 sm:$0xff]  }
  0x38   : > { %783 = vmatpush1.bf16.msra.mxu1 %v757_v52  ;;  %817 = vmatprep.subr.bf16.mxu0 %v3853_v50  ;;  %v3927_v50 = vld [vmem:[%s4189_s25 + $0x254] ss:$24 sps:$4 sm:$0xff]   ;;  %v3284_v52 = vld [vmem:[%s4189_s25 + $0x280] sm:$0xff] }
  0x39   : > { %860 = vmatprep.subr.bf16.mxu1 %v3856_v53  ;;  %v3369_v53 = vld [vmem:[%s4189_s25 + $0x348] sm:$0xff] }
  0x3a   : > { %3170 = vmatmul.mubr.msk.bf16.vlgmr.msra.gmra.mrb[4].mxu0 %vm404_vm1, %v4218_v29 }
  0x3b   : > { %3229 = vmatmul.mubr.msk.bf16.vlgmr.msra.gmra.mrb[4].mxu1 %vm404_vm1, %v4218_v29  ;;  %818 = vmatpush1.bf16.msra.mxu0 %v3851_v54  ;;  %v3925_v54 = vld [vmem:[%s4189_s25 + $0x250] ss:$24 sps:$4 sm:$0xff]  }
  0x3c   : > { %861 = vmatpush1.bf16.msra.mxu1 %v3854_v55  ;;  %819 = vmatprep.subr.bf16.mxu0 %v3859_v56  ;;  %v3928_v55 = vld [vmem:[%s4189_s25 + $0x318] ss:$24 sps:$4 sm:$0xff]   ;;  %v3314_v56 = vcombine.high %v3284_v52, %v3284_v52 }
  0x3d   : > { %862 = vmatprep.subr.bf16.mxu1 %v3862_v57  ;;  %849 = vmatprep.mubr.bf16.mxu0 %v4140_v0  ;;  %v3397_v57 = vcombine.high %v3369_v53, %v3369_v53 }
  0x3e   : > { %892 = vmatprep.mubr.bf16.mxu1 %v4140_v0 }
  0x3f   : > { %820 = vmatpush1.bf16.msra.mxu0 %v3857_v58  ;;  %v3313_v58 = vcombine.low %v3284_v52, %v3284_v52  ;;  %v3999_v52 = vld [vmem:[%s4189_s25 + $0x3a4] ss:$24 sps:$4 sm:$0xff]  }
  0x40   : > { %863 = vmatpush1.bf16.msra.mxu1 %v3860_v59  ;;  %821 = vmatprep.subr.bf16.mxu0 %v3865_v60  ;;  %v3396_v59 = vcombine.low %v3369_v53, %v3369_v53  ;;  %v3937_v60 = vld [vmem:[%s4189_s25 + $0x294] ss:$24 sps:$4 sm:$0xff]  }
  0x41   : > { %864 = vmatprep.subr.bf16.mxu1 %v3868_v61  ;;  %v1117_v61 = vsel %vm408_vm0, %v3313_v58, 0  ;;  %v4002_v53 = vld [vmem:[%s4189_s25 + $0x46c] ss:$24 sps:$4 sm:$0xff]   ;;  %v4003_v58 = vld [vmem:[%s4189_s25 + $0x3d0] ss:$24 sps:$4 sm:$0xff]  }
  0x43   : > { %822 = vmatpush1.bf16.msra.mxu0 %v3863_v62  ;;  %v1453_v62 = vsel %vm408_vm0, %v3396_v59, 0  ;;  %v4006_v59 = vld [vmem:[%s4189_s25 + $0x498] ss:$24 sps:$4 sm:$0xff]  }
  0x44   : > { %865 = vmatpush1.bf16.msra.mxu1 %v3866_v63  ;;  %823 = vmatprep.subr.bf16.mxu0 %v3871_v1  ;;  %v3940_v63 = vld [vmem:[%s4189_s25 + $0x29c] ss:$24 sps:$4 sm:$0xff]   ;;  %v3935_v1 = vld [vmem:[%s4189_s25 + $0x290] ss:$24 sps:$4 sm:$0xff]  }
  0x45   : > { %866 = vmatprep.subr.bf16.mxu1 %v3874_v2  ;;  %v3938_v2 = vld [vmem:[%s4189_s25 + $0x298] ss:$24 sps:$4 sm:$0xff]  }
  0x47   : > { %824 = vmatpush1.bf16.msra.mxu0 %v3869_v5  ;;  %v3941_v5 = vld [vmem:[%s4189_s25 + $0x2c0] ss:$24 sps:$4 sm:$0xff]  }
  0x48   : > { %867 = vmatpush1.bf16.msra.mxu1 %v3872_v6  ;;  %3230 = vmatprep.subr.msk.bf16.mxu0 %vm408_vm0, %v3225_v7  ;;  %v3944_v6 = vld [vmem:[%s4189_s25 + $0x2c8] ss:$24 sps:$4 sm:$0xff]   ;;  %v3949_v7 = vld [vmem:[%s4189_s25 + $0x2f4] ss:$24 sps:$4 sm:$0xff]  }
  0x49   : > { %3232 = vmatprep.subr.msk.bf16.mxu1 %vm408_vm0, %v3227_v8  ;;  %v3952_v8 = vld [vmem:[%s4189_s25 + $0x2fc] ss:$24 sps:$4 sm:$0xff]  }
  0x4b   : > { %826 = vmatpush1.bf16.msra.mxu0 %v763_v12  ;;  %v3958_v12 = vld [vmem:[%s4189_s25 + $0x32c] ss:$24 sps:$4 sm:$0xff]  }
  0x4c   : > { %869 = vmatpush1.bf16.msra.mxu1 %v769_v13  ;;  %1122 = vmatprep.subr.bf16.mxu0 %v3881_v11  ;;  %v3955_v11 = vld [vmem:[%s4189_s25 + $0x324] ss:$24 sps:$4 sm:$0xff]   ;;  %v3370_v13 = vld [vmem:[%s4189_s25 + $0x350] sm:$0xff] }
  0x4d   : > { %1165 = vmatprep.subr.bf16.mxu1 %v3884_v14  ;;  %v3371_v14 = vld [vmem:[%s4189_s25 + $0x358] sm:$0xff] }
  0x4e   : > { %3231 = vmatmul.mubr.msk.bf16.vlgmr.msra.gmra.mrb[8].mxu0 %vm404_vm1, %v4218_v29 }
  0x4f   : > { %3233 = vmatmul.mubr.msk.bf16.vlgmr.msra.gmra.mrb[8].mxu1 %vm404_vm1, %v4218_v29  ;;  %1123 = vmatpush1.bf16.msra.mxu0 %v3879_v15  ;;  %v3953_v15 = vld [vmem:[%s4189_s25 + $0x320] ss:$24 sps:$4 sm:$0xff]  }
  0x50   : > { %1166 = vmatpush1.bf16.msra.mxu1 %v3882_v16  ;;  %1124 = vmatprep.subr.bf16.mxu0 %v3887_v17  ;;  %v3956_v16 = vld [vmem:[%s4189_s25 + $0x328] ss:$24 sps:$4 sm:$0xff]   ;;  %v3399_v17 = vcombine.high %v3370_v13, %v3370_v13 }
  0x51   : > { %1167 = vmatprep.subr.bf16.mxu1 %v3890_v18  ;;  %1154 = vmatprep.mubr.bf16.mxu0 %v4140_v0  ;;  %v3401_v18 = vcombine.high %v3371_v14, %v3371_v14 }
  0x52   : > { %1197 = vmatprep.mubr.bf16.mxu1 %v4140_v0 }
  0x53   : > { %1125 = vmatpush1.bf16.msra.mxu0 %v3885_v19  ;;  %v3398_v19 = vcombine.low %v3370_v13, %v3370_v13  ;;  %v4027_v13 = vld [vmem:[%s4189_s25 + $0x474] ss:$24 sps:$4 sm:$0xff]  }
  0x54   : > { %1168 = vmatpush1.bf16.msra.mxu1 %v3888_v20  ;;  %1126 = vmatprep.subr.bf16.mxu0 %v3893_v21  ;;  %v3400_v20 = vcombine.low %v3371_v14, %v3371_v14  ;;  %v3965_v21 = vld [vmem:[%s4189_s25 + $0x364] ss:$24 sps:$4 sm:$0xff]  }
  0x55   : > { %1169 = vmatprep.subr.bf16.mxu1 %v3896_v22  ;;  %v1459_v22 = vsel %vm408_vm0, %v3398_v19, 0  ;;  %v4030_v14 = vld [vmem:[%s4189_s25 + $0x47c] ss:$24 sps:$4 sm:$0xff]   ;;  %v4034_v19 = vld [vmem:[%s4189_s25 + $0x4a8] ss:$24 sps:$4 sm:$0xff]  }
  0x57   : > { %1127 = vmatpush1.bf16.msra.mxu0 %v3891_v23  ;;  %v1465_v23 = vsel %vm408_vm0, %v3400_v20, 0  ;;  %v4039_v20 = vld [vmem:[%s4189_s25 + $0x4d4] ss:$24 sps:$4 sm:$0xff]  }
  0x58   : > { %1170 = vmatpush1.bf16.msra.mxu1 %v3894_v24  ;;  %1128 = vmatprep.subr.bf16.mxu0 %v3899_v25  ;;  %v3968_v24 = vld [vmem:[%s4189_s25 + $0x36c] ss:$24 sps:$4 sm:$0xff]   ;;  %v3963_v25 = vld [vmem:[%s4189_s25 + $0x360] ss:$24 sps:$4 sm:$0xff]  }
  0x59   : > { %1171 = vmatprep.subr.bf16.mxu1 %v3902_v26  ;;  %v3966_v26 = vld [vmem:[%s4189_s25 + $0x368] ss:$24 sps:$4 sm:$0xff]  }
  0x5b   : > { %1129 = vmatpush1.bf16.msra.mxu0 %v3897_v30  ;;  %v3969_v30 = vld [vmem:[%s4189_s25 + $0x390] ss:$24 sps:$4 sm:$0xff]  }
  0x5c   : > { %1172 = vmatpush1.bf16.msra.mxu1 %v3900_v31  ;;  %3315 = vmatprep.subr.msk.bf16.mxu0 %vm408_vm0, %v3310_v32  ;;  %v3972_v31 = vld [vmem:[%s4189_s25 + $0x398] ss:$24 sps:$4 sm:$0xff]   ;;  %v3977_v32 = vld [vmem:[%s4189_s25 + $0x3c4] ss:$24 sps:$4 sm:$0xff]  }
  0x5d   : > { %3317 = vmatprep.subr.msk.bf16.mxu1 %vm408_vm0, %v3312_v33  ;;  %v3980_v33 = vld [vmem:[%s4189_s25 + $0x3cc] ss:$24 sps:$4 sm:$0xff]  }
  0x5f   : > { %1131 = vmatpush1.bf16.msra.mxu0 %v1105_v37  ;;  %v3986_v37 = vld [vmem:[%s4189_s25 + $0x3fc] ss:$24 sps:$4 sm:$0xff]  }
  0x60   : > { %1174 = vmatpush1.bf16.msra.mxu1 %v1111_v38  ;;  %1208 = vmatprep.subr.bf16.mxu0 %v3909_v36  ;;  %v3983_v36 = vld [vmem:[%s4189_s25 + $0x3f4] ss:$24 sps:$4 sm:$0xff]   ;;  %v3456_v38 = vld [vmem:[%s4189_s25 + $0x420] sm:$0xff] }
  0x61   : > { %1470 = vmatprep.subr.bf16.mxu1 %v3912_v39  ;;  %v3457_v39 = vld [vmem:[%s4189_s25 + $0x428] sm:$0xff] }
  0x62   : > { %3316 = vmatmul.mubr.msk.bf16.vlgmr.msra.gmra.mrb[12].mxu0 %vm404_vm1, %v4218_v29 }
  0x63   : > { %3318 = vmatmul.mubr.msk.bf16.vlgmr.msra.gmra.mrb[12].mxu1 %vm404_vm1, %v4218_v29  ;;  %1209 = vmatpush1.bf16.msra.mxu0 %v3907_v40  ;;  %v3981_v40 = vld [vmem:[%s4189_s25 + $0x3f0] ss:$24 sps:$4 sm:$0xff]  }
  0x64   : > { %1471 = vmatpush1.bf16.msra.mxu1 %v3910_v41  ;;  %1210 = vmatprep.subr.bf16.mxu0 %v3915_v42  ;;  %v3984_v41 = vld [vmem:[%s4189_s25 + $0x3f8] ss:$24 sps:$4 sm:$0xff]   ;;  %v3484_v42 = vcombine.high %v3456_v38, %v3456_v38 }
  0x65   : > { %1472 = vmatprep.subr.bf16.mxu1 %v3918_v43  ;;  %1240 = vmatprep.mubr.bf16.mxu0 %v4140_v0  ;;  %v3486_v43 = vcombine.high %v3457_v39, %v3457_v39 }
  0x66   : > { %1502 = vmatprep.mubr.bf16.mxu1 %v4140_v0 }
  0x67   : > { %1211 = vmatpush1.bf16.msra.mxu0 %v3913_v44  ;;  %v3483_v44 = vcombine.low %v3456_v38, %v3456_v38  ;;  %v4058_v38 = vld [vmem:[%s4189_s25 + $0x54c] ss:$24 sps:$4 sm:$0xff]  }
  0x68   : > { %1473 = vmatpush1.bf16.msra.mxu1 %v3916_v45  ;;  %1212 = vmatprep.subr.bf16.mxu0 %v3921_v46  ;;  %v3485_v45 = vcombine.low %v3457_v39, %v3457_v39  ;;  %v4451_v39 = vld [vmem:[%s4874_s1] sm:$0xff]  }
  0x69   : > { %1474 = vmatprep.subr.bf16.mxu1 %v3924_v47  ;;  %v1801_v46 = vsel %vm408_vm0, %v3483_v44, 0  ;;  %v4059_v44 = vld [vmem:[%s4189_s25 + $0x570] ss:$24 sps:$4 sm:$0xff]  }
  0x6a   : > { %v1807_v47 = vsel %vm408_vm0, %v3485_v45, 0  ;;  %v4062_v45 = vld [vmem:[%s4189_s25 + $0x578] ss:$24 sps:$4 sm:$0xff]  }
  0x6b   : > { %1213 = vmatpush1.bf16.msra.mxu0 %v3919_v48  ;;  %v3993_v48 = vld [vmem:[%s4189_s25 + $0x374] ss:$24 sps:$4 sm:$0xff]  }
  0x6c   : > { %1475 = vmatpush1.bf16.msra.mxu1 %v3922_v49  ;;  %1214 = vmatprep.subr.bf16.mxu0 %v3927_v50  ;;  %v3996_v49 = vld [vmem:[%s4189_s25 + $0x43c] ss:$24 sps:$4 sm:$0xff]   ;;  %v3991_v50 = vld [vmem:[%s4189_s25 + $0x370] ss:$24 sps:$4 sm:$0xff]  }
  0x6d   : > { %1476 = vmatprep.subr.bf16.mxu1 %v3930_v51  ;;  %v3994_v51 = vld [vmem:[%s4189_s25 + $0x438] ss:$24 sps:$4 sm:$0xff]  }
  0x6f   : > { %1215 = vmatpush1.bf16.msra.mxu0 %v3925_v54  ;;  %v3997_v54 = vld [vmem:[%s4189_s25 + $0x3a0] ss:$24 sps:$4 sm:$0xff]  }
  0x70   : > { %1477 = vmatpush1.bf16.msra.mxu1 %v3928_v55  ;;  %3319 = vmatprep.subr.msk.bf16.mxu0 %vm408_vm0, %v3314_v56  ;;  %v4000_v55 = vld [vmem:[%s4189_s25 + $0x468] ss:$24 sps:$4 sm:$0xff]   ;;  %v4005_v56 = vld [vmem:[%s4189_s25 + $0x3d4] ss:$24 sps:$4 sm:$0xff]  }
  0x71   : > { %3402 = vmatprep.subr.msk.bf16.mxu1 %vm408_vm0, %v3397_v57  ;;  %v4008_v57 = vld [vmem:[%s4189_s25 + $0x49c] ss:$24 sps:$4 sm:$0xff]  }
  0x73   : > { %1217 = vmatpush1.bf16.msra.mxu0 %v1117_v61  ;;  %v4014_v61 = vld [vmem:[%s4189_s25 + $0x4cc] ss:$24 sps:$4 sm:$0xff]  }
  0x74   : > { %1479 = vmatpush1.bf16.msra.mxu1 %v1453_v62  ;;  %1513 = vmatprep.subr.bf16.mxu0 %v3937_v60  ;;  %v4011_v60 = vld [vmem:[%s4189_s25 + $0x404] ss:$24 sps:$4 sm:$0xff]   ;;  %v3458_v62 = vld [vmem:[%s4189_s25 + $0x430] sm:$0xff] }
  0x75   : > { %1556 = vmatprep.subr.bf16.mxu1 %v3940_v63  ;;  %v3543_v63 = vld [vmem:[%s4189_s25 + $0x4f8] sm:$0xff] }
  0x76   : > { %3320 = vmatmul.mubr.msk.bf16.vlgmr.msra.gmra.mrb[16].mxu0 %vm404_vm1, %v4218_v29 }
  0x77   : > { %3403 = vmatmul.mubr.msk.bf16.vlgmr.msra.gmra.mrb[16].mxu1 %vm404_vm1, %v4218_v29  ;;  %1514 = vmatpush1.bf16.msra.mxu0 %v3935_v1  ;;  %v4009_v1 = vld [vmem:[%s4189_s25 + $0x400] ss:$24 sps:$4 sm:$0xff]  }
  0x78   : > { %1557 = vmatpush1.bf16.msra.mxu1 %v3938_v2  ;;  %1515 = vmatprep.subr.bf16.mxu0 %v3943_v3  ;;  %v4012_v2 = vld [vmem:[%s4189_s25 + $0x4c8] ss:$24 sps:$4 sm:$0xff]   ;;  %v3488_v3 = vcombine.high %v3458_v62, %v3458_v62 }
  0x79   : > { %1558 = vmatprep.subr.bf16.mxu1 %v3946_v4  ;;  %1545 = vmatprep.mubr.bf16.mxu0 %v4140_v0  ;;  %v3571_v4 = vcombine.high %v3543_v63, %v3543_v63 }
  0x7a   : > { %1588 = vmatprep.mubr.bf16.mxu1 %v4140_v0 }
  0x7b   : > { %1516 = vmatpush1.bf16.msra.mxu0 %v3941_v5  ;;  %v3487_v5 = vcombine.low %v3458_v62, %v3458_v62  ;;  %v4083_v62 = vld [vmem:[%s4189_s25 + $0x554] ss:$24 sps:$4 sm:$0xff]  }
  0x7c   : > { %1559 = vmatpush1.bf16.msra.mxu1 %v3944_v6  ;;  %1517 = vmatprep.subr.bf16.mxu0 %v3949_v7  ;;  %v3570_v6 = vcombine.low %v3543_v63, %v3543_v63  ;;  %v4086_v63 = vld [vmem:[%s4189_s25 + $0x61c] ss:$24 sps:$4 sm:$0xff]  }
  0x7d   : > { %1560 = vmatprep.subr.bf16.mxu1 %v3952_v8  ;;  %v1813_v7 = vsel %vm408_vm0, %v3487_v5, 0  ;;  %v4087_v5 = vld [vmem:[%s4189_s25 + $0x580] ss:$24 sps:$4 sm:$0xff]  }
  0x7e   : > { %v2149_v8 = vsel %vm408_vm0, %v3570_v6, 0  ;;  %v4090_v6 = vld [vmem:[%s4189_s25 + $0x648] ss:$24 sps:$4 sm:$0xff]  }
  0x7f   : > { %1518 = vmatpush1.bf16.msra.mxu0 %v3947_v9  ;;  %v4021_v9 = vld [vmem:[%s4189_s25 + $0x444] ss:$24 sps:$4 sm:$0xff]  }
  0x80   : > { %1561 = vmatpush1.bf16.msra.mxu1 %v3950_v10  ;;  %1519 = vmatprep.subr.bf16.mxu0 %v3955_v11  ;;  %v4024_v10 = vld [vmem:[%s4189_s25 + $0x44c] ss:$24 sps:$4 sm:$0xff]   ;;  %v4019_v11 = vld [vmem:[%s4189_s25 + $0x440] ss:$24 sps:$4 sm:$0xff]  }
  0x81   : > { %1562 = vmatprep.subr.bf16.mxu1 %v3958_v12  ;;  %v4022_v12 = vld [vmem:[%s4189_s25 + $0x448] ss:$24 sps:$4 sm:$0xff]  }
  0x83   : > { %1520 = vmatpush1.bf16.msra.mxu0 %v3953_v15  ;;  %v4025_v15 = vld [vmem:[%s4189_s25 + $0x470] ss:$24 sps:$4 sm:$0xff]  }
  0x84   : > { %1563 = vmatpush1.bf16.msra.mxu1 %v3956_v16  ;;  %3404 = vmatprep.subr.msk.bf16.mxu0 %vm408_vm0, %v3399_v17  ;;  %v4028_v16 = vld [vmem:[%s4189_s25 + $0x478] ss:$24 sps:$4 sm:$0xff]   ;;  %v4033_v17 = vld [vmem:[%s4189_s25 + $0x4a4] ss:$24 sps:$4 sm:$0xff]  }
  0x85   : > { %3406 = vmatprep.subr.msk.bf16.mxu1 %vm408_vm0, %v3401_v18  ;;  %v4036_v18 = vld [vmem:[%s4189_s25 + $0x4ac] ss:$24 sps:$4 sm:$0xff]  }
  0x87   : > { %1522 = vmatpush1.bf16.msra.mxu0 %v1459_v22  ;;  %v3544_v22 = vld [vmem:[%s4189_s25 + $0x500] sm:$0xff] }
  0x88   : > { %1565 = vmatpush1.bf16.msra.mxu1 %v1465_v23  ;;  %1818 = vmatprep.subr.bf16.mxu0 %v3965_v21  ;;  %v4042_v21 = vld [vmem:[%s4189_s25 + $0x4dc] ss:$24 sps:$4 sm:$0xff]   ;;  %v3545_v23 = vld [vmem:[%s4189_s25 + $0x508] sm:$0xff] }
  0x89   : > { %1861 = vmatprep.subr.bf16.mxu1 %v3968_v24  ;;  %v4037_v24 = vld [vmem:[%s4189_s25 + $0x4d0] ss:$24 sps:$4 sm:$0xff]  }
  0x8a   : > { %3405 = vmatmul.mubr.msk.bf16.vlgmr.msra.gmra.mrb[20].mxu0 %vm404_vm1, %v4218_v29 }
  0x8b   : > { %3407 = vmatmul.mubr.msk.bf16.vlgmr.msra.gmra.mrb[20].mxu1 %vm404_vm1, %v4218_v29  ;;  %1819 = vmatpush1.bf16.msra.mxu0 %v3963_v25  ;;  %v4040_v25 = vld [vmem:[%s4189_s25 + $0x4d8] ss:$24 sps:$4 sm:$0xff]  }
  0x8c   : > { %1862 = vmatpush1.bf16.msra.mxu1 %v3966_v26  ;;  %1820 = vmatprep.subr.bf16.mxu0 %v3971_v27  ;;  %v3573_v26 = vcombine.high %v3544_v22, %v3544_v22  ;;  %v3575_v27 = vcombine.high %v3545_v23, %v3545_v23 }
  0x8d   : > { %1863 = vmatprep.subr.bf16.mxu1 %v3974_v28  ;;  %1850 = vmatprep.mubr.bf16.mxu0 %v4140_v0  ;;  %v3572_v28 = vcombine.low %v3544_v22, %v3544_v22  ;;  %v4111_v22 = vld [vmem:[%s4189_s25 + $0x624] ss:$24 sps:$4 sm:$0xff]  }
  0x8e   : > { %1893 = vmatprep.mubr.bf16.mxu1 %v4140_v0 }
  0x8f   : > { %1821 = vmatpush1.bf16.msra.mxu0 %v3969_v30  ;;  %v3574_v30 = vcombine.low %v3545_v23, %v3545_v23  ;;  %v4114_v23 = vld [vmem:[%s4189_s25 + $0x62c] ss:$24 sps:$4 sm:$0xff]  }
  0x90   : > { %1864 = vmatpush1.bf16.msra.mxu1 %v3972_v31  ;;  %1822 = vmatprep.subr.bf16.mxu0 %v3977_v32  ;;  %v2155_v31 = vsel %vm408_vm0, %v3572_v28, 0  ;;  %v4519_v28 = vpop.permute.xlu0 %256 }
  0x91   : > { %1865 = vmatprep.subr.bf16.mxu1 %v3980_v33  ;;  %v2161_v32 = vsel %vm408_vm0, %v3574_v30, 0  ;;  %v4049_v33 = vld [vmem:[%s4189_s25 + $0x514] ss:$24 sps:$4 sm:$0xff]   ;;  %v4115_v30 = vld [vmem:[%s4189_s25 + $0x650] ss:$24 sps:$4 sm:$0xff]  }
  0x93   : > { %1823 = vmatpush1.bf16.msra.mxu0 %v3975_v34  ;;  %v4052_v34 = vld [vmem:[%s4189_s25 + $0x51c] ss:$24 sps:$4 sm:$0xff]  }
  0x94   : > { %1866 = vmatpush1.bf16.msra.mxu1 %v3978_v35  ;;  %1824 = vmatprep.subr.bf16.mxu0 %v3983_v36  ;;  %v4047_v35 = vld [vmem:[%s4189_s25 + $0x510] ss:$24 sps:$4 sm:$0xff]  }
  0x95   : > { %1867 = vmatprep.subr.bf16.mxu1 %v3986_v37  ;;  %v4050_v36 = vld [vmem:[%s4189_s25 + $0x518] ss:$24 sps:$4 sm:$0xff]   ;;  %v4055_v37 = vld [vmem:[%s4189_s25 + $0x544] ss:$24 sps:$4 sm:$0xff]  }
  0x97   : > { %1825 = vmatpush1.bf16.msra.mxu0 %v3981_v40  ;;  %v4053_v40 = vld [vmem:[%s4189_s25 + $0x540] ss:$24 sps:$4 sm:$0xff]  }
  0x98   : > { %1868 = vmatpush1.bf16.msra.mxu1 %v3984_v41  ;;  %3489 = vmatprep.subr.msk.bf16.mxu0 %vm408_vm0, %v3484_v42  ;;  %v4056_v41 = vld [vmem:[%s4189_s25 + $0x548] ss:$24 sps:$4 sm:$0xff]   ;;  %v4061_v42 = vld [vmem:[%s4189_s25 + $0x574] ss:$24 sps:$4 sm:$0xff]  }
  0x99   : > { %3491 = vmatprep.subr.msk.bf16.mxu1 %vm408_vm0, %v3486_v43  ;;  %v4064_v43 = vld [vmem:[%s4189_s25 + $0x57c] ss:$24 sps:$4 sm:$0xff]  }
  0x9b   : > { %1827 = vmatpush1.bf16.msra.mxu0 %v1801_v46  ;;  %v4067_v46 = vld [vmem:[%s4189_s25 + $0x5a4] ss:$24 sps:$4 sm:$0xff]  }
  0x9c   : > { %1870 = vmatpush1.bf16.msra.mxu1 %v1807_v47  ;;  %1904 = vmatprep.subr.bf16.mxu0 %v3993_v48  ;;  %v4070_v47 = vld [vmem:[%s4189_s25 + $0x5ac] ss:$24 sps:$4 sm:$0xff]   ;;  %v3630_v48 = vld [vmem:[%s4189_s25 + $0x5d0] sm:$0xff] }
  0x9d   : > { %2166 = vmatprep.subr.bf16.mxu1 %v3996_v49  ;;  %v3631_v49 = vld [vmem:[%s4189_s25 + $0x5d8] sm:$0xff] }
  0x9e   : > { %3490 = vmatmul.mubr.msk.bf16.vlgmr.msra.gmra.mrb[24].mxu0 %vm404_vm1, %v4218_v29 }
  0x9f   : > { %3492 = vmatmul.mubr.msk.bf16.vlgmr.msra.gmra.mrb[24].mxu1 %vm404_vm1, %v4218_v29  ;;  %1905 = vmatpush1.bf16.msra.mxu0 %v3991_v50  ;;  %v4065_v50 = vld [vmem:[%s4189_s25 + $0x5a0] ss:$24 sps:$4 sm:$0xff]  }
  0xa0   : > { %2167 = vmatpush1.bf16.msra.mxu1 %v3994_v51  ;;  %1906 = vmatprep.subr.bf16.mxu0 %v3999_v52  ;;  %v4068_v51 = vld [vmem:[%s4189_s25 + $0x5a8] ss:$24 sps:$4 sm:$0xff]   ;;  %v3658_v52 = vcombine.high %v3630_v48, %v3630_v48 }
  0xa1   : > { %2168 = vmatprep.subr.bf16.mxu1 %v4002_v53  ;;  %1936 = vmatprep.mubr.bf16.mxu0 %v4140_v0  ;;  %v3660_v53 = vcombine.high %v3631_v49, %v3631_v49 }
  0xa2   : > { %2198 = vmatprep.mubr.bf16.mxu1 %v4140_v0 }
  0xa3   : > { %1907 = vmatpush1.bf16.msra.mxu0 %v3997_v54  ;;  %v3657_v54 = vcombine.low %v3630_v48, %v3630_v48 }
  0xa4   : > { %2169 = vmatpush1.bf16.msra.mxu1 %v4000_v55  ;;  %1908 = vmatprep.subr.bf16.mxu0 %v4005_v56  ;;  %v3659_v55 = vcombine.low %v3631_v49, %v3631_v49 }
  0xa5   : > { %2170 = vmatprep.subr.bf16.mxu1 %v4008_v57  ;;  %v2497_v56 = vsel %vm408_vm0, %v3657_v54, 0 }
  0xa6   : > { %v2503_v57 = vsel %vm408_vm0, %v3659_v55, 0 }
  0xa7   : > { %1909 = vmatpush1.bf16.msra.mxu0 %v4003_v58  ;;  %v4077_v58 = vld [vmem:[%s4189_s25 + $0x524] ss:$24 sps:$4 sm:$0xff]  }
  0xa8   : > { %2171 = vmatpush1.bf16.msra.mxu1 %v4006_v59  ;;  %1910 = vmatprep.subr.bf16.mxu0 %v4011_v60  ;;  %v4080_v59 = vld [vmem:[%s4189_s25 + $0x5ec] ss:$24 sps:$4 sm:$0xff]   ;;  %v4075_v60 = vld [vmem:[%s4189_s25 + $0x520] ss:$24 sps:$4 sm:$0xff]  }
  0xa9   : > { %2172 = vmatprep.subr.bf16.mxu1 %v4014_v61  ;;  %v4078_v61 = vld [vmem:[%s4189_s25 + $0x5e8] ss:$24 sps:$4 sm:$0xff]  }
  0xab   : > { %1911 = vmatpush1.bf16.msra.mxu0 %v4009_v1  ;;  %v4081_v1 = vld [vmem:[%s4189_s25 + $0x550] ss:$24 sps:$4 sm:$0xff]  }
  0xac   : > { %2173 = vmatpush1.bf16.msra.mxu1 %v4012_v2  ;;  %3493 = vmatprep.subr.msk.bf16.mxu0 %vm408_vm0, %v3488_v3  ;;  %v4084_v2 = vld [vmem:[%s4189_s25 + $0x618] ss:$24 sps:$4 sm:$0xff]   ;;  %v4089_v3 = vld [vmem:[%s4189_s25 + $0x584] ss:$24 sps:$4 sm:$0xff]  }
  0xad   : > { %3576 = vmatprep.subr.msk.bf16.mxu1 %vm408_vm0, %v3571_v4  ;;  %v4092_v4 = vld [vmem:[%s4189_s25 + $0x64c] ss:$24 sps:$4 sm:$0xff]  }
  0xaf   : > { %1913 = vmatpush1.bf16.msra.mxu0 %v1813_v7  ;;  %v4095_v7 = vld [vmem:[%s4189_s25 + $0x5b4] ss:$24 sps:$4 sm:$0xff]  }
  0xb0   : > { %2175 = vmatpush1.bf16.msra.mxu1 %v2149_v8  ;;  %2209 = vmatprep.subr.bf16.mxu0 %v4021_v9  ;;  %v4098_v8 = vld [vmem:[%s4189_s25 + $0x67c] ss:$24 sps:$4 sm:$0xff]   ;;  %v3632_v9 = vld [vmem:[%s4189_s25 + $0x5e0] sm:$0xff] }
  0xb1   : > { %2252 = vmatprep.subr.bf16.mxu1 %v4024_v10  ;;  %v3717_v10 = vld [vmem:[%s4189_s25 + $0x6a8] sm:$0xff] }
  0xb2   : > { %3494 = vmatmul.mubr.msk.bf16.vlgmr.msra.gmra.mrb[28].mxu0 %vm404_vm1, %v4218_v29 }
  0xb3   : > { %3577 = vmatmul.mubr.msk.bf16.vlgmr.msra.gmra.mrb[28].mxu1 %vm404_vm1, %v4218_v29  ;;  %2210 = vmatpush1.bf16.msra.mxu0 %v4019_v11  ;;  %v4031_v29 = vld [vmem:[%s4189_s25 + $0x4a0] ss:$24 sps:$4 sm:$0xff]   ;;  %v4093_v11 = vld [vmem:[%s4189_s25 + $0x5b0] ss:$24 sps:$4 sm:$0xff]  }
  0xb4   : > { %2253 = vmatpush1.bf16.msra.mxu1 %v4022_v12  ;;  %2211 = vmatprep.subr.bf16.mxu0 %v4027_v13  ;;  %v4096_v12 = vld [vmem:[%s4189_s25 + $0x678] ss:$24 sps:$4 sm:$0xff]   ;;  %v3662_v13 = vcombine.high %v3632_v9, %v3632_v9 }
  0xb5   : > { %2254 = vmatprep.subr.bf16.mxu1 %v4030_v14  ;;  %2241 = vmatprep.mubr.bf16.mxu0 %v4140_v0  ;;  %v3745_v14 = vcombine.high %v3717_v10, %v3717_v10 }
  0xb6   : > { %2284 = vmatprep.mubr.bf16.mxu1 %v4140_v0 }
  0xb7   : > { %2212 = vmatpush1.bf16.msra.mxu0 %v4025_v15  ;;  %v3661_v15 = vcombine.low %v3632_v9, %v3632_v9 }
  0xb8   : > { %2255 = vmatpush1.bf16.msra.mxu1 %v4028_v16  ;;  %2213 = vmatprep.subr.bf16.mxu0 %v4033_v17  ;;  %v3744_v16 = vcombine.low %v3717_v10, %v3717_v10 }
  0xb9   : > { %2256 = vmatprep.subr.bf16.mxu1 %v4036_v18  ;;  %v2509_v17 = vsel %vm408_vm0, %v3661_v15, 0 }
  0xba   : > { %v2845_v18 = vsel %vm408_vm0, %v3744_v16, 0 }
  0xbb   : > { %2214 = vmatpush1.bf16.msra.mxu0 %v4031_v29  ;;  %v4105_v29 = vld [vmem:[%s4189_s25 + $0x5f4] ss:$24 sps:$4 sm:$0xff]  }
  0xbc   : > { %2257 = vmatpush1.bf16.msra.mxu1 %v4034_v19  ;;  %2215 = vmatprep.subr.bf16.mxu0 %v4039_v20  ;;  %v4108_v19 = vld [vmem:[%s4189_s25 + $0x5fc] ss:$24 sps:$4 sm:$0xff]   ;;  %v4103_v20 = vld [vmem:[%s4189_s25 + $0x5f0] ss:$24 sps:$4 sm:$0xff]  }
  0xbd   : > { %2258 = vmatprep.subr.bf16.mxu1 %v4042_v21  ;;  %v4106_v21 = vld [vmem:[%s4189_s25 + $0x5f8] ss:$24 sps:$4 sm:$0xff]  }
  0xbf   : > { %2216 = vmatpush1.bf16.msra.mxu0 %v4037_v24  ;;  %v4109_v24 = vld [vmem:[%s4189_s25 + $0x620] ss:$24 sps:$4 sm:$0xff]  }
  0xc0   : > { %2259 = vmatpush1.bf16.msra.mxu1 %v4040_v25  ;;  %3578 = vmatprep.subr.msk.bf16.mxu0 %vm408_vm0, %v3573_v26  ;;  %v4112_v25 = vld [vmem:[%s4189_s25 + $0x628] ss:$24 sps:$4 sm:$0xff]   ;;  %v4117_v26 = vld [vmem:[%s4189_s25 + $0x654] ss:$24 sps:$4 sm:$0xff]  }
  0xc1   : > { %3580 = vmatprep.subr.msk.bf16.mxu1 %vm408_vm0, %v3575_v27  ;;  %v4120_v27 = vld [vmem:[%s4189_s25 + $0x65c] ss:$24 sps:$4 sm:$0xff]  }
  0xc3   : > { %2218 = vmatpush1.bf16.msra.mxu0 %v2155_v31  ;;  %v4118_v31 = vld [vmem:[%s4189_s25 + $0x658] ss:$24 sps:$4 sm:$0xff]  }
  0xc4   : > { %2261 = vmatpush1.bf16.msra.mxu1 %v2161_v32  ;;  %2514 = vmatprep.subr.bf16.mxu0 %v4049_v33  ;;  %v4123_v32 = vld [vmem:[%s4189_s25 + $0x684] ss:$24 sps:$4 sm:$0xff]  }
  0xc5   : > { %2557 = vmatprep.subr.bf16.mxu1 %v4052_v34  ;;  %v4126_v33 = vld [vmem:[%s4189_s25 + $0x68c] ss:$24 sps:$4 sm:$0xff]   ;;  %v3718_v34 = vld [vmem:[%s4189_s25 + $0x6b0] sm:$0xff] }
  0xc6   : > { %3579 = vmatmul.mubr.msk.bf16.vlgmr.msra.gmra.mrb[32].mxu0 %vm404_vm1, %v4451_v39 }
  0xc7   : > { %3581 = vmatmul.mubr.msk.bf16.vlgmr.msra.gmra.mrb[32].mxu1 %vm404_vm1, %v4451_v39  ;;  %2515 = vmatpush1.bf16.msra.mxu0 %v4047_v35  ;;  %v3719_v35 = vld [vmem:[%s4189_s25 + $0x6b8] sm:$0xff] }
  0xc8   : > { %2558 = vmatpush1.bf16.msra.mxu1 %v4050_v36  ;;  %2516 = vmatprep.subr.bf16.mxu0 %v4055_v37  ;;  %v4121_v36 = vld [vmem:[%s4189_s25 + $0x680] ss:$24 sps:$4 sm:$0xff]  }
  0xc9   : > { %2559 = vmatprep.subr.bf16.mxu1 %v4058_v38  ;;  %2546 = vmatprep.mubr.bf16.mxu0 %v4140_v0  ;;  %v4124_v37 = vld [vmem:[%s4189_s25 + $0x688] ss:$24 sps:$4 sm:$0xff]   ;;  %v3746_v38 = vcombine.low %v3718_v34, %v3718_v34 }
  0xca   : > { %2589 = vmatprep.mubr.bf16.mxu1 %v4140_v0 }
  0xcb   : > { %2517 = vmatpush1.bf16.msra.mxu0 %v4053_v40  ;;  %v4530_v40 = vpop.permute.xlu0 %261 }
  0xcc   : > { %2560 = vmatpush1.bf16.msra.mxu1 %v4056_v41  ;;  %2518 = vmatprep.subr.bf16.mxu0 %v4061_v42  ;;  %v3747_v41 = vcombine.high %v3718_v34, %v3718_v34  ;;  %v3749_v42 = vcombine.high %v3719_v35, %v3719_v35 }
  0xcd   : > { %2561 = vmatprep.subr.bf16.mxu1 %v4064_v43 }
  0xcf   : > { %2519 = vmatpush1.bf16.msra.mxu0 %v4059_v44 }
  0xd0   : > { %2562 = vmatpush1.bf16.msra.mxu1 %v4062_v45  ;;  %2520 = vmatprep.subr.bf16.mxu0 %v4067_v46 }
  0xd1   : > { %2563 = vmatprep.subr.bf16.mxu1 %v4070_v47 }
  0xd3   : > { %2521 = vmatpush1.bf16.msra.mxu0 %v4065_v50 }
  0xd4   : > { %2564 = vmatpush1.bf16.msra.mxu1 %v4068_v51  ;;  %3663 = vmatprep.subr.msk.bf16.mxu0 %vm408_vm0, %v3658_v52 }
  0xd5   : > { %3665 = vmatprep.subr.msk.bf16.mxu1 %vm408_vm0, %v3660_v53  ;;  %v2851_v53 = vsel %vm408_vm0, %v3746_v38, 0 }
  0xd7   : > { %2523 = vmatpush1.bf16.msra.mxu0 %v2497_v56 }
  0xd8   : > { %2566 = vmatpush1.bf16.msra.mxu1 %v2503_v57  ;;  %2600 = vmatprep.subr.bf16.mxu0 %v4077_v58 }
  0xd9   : > { %2862 = vmatprep.subr.bf16.mxu1 %v4080_v59 }
  0xda   : > { %3664 = vmatmul.mubr.msk.bf16.vlgmr.msra.gmra.mrb[36].mxu0 %vm404_vm1, %v4451_v39 }
  0xdb   : > { %3666 = vmatmul.mubr.msk.bf16.vlgmr.msra.gmra.mrb[36].mxu1 %vm404_vm1, %v4451_v39  ;;  %2601 = vmatpush1.bf16.msra.mxu0 %v4075_v60 }
  0xdc   : > { %2863 = vmatpush1.bf16.msra.mxu1 %v4078_v61  ;;  %2602 = vmatprep.subr.bf16.mxu0 %v4083_v62 }
  0xdd   : > { %2864 = vmatprep.subr.bf16.mxu1 %v4086_v63  ;;  %2632 = vmatprep.mubr.bf16.mxu0 %v4140_v0 }
  0xde   : > { %2894 = vmatprep.mubr.bf16.mxu1 %v4140_v0 }
  0xdf   : > { %2603 = vmatpush1.bf16.msra.mxu0 %v4081_v1 }
  0xe0   : > { %2865 = vmatpush1.bf16.msra.mxu1 %v4084_v2  ;;  %2604 = vmatprep.subr.bf16.mxu0 %v4089_v3 }
  0xe1   : > { %2866 = vmatprep.subr.bf16.mxu1 %v4092_v4 }
  0xe3   : > { %2605 = vmatpush1.bf16.msra.mxu0 %v4087_v5 }
  0xe4   : > { %2867 = vmatpush1.bf16.msra.mxu1 %v4090_v6  ;;  %2606 = vmatprep.subr.bf16.mxu0 %v4095_v7 }
  0xe5   : > { %2868 = vmatprep.subr.bf16.mxu1 %v4098_v8 }
  0xe7   : > { %2607 = vmatpush1.bf16.msra.mxu0 %v4093_v11 }
  0xe8   : > { %2869 = vmatpush1.bf16.msra.mxu1 %v4096_v12  ;;  %3667 = vmatprep.subr.msk.bf16.mxu0 %vm408_vm0, %v3662_v13 }
  0xe9   : > { %3750 = vmatprep.subr.msk.bf16.mxu1 %vm408_vm0, %v3745_v14 }
  0xeb   : > { %2609 = vmatpush1.bf16.msra.mxu0 %v2509_v17 }
  0xec   : > { %2871 = vmatpush1.bf16.msra.mxu1 %v2845_v18  ;;  %2905 = vmatprep.subr.bf16.mxu0 %v4105_v29 }
  0xed   : > { %2948 = vmatprep.subr.bf16.mxu1 %v4108_v19 }
  0xee   : > { %3668 = vmatmul.mubr.msk.bf16.vlgmr.msra.gmra.mrb[40].mxu0 %vm404_vm1, %v4451_v39 }
  0xef   : > { %3751 = vmatmul.mubr.msk.bf16.vlgmr.msra.gmra.mrb[40].mxu1 %vm404_vm1, %v4451_v39  ;;  %2906 = vmatpush1.bf16.msra.mxu0 %v4103_v20 }
  0xf0   : > { %2949 = vmatpush1.bf16.msra.mxu1 %v4106_v21  ;;  %2907 = vmatprep.subr.bf16.mxu0 %v4111_v22 }
  0xf1   : > { %2950 = vmatprep.subr.bf16.mxu1 %v4114_v23  ;;  %2937 = vmatprep.mubr.bf16.mxu0 %v4140_v0 }
  0xf2   : > { %2980 = vmatprep.mubr.bf16.mxu1 %v4140_v0  ;;  %v3748_v0 = vcombine.low %v3719_v35, %v3719_v35 }
  0xf3   : > { %2908 = vmatpush1.bf16.msra.mxu0 %v4109_v24 }
  0xf4   : > { %2951 = vmatpush1.bf16.msra.mxu1 %v4112_v25  ;;  %2909 = vmatprep.subr.bf16.mxu0 %v4117_v26  ;;  %v2857_v54 = vsel %vm408_vm0, %v3748_v0, 0 }
  0xf5   : > { %2952 = vmatprep.subr.bf16.mxu1 %v4120_v27 }
  0xf7   : > { %2910 = vmatpush1.bf16.msra.mxu0 %v4115_v30 }
  0xf8   : > { %2953 = vmatpush1.bf16.msra.mxu1 %v4118_v31  ;;  %2911 = vmatprep.subr.bf16.mxu0 %v4123_v32 }
  0xf9   : > { %2954 = vmatprep.subr.bf16.mxu1 %v4126_v33  ;;  %v461_v43 = vpop.f32.mrb[0].mxu0 }
  0xfa   : > { %v504_v44 = vpop.f32.mrb[0].mxu1  ;;  %v462_v45 = vadd.f32 %v461_v43, %v4519_v28  ;;  %v463_v47 = vpop.f32.mrb[1].mxu0 }
  0xfb   : > { %v505_v46 = vadd.f32 %v504_v44, %v4519_v28  ;;  %v506_v48 = vpop.f32.mrb[1].mxu1  ;;  %v464_v49 = vadd.f32 %v463_v47, %v4519_v28  ;;  %v465_v51 = vpop.f32.mrb[2].mxu0  ;;  %2912 = vmatpush1.bf16.msra.mxu0 %v4121_v36 }
  0xfc   : > { %v507_v50 = vadd.f32 %v506_v48, %v4519_v28  ;;  %v508_v52 = vpop.f32.mrb[2].mxu1  ;;  %2955 = vmatpush1.bf16.msra.mxu1 %v4124_v37  ;;  %556 = vst [vmem:[%s4535_s7] sm:$0xff] %v462_v45  ;;  %v569_v55 = vmax.f32 %v462_v45, 0.0  ;;  %v466_v57 = vadd.f32 %v465_v51, %v4530_v40  ;;  %v467_v59 = vpop.f32.mrb[3].mxu0  ;;  %3752 = vmatprep.subr.msk.bf16.mxu0 %vm408_vm0, %v3747_v41 }
  0xfd   : > { %558 = vst [vmem:[%s4535_s7 + $0x10] sm:$0xff] %v505_v46  ;;  %v571_v56 = vmax.f32 %v505_v46, 0.0  ;;  %v509_v58 = vadd.f32 %v508_v52, %v4530_v40  ;;  %v510_v60 = vpop.f32.mrb[3].mxu1  ;;  %3754 = vmatprep.subr.msk.bf16.mxu1 %vm408_vm0, %v3749_v42  ;;  %557 = vst [vmem:[%s4535_s7 + $0x8] sm:$0xff] %v464_v49  ;;  %v570_v61 = vmax.f32 %v464_v49, 0.0  ;;  %v468_v63 = vadd.f32 %v467_v59, %v4530_v40 }
  0xfe   : > { %559 = vst [vmem:[%s4535_s7 + $0x18] sm:$0xff] %v507_v50  ;;  %v572_v62 = vmax.f32 %v507_v50, 0.0  ;;  %v511_v1 = vadd.f32 %v510_v60, %v4530_v40  ;;  %581 = vst [vmem:[%s4542_s10] sm:$0xff] %v569_v55  ;;  %v575_v2 = vmax.f32 %v466_v57, 0.0 }
  0xff   : > { %583 = vst [vmem:[%s4542_s10 + $0x10] sm:$0xff] %v571_v56  ;;  %563 = vst [vmem:[%s4535_s7 + $0x30] sm:$0xff] %v466_v57  ;;  %v577_v3 = vmax.f32 %v509_v58, 0.0  ;;  %v576_v4 = vmax.f32 %v468_v63, 0.0  ;;  %2914 = vmatpush1.bf16.msra.mxu0 %v2851_v53 }
 0x100   : > { %565 = vst [vmem:[%s4535_s7 + $0x40] sm:$0xff] %v509_v58  ;;  %582 = vst [vmem:[%s4542_s10 + $0x8] sm:$0xff] %v570_v61  ;;  %v578_v5 = vmax.f32 %v511_v1, 0.0  ;;  %2957 = vmatpush1.bf16.msra.mxu1 %v2857_v54 }
 0x101   : > { %584 = vst [vmem:[%s4542_s10 + $0x18] sm:$0xff] %v572_v62  ;;  %564 = vst [vmem:[%s4535_s7 + $0x38] sm:$0xff] %v468_v63 }
 0x102   : > { %566 = vst [vmem:[%s4535_s7 + $0x48] sm:$0xff] %v511_v1  ;;  %587 = vst [vmem:[%s4542_s10 + $0x30] sm:$0xff] %v575_v2  ;;  %3753 = vmatmul.mubr.msk.bf16.vlgmr.msra.gmra.mrb[44].mxu0 %vm404_vm1, %v4451_v39 }
 0x103   : > { %589 = vst [vmem:[%s4542_s10 + $0x40] sm:$0xff] %v577_v3  ;;  %588 = vst [vmem:[%s4542_s10 + $0x38] sm:$0xff] %v576_v4  ;;  %3755 = vmatmul.mubr.msk.bf16.vlgmr.msra.gmra.mrb[44].mxu1 %vm404_vm1, %v4451_v39 }
 0x104   : > { %590 = vst [vmem:[%s4542_s10 + $0x48] sm:$0xff] %v578_v5 }
 0x10d   : > { %v547_v6 = vpop.f32.mrb[4].mxu0 }
 0x10e   : > { %v808_v7 = vpop.f32.mrb[4].mxu1  ;;  %v548_v8 = vadd.f32 %v547_v6, %v4519_v28  ;;  %v549_v10 = vpop.f32.mrb[5].mxu0 }
 0x10f   : > { %v809_v9 = vadd.f32 %v808_v7, %v4519_v28  ;;  %v810_v11 = vpop.f32.mrb[5].mxu1  ;;  %v550_v12 = vadd.f32 %v549_v10, %v4519_v28  ;;  %v551_v14 = vpop.f32.mrb[6].mxu0 }
 0x110   : > { %v811_v13 = vadd.f32 %v810_v11, %v4519_v28  ;;  %v812_v15 = vpop.f32.mrb[6].mxu1  ;;  %560 = vst [vmem:[%s4535_s7 + $0x20] sm:$0xff] %v548_v8  ;;  %v573_v39 = vmax.f32 %v548_v8, 0.0  ;;  %v552_v17 = vadd.f32 %v551_v14, %v4530_v40  ;;  %v553_v29 = vpop.f32.mrb[7].mxu0 }
 0x111   : > { %3234 = vst [vmem:[%s4535_s7 + $0x60] sm:$0xff] %v809_v9  ;;  %v916_v16 = vmax.f32 %v809_v9, 0.0  ;;  %v813_v18 = vadd.f32 %v812_v15, %v4530_v40  ;;  %v814_v19 = vpop.f32.mrb[7].mxu1  ;;  %562 = vst.msk [vmem:[%s4535_s7 + $0x28] sm:$0xff] %vm561_vm2, %v550_v12  ;;  %v574_v20 = vmax.f32 %v550_v12, 0.0  ;;  %v554_v22 = vadd.f32 %v553_v29, %v4530_v40 }
 0x112   : > { %3235 = vst [vmem:[%s4535_s7 + $0x68] sm:$0xff] %v811_v13  ;;  %v917_v21 = vmax.f32 %v811_v13, 0.0  ;;  %v815_v23 = vadd.f32 %v814_v19, %v4530_v40  ;;  %585 = vst [vmem:[%s4542_s10 + $0x20] sm:$0xff] %v573_v39  ;;  %v579_v24 = vmax.f32 %v552_v17, 0.0 }
 0x113   : > { %3246 = vst [vmem:[%s4542_s10 + $0x60] sm:$0xff] %v916_v16  ;;  %567 = vst [vmem:[%s4535_s7 + $0x50] sm:$0xff] %v552_v17  ;;  %v922_v25 = vmax.f32 %v813_v18, 0.0  ;;  %v580_v26 = vmax.f32 %v554_v22, 0.0 }
 0x114   : > { %3240 = vst [vmem:[%s4535_s7 + $0x90] sm:$0xff] %v813_v18  ;;  %586 = vst.msk [vmem:[%s4542_s10 + $0x28] sm:$0xff] %vm561_vm2, %v574_v20  ;;  %v923_v27 = vmax.f32 %v815_v23, 0.0 }
 0x115   : > { %3247 = vst [vmem:[%s4542_s10 + $0x68] sm:$0xff] %v917_v21  ;;  %568 = vst.msk [vmem:[%s4535_s7 + $0x58] sm:$0xff] %vm561_vm2, %v554_v22 }
 0x116   : > { %3241 = vst [vmem:[%s4535_s7 + $0x98] sm:$0xff] %v815_v23  ;;  %591 = vst [vmem:[%s4542_s10 + $0x50] sm:$0xff] %v579_v24 }
 0x117   : > { %3252 = vst [vmem:[%s4542_s10 + $0x90] sm:$0xff] %v922_v25  ;;  %592 = vst.msk [vmem:[%s4542_s10 + $0x58] sm:$0xff] %vm561_vm2, %v580_v26 }
 0x118   : > { %3253 = vst [vmem:[%s4542_s10 + $0x98] sm:$0xff] %v923_v27 }
 0x121   : > { %v851_v30 = vpop.f32.mrb[8].mxu0 }
 0x122   : > { %v894_v31 = vpop.f32.mrb[8].mxu1  ;;  %v852_v32 = vadd.f32 %v851_v30, %v4519_v28  ;;  %v853_v34 = vpop.f32.mrb[9].mxu0 }
 0x123   : > { %v895_v33 = vadd.f32 %v894_v31, %v4519_v28  ;;  %v896_v35 = vpop.f32.mrb[9].mxu1  ;;  %v854_v36 = vadd.f32 %v853_v34, %v4519_v28  ;;  %v855_v38 = vpop.f32.mrb[10].mxu0 }
 0x124   : > { %v897_v37 = vadd.f32 %v896_v35, %v4519_v28  ;;  %v898_v0 = vpop.f32.mrb[10].mxu1  ;;  %3236 = vst [vmem:[%s4535_s7 + $0x70] sm:$0xff] %v852_v32  ;;  %v918_v41 = vmax.f32 %v852_v32, 0.0  ;;  %v856_v43 = vadd.f32 %v855_v38, %v4530_v40  ;;  %v857_v45 = vpop.f32.mrb[11].mxu0 }
 0x125   : > { %3238 = vst [vmem:[%s4535_s7 + $0x80] sm:$0xff] %v895_v33  ;;  %v920_v42 = vmax.f32 %v895_v33, 0.0  ;;  %v899_v44 = vadd.f32 %v898_v0, %v4530_v40  ;;  %v900_v46 = vpop.f32.mrb[11].mxu1  ;;  %3237 = vst [vmem:[%s4535_s7 + $0x78] sm:$0xff] %v854_v36  ;;  %v919_v47 = vmax.f32 %v854_v36, 0.0  ;;  %v858_v49 = vadd.f32 %v857_v45, %v4530_v40 }
 0x126   : > { %3239 = vst.msk [vmem:[%s4535_s7 + $0x88] sm:$0xff] %vm561_vm2, %v897_v37  ;;  %v921_v48 = vmax.f32 %v897_v37, 0.0  ;;  %v901_v50 = vadd.f32 %v900_v46, %v4530_v40  ;;  %3248 = vst [vmem:[%s4542_s10 + $0x70] sm:$0xff] %v918_v41  ;;  %v924_v51 = vmax.f32 %v856_v43, 0.0 }
 0x127   : > { %3250 = vst [vmem:[%s4542_s10 + $0x80] sm:$0xff] %v920_v42  ;;  %3242 = vst [vmem:[%s4535_s7 + $0xa0] sm:$0xff] %v856_v43  ;;  %v926_v52 = vmax.f32 %v899_v44, 0.0  ;;  %v925_v53 = vmax.f32 %v858_v49, 0.0 }
 0x128   : > { %3244 = vst [vmem:[%s4535_s7 + $0xb0] sm:$0xff] %v899_v44  ;;  %3249 = vst [vmem:[%s4542_s10 + $0x78] sm:$0xff] %v919_v47  ;;  %v927_v54 = vmax.f32 %v901_v50, 0.0 }
 0x129   : > { %3251 = vst.msk [vmem:[%s4542_s10 + $0x88] sm:$0xff] %vm561_vm2, %v921_v48  ;;  %3243 = vst [vmem:[%s4535_s7 + $0xa8] sm:$0xff] %v858_v49 }
 0x12a   : > { %3245 = vst.msk [vmem:[%s4535_s7 + $0xb8] sm:$0xff] %vm561_vm2, %v901_v50  ;;  %3254 = vst [vmem:[%s4542_s10 + $0xa0] sm:$0xff] %v924_v51 }
 0x12b   : > { %3256 = vst [vmem:[%s4542_s10 + $0xb0] sm:$0xff] %v926_v52  ;;  %3255 = vst [vmem:[%s4542_s10 + $0xa8] sm:$0xff] %v925_v53 }
 0x12c   : > { %3257 = vst.msk [vmem:[%s4542_s10 + $0xb8] sm:$0xff] %vm561_vm2, %v927_v54 }
 0x135   : > { %v1156_v55 = vpop.f32.mrb[12].mxu0 }
 0x136   : > { %v1199_v56 = vpop.f32.mrb[12].mxu1  ;;  %v1157_v57 = vadd.f32 %v1156_v55, %v4519_v28  ;;  %v1158_v59 = vpop.f32.mrb[13].mxu0 }
 0x137   : > { %v1200_v58 = vadd.f32 %v1199_v56, %v4519_v28  ;;  %v1201_v60 = vpop.f32.mrb[13].mxu1  ;;  %v1159_v61 = vadd.f32 %v1158_v59, %v4519_v28  ;;  %v1160_v63 = vpop.f32.mrb[14].mxu0 }
 0x138   : > { %v1202_v62 = vadd.f32 %v1201_v60, %v4519_v28  ;;  %v1203_v1 = vpop.f32.mrb[14].mxu1  ;;  %3321 = vst [vmem:[%s4535_s7 + $0xc0] sm:$0xff] %v1157_v57  ;;  %v1264_v2 = vmax.f32 %v1157_v57, 0.0  ;;  %v1161_v4 = vadd.f32 %v1160_v63, %v4530_v40  ;;  %v1162_v6 = vpop.f32.mrb[15].mxu0 }
 0x139   : > { %3323 = vst [vmem:[%s4535_s7 + $0xd0] sm:$0xff] %v1200_v58  ;;  %v1266_v3 = vmax.f32 %v1200_v58, 0.0  ;;  %v1204_v5 = vadd.f32 %v1203_v1, %v4530_v40  ;;  %v1205_v7 = vpop.f32.mrb[15].mxu1  ;;  %3322 = vst [vmem:[%s4535_s7 + $0xc8] sm:$0xff] %v1159_v61  ;;  %v1265_v8 = vmax.f32 %v1159_v61, 0.0  ;;  %v1163_v10 = vadd.f32 %v1162_v6, %v4530_v40 }
 0x13a   : > { %3324 = vst [vmem:[%s4535_s7 + $0xd8] sm:$0xff] %v1202_v62  ;;  %v1267_v9 = vmax.f32 %v1202_v62, 0.0  ;;  %v1206_v11 = vadd.f32 %v1205_v7, %v4530_v40  ;;  %3333 = vst [vmem:[%s4542_s10 + $0xc0] sm:$0xff] %v1264_v2  ;;  %v1270_v12 = vmax.f32 %v1161_v4, 0.0 }
 0x13b   : > { %3335 = vst [vmem:[%s4542_s10 + $0xd0] sm:$0xff] %v1266_v3  ;;  %3327 = vst [vmem:[%s4535_s7 + $0xf0] sm:$0xff] %v1161_v4  ;;  %v1272_v13 = vmax.f32 %v1204_v5, 0.0  ;;  %v1271_v14 = vmax.f32 %v1163_v10, 0.0 }
 0x13c   : > { %3329 = vst [vmem:[%s4535_s7 + $0x100] sm:$0xff] %v1204_v5  ;;  %3334 = vst [vmem:[%s4542_s10 + $0xc8] sm:$0xff] %v1265_v8  ;;  %v1273_v15 = vmax.f32 %v1206_v11, 0.0 }
 0x13d   : > { %3336 = vst [vmem:[%s4542_s10 + $0xd8] sm:$0xff] %v1267_v9  ;;  %3328 = vst [vmem:[%s4535_s7 + $0xf8] sm:$0xff] %v1163_v10 }
 0x13e   : > { %3330 = vst [vmem:[%s4535_s7 + $0x108] sm:$0xff] %v1206_v11  ;;  %3339 = vst [vmem:[%s4542_s10 + $0xf0] sm:$0xff] %v1270_v12 }
 0x13f   : > { %3341 = vst [vmem:[%s4542_s10 + $0x100] sm:$0xff] %v1272_v13  ;;  %3340 = vst [vmem:[%s4542_s10 + $0xf8] sm:$0xff] %v1271_v14 }
 0x140   : > { %3342 = vst [vmem:[%s4542_s10 + $0x108] sm:$0xff] %v1273_v15 }
 0x149   : > { %v1242_v39 = vpop.f32.mrb[16].mxu0 }
 0x14a   : > { %v1504_v16 = vpop.f32.mrb[16].mxu1  ;;  %v1243_v17 = vadd.f32 %v1242_v39, %v4519_v28  ;;  %v1244_v29 = vpop.f32.mrb[17].mxu0 }
 0x14b   : > { %v1505_v18 = vadd.f32 %v1504_v16, %v4519_v28  ;;  %v1506_v19 = vpop.f32.mrb[17].mxu1  ;;  %v1245_v20 = vadd.f32 %v1244_v29, %v4519_v28  ;;  %v1246_v22 = vpop.f32.mrb[18].mxu0 }
 0x14c   : > { %v1507_v21 = vadd.f32 %v1506_v19, %v4519_v28  ;;  %v1508_v23 = vpop.f32.mrb[18].mxu1  ;;  %3325 = vst [vmem:[%s4535_s7 + $0xe0] sm:$0xff] %v1243_v17  ;;  %v1268_v24 = vmax.f32 %v1243_v17, 0.0  ;;  %v1247_v26 = vadd.f32 %v1246_v22, %v4530_v40  ;;  %v1248_v30 = vpop.f32.mrb[19].mxu0 }
 0x14d   : > { %3408 = vst [vmem:[%s4535_s7 + $0x120] sm:$0xff] %v1505_v18  ;;  %v1612_v25 = vmax.f32 %v1505_v18, 0.0  ;;  %v1509_v27 = vadd.f32 %v1508_v23, %v4530_v40  ;;  %v1510_v31 = vpop.f32.mrb[19].mxu1  ;;  %3326 = vst.msk [vmem:[%s4535_s7 + $0xe8] sm:$0xff] %vm561_vm2, %v1245_v20  ;;  %v1269_v32 = vmax.f32 %v1245_v20, 0.0  ;;  %v1249_v34 = vadd.f32 %v1248_v30, %v4530_v40 }
 0x14e   : > { %3409 = vst [vmem:[%s4535_s7 + $0x128] sm:$0xff] %v1507_v21  ;;  %v1613_v33 = vmax.f32 %v1507_v21, 0.0  ;;  %v1511_v35 = vadd.f32 %v1510_v31, %v4530_v40  ;;  %3337 = vst [vmem:[%s4542_s10 + $0xe0] sm:$0xff] %v1268_v24  ;;  %v1274_v36 = vmax.f32 %v1247_v26, 0.0 }
 0x14f   : > { %3420 = vst [vmem:[%s4542_s10 + $0x120] sm:$0xff] %v1612_v25  ;;  %3331 = vst [vmem:[%s4535_s7 + $0x110] sm:$0xff] %v1247_v26  ;;  %v1618_v37 = vmax.f32 %v1509_v27, 0.0  ;;  %v1275_v38 = vmax.f32 %v1249_v34, 0.0 }
 0x150   : > { %3414 = vst [vmem:[%s4535_s7 + $0x150] sm:$0xff] %v1509_v27  ;;  %3338 = vst.msk [vmem:[%s4542_s10 + $0xe8] sm:$0xff] %vm561_vm2, %v1269_v32  ;;  %v1619_v0 = vmax.f32 %v1511_v35, 0.0 }
 0x151   : > { %3421 = vst [vmem:[%s4542_s10 + $0x128] sm:$0xff] %v1613_v33  ;;  %3332 = vst.msk [vmem:[%s4535_s7 + $0x118] sm:$0xff] %vm561_vm2, %v1249_v34 }
 0x152   : > { %3415 = vst [vmem:[%s4535_s7 + $0x158] sm:$0xff] %v1511_v35  ;;  %3343 = vst [vmem:[%s4542_s10 + $0x110] sm:$0xff] %v1274_v36 }
 0x153   : > { %3426 = vst [vmem:[%s4542_s10 + $0x150] sm:$0xff] %v1618_v37  ;;  %3344 = vst.msk [vmem:[%s4542_s10 + $0x118] sm:$0xff] %vm561_vm2, %v1275_v38 }
 0x154   : > { %3427 = vst [vmem:[%s4542_s10 + $0x158] sm:$0xff] %v1619_v0 }
 0x15d   : > { %v1547_v41 = vpop.f32.mrb[20].mxu0 }
 0x15e   : > { %v1590_v42 = vpop.f32.mrb[20].mxu1  ;;  %v1548_v43 = vadd.f32 %v1547_v41, %v4519_v28  ;;  %v1549_v45 = vpop.f32.mrb[21].mxu0 }
 0x15f   : > { %v1591_v44 = vadd.f32 %v1590_v42, %v4519_v28  ;;  %v1592_v46 = vpop.f32.mrb[21].mxu1  ;;  %v1550_v47 = vadd.f32 %v1549_v45, %v4519_v28  ;;  %v1551_v49 = vpop.f32.mrb[22].mxu0 }
 0x160   : > { %v1593_v48 = vadd.f32 %v1592_v46, %v4519_v28  ;;  %v1594_v50 = vpop.f32.mrb[22].mxu1  ;;  %3410 = vst [vmem:[%s4535_s7 + $0x130] sm:$0xff] %v1548_v43  ;;  %v1614_v51 = vmax.f32 %v1548_v43, 0.0  ;;  %v1552_v53 = vadd.f32 %v1551_v49, %v4530_v40  ;;  %v1553_v55 = vpop.f32.mrb[23].mxu0 }
 0x161   : > { %3412 = vst [vmem:[%s4535_s7 + $0x140] sm:$0xff] %v1591_v44  ;;  %v1616_v52 = vmax.f32 %v1591_v44, 0.0  ;;  %v1595_v54 = vadd.f32 %v1594_v50, %v4530_v40  ;;  %v1596_v56 = vpop.f32.mrb[23].mxu1  ;;  %3411 = vst [vmem:[%s4535_s7 + $0x138] sm:$0xff] %v1550_v47  ;;  %v1615_v57 = vmax.f32 %v1550_v47, 0.0  ;;  %v1554_v59 = vadd.f32 %v1553_v55, %v4530_v40 }
 0x162   : > { %3413 = vst.msk [vmem:[%s4535_s7 + $0x148] sm:$0xff] %vm561_vm2, %v1593_v48  ;;  %v1617_v58 = vmax.f32 %v1593_v48, 0.0  ;;  %v1597_v60 = vadd.f32 %v1596_v56, %v4530_v40  ;;  %3422 = vst [vmem:[%s4542_s10 + $0x130] sm:$0xff] %v1614_v51  ;;  %v1620_v61 = vmax.f32 %v1552_v53, 0.0 }
 0x163   : > { %3424 = vst [vmem:[%s4542_s10 + $0x140] sm:$0xff] %v1616_v52  ;;  %3416 = vst [vmem:[%s4535_s7 + $0x160] sm:$0xff] %v1552_v53  ;;  %v1622_v62 = vmax.f32 %v1595_v54, 0.0  ;;  %v1621_v63 = vmax.f32 %v1554_v59, 0.0 }
 0x164   : > { %3418 = vst [vmem:[%s4535_s7 + $0x170] sm:$0xff] %v1595_v54  ;;  %3423 = vst [vmem:[%s4542_s10 + $0x138] sm:$0xff] %v1615_v57  ;;  %v1623_v1 = vmax.f32 %v1597_v60, 0.0 }
 0x165   : > { %3425 = vst.msk [vmem:[%s4542_s10 + $0x148] sm:$0xff] %vm561_vm2, %v1617_v58  ;;  %3417 = vst [vmem:[%s4535_s7 + $0x168] sm:$0xff] %v1554_v59 }
 0x166   : > { %3419 = vst.msk [vmem:[%s4535_s7 + $0x178] sm:$0xff] %vm561_vm2, %v1597_v60  ;;  %3428 = vst [vmem:[%s4542_s10 + $0x160] sm:$0xff] %v1620_v61 }
 0x167   : > { %3430 = vst [vmem:[%s4542_s10 + $0x170] sm:$0xff] %v1622_v62  ;;  %3429 = vst [vmem:[%s4542_s10 + $0x168] sm:$0xff] %v1621_v63 }
 0x168   : > { %3431 = vst.msk [vmem:[%s4542_s10 + $0x178] sm:$0xff] %vm561_vm2, %v1623_v1 }
 0x171   : > { %v1852_v2 = vpop.f32.mrb[24].mxu0 }
 0x172   : > { %v1895_v3 = vpop.f32.mrb[24].mxu1  ;;  %v1853_v4 = vadd.f32 %v1852_v2, %v4519_v28  ;;  %v1854_v6 = vpop.f32.mrb[25].mxu0 }
 0x173   : > { %v1896_v5 = vadd.f32 %v1895_v3, %v4519_v28  ;;  %v1897_v7 = vpop.f32.mrb[25].mxu1  ;;  %v1855_v8 = vadd.f32 %v1854_v6, %v4519_v28  ;;  %v1856_v10 = vpop.f32.mrb[26].mxu0 }
 0x174   : > { %v1898_v9 = vadd.f32 %v1897_v7, %v4519_v28  ;;  %v1899_v11 = vpop.f32.mrb[26].mxu1  ;;  %3495 = vst [vmem:[%s4535_s7 + $0x180] sm:$0xff] %v1853_v4  ;;  %v1960_v12 = vmax.f32 %v1853_v4, 0.0  ;;  %v1857_v14 = vadd.f32 %v1856_v10, %v4530_v40  ;;  %v1858_v39 = vpop.f32.mrb[27].mxu0 }
 0x175   : > { %3497 = vst [vmem:[%s4535_s7 + $0x190] sm:$0xff] %v1896_v5  ;;  %v1962_v13 = vmax.f32 %v1896_v5, 0.0  ;;  %v1900_v15 = vadd.f32 %v1899_v11, %v4530_v40  ;;  %v1901_v16 = vpop.f32.mrb[27].mxu1  ;;  %3496 = vst [vmem:[%s4535_s7 + $0x188] sm:$0xff] %v1855_v8  ;;  %v1961_v17 = vmax.f32 %v1855_v8, 0.0  ;;  %v1859_v29 = vadd.f32 %v1858_v39, %v4530_v40 }
 0x176   : > { %3498 = vst [vmem:[%s4535_s7 + $0x198] sm:$0xff] %v1898_v9  ;;  %v1963_v18 = vmax.f32 %v1898_v9, 0.0  ;;  %v1902_v19 = vadd.f32 %v1901_v16, %v4530_v40  ;;  %3507 = vst [vmem:[%s4542_s10 + $0x180] sm:$0xff] %v1960_v12  ;;  %v1966_v20 = vmax.f32 %v1857_v14, 0.0 }
 0x177   : > { %3509 = vst [vmem:[%s4542_s10 + $0x190] sm:$0xff] %v1962_v13  ;;  %3501 = vst [vmem:[%s4535_s7 + $0x1b0] sm:$0xff] %v1857_v14  ;;  %v1968_v21 = vmax.f32 %v1900_v15, 0.0  ;;  %v1967_v22 = vmax.f32 %v1859_v29, 0.0 }
 0x178   : > { %3503 = vst [vmem:[%s4535_s7 + $0x1c0] sm:$0xff] %v1900_v15  ;;  %3508 = vst [vmem:[%s4542_s10 + $0x188] sm:$0xff] %v1961_v17  ;;  %v1969_v23 = vmax.f32 %v1902_v19, 0.0 }
 0x179   : > { %3510 = vst [vmem:[%s4542_s10 + $0x198] sm:$0xff] %v1963_v18  ;;  %3502 = vst [vmem:[%s4535_s7 + $0x1b8] sm:$0xff] %v1859_v29 }
 0x17a   : > { %3504 = vst [vmem:[%s4535_s7 + $0x1c8] sm:$0xff] %v1902_v19  ;;  %3513 = vst [vmem:[%s4542_s10 + $0x1b0] sm:$0xff] %v1966_v20 }
 0x17b   : > { %3515 = vst [vmem:[%s4542_s10 + $0x1c0] sm:$0xff] %v1968_v21  ;;  %3514 = vst [vmem:[%s4542_s10 + $0x1b8] sm:$0xff] %v1967_v22 }
 0x17c   : > { %3516 = vst [vmem:[%s4542_s10 + $0x1c8] sm:$0xff] %v1969_v23 }
 0x185   : > { %v1938_v24 = vpop.f32.mrb[28].mxu0 }
 0x186   : > { %v2200_v25 = vpop.f32.mrb[28].mxu1  ;;  %v1939_v26 = vadd.f32 %v1938_v24, %v4519_v28  ;;  %v1940_v30 = vpop.f32.mrb[29].mxu0 }
 0x187   : > { %v2201_v27 = vadd.f32 %v2200_v25, %v4519_v28  ;;  %v2202_v31 = vpop.f32.mrb[29].mxu1  ;;  %v1941_v32 = vadd.f32 %v1940_v30, %v4519_v28  ;;  %v1942_v34 = vpop.f32.mrb[30].mxu0 }
 0x188   : > { %v2203_v33 = vadd.f32 %v2202_v31, %v4519_v28  ;;  %v2204_v35 = vpop.f32.mrb[30].mxu1  ;;  %3499 = vst [vmem:[%s4535_s7 + $0x1a0] sm:$0xff] %v1939_v26  ;;  %v1964_v36 = vmax.f32 %v1939_v26, 0.0  ;;  %v1943_v38 = vadd.f32 %v1942_v34, %v4530_v40  ;;  %v1944_v41 = vpop.f32.mrb[31].mxu0 }
 0x189   : > { %3582 = vst [vmem:[%s4535_s7 + $0x1e0] sm:$0xff] %v2201_v27  ;;  %v2308_v37 = vmax.f32 %v2201_v27, 0.0  ;;  %v2205_v0 = vadd.f32 %v2204_v35, %v4530_v40  ;;  %v2206_v42 = vpop.f32.mrb[31].mxu1  ;;  %3500 = vst.msk [vmem:[%s4535_s7 + $0x1a8] sm:$0xff] %vm561_vm2, %v1941_v32  ;;  %v1965_v43 = vmax.f32 %v1941_v32, 0.0  ;;  %v1945_v45 = vadd.f32 %v1944_v41, %v4530_v40 }
 0x18a   : > { %3583 = vst [vmem:[%s4535_s7 + $0x1e8] sm:$0xff] %v2203_v33  ;;  %v2309_v44 = vmax.f32 %v2203_v33, 0.0  ;;  %v2207_v46 = vadd.f32 %v2206_v42, %v4530_v40  ;;  %3511 = vst [vmem:[%s4542_s10 + $0x1a0] sm:$0xff] %v1964_v36  ;;  %v1970_v47 = vmax.f32 %v1943_v38, 0.0 }
 0x18b   : > { %3594 = vst [vmem:[%s4542_s10 + $0x1e0] sm:$0xff] %v2308_v37  ;;  %3505 = vst [vmem:[%s4535_s7 + $0x1d0] sm:$0xff] %v1943_v38  ;;  %v2314_v48 = vmax.f32 %v2205_v0, 0.0  ;;  %v1971_v49 = vmax.f32 %v1945_v45, 0.0 }
 0x18c   : > { %3588 = vst [vmem:[%s4535_s7 + $0x210] sm:$0xff] %v2205_v0  ;;  %3512 = vst.msk [vmem:[%s4542_s10 + $0x1a8] sm:$0xff] %vm561_vm2, %v1965_v43  ;;  %v2315_v50 = vmax.f32 %v2207_v46, 0.0 }
 0x18d   : > { %3595 = vst [vmem:[%s4542_s10 + $0x1e8] sm:$0xff] %v2309_v44  ;;  %3506 = vst.msk [vmem:[%s4535_s7 + $0x1d8] sm:$0xff] %vm561_vm2, %v1945_v45 }
 0x18e   : > { %3589 = vst [vmem:[%s4535_s7 + $0x218] sm:$0xff] %v2207_v46  ;;  %3517 = vst [vmem:[%s4542_s10 + $0x1d0] sm:$0xff] %v1970_v47 }
 0x18f   : > { %3600 = vst [vmem:[%s4542_s10 + $0x210] sm:$0xff] %v2314_v48  ;;  %3518 = vst.msk [vmem:[%s4542_s10 + $0x1d8] sm:$0xff] %vm561_vm2, %v1971_v49 }
 0x190   : > { %3601 = vst [vmem:[%s4542_s10 + $0x218] sm:$0xff] %v2315_v50 }
 0x199   : > { %v2243_v51 = vpop.f32.mrb[32].mxu0 }
 0x19a   : > { %v2286_v52 = vpop.f32.mrb[32].mxu1  ;;  %v2244_v53 = vadd.f32 %v2243_v51, %v4519_v28  ;;  %v2245_v55 = vpop.f32.mrb[33].mxu0 }
 0x19b   : > { %v2287_v54 = vadd.f32 %v2286_v52, %v4519_v28  ;;  %v2288_v56 = vpop.f32.mrb[33].mxu1  ;;  %v2246_v57 = vadd.f32 %v2245_v55, %v4519_v28  ;;  %v2247_v59 = vpop.f32.mrb[34].mxu0 }
 0x19c   : > { %v2289_v58 = vadd.f32 %v2288_v56, %v4519_v28  ;;  %v2290_v60 = vpop.f32.mrb[34].mxu1  ;;  %3584 = vst [vmem:[%s4535_s7 + $0x1f0] sm:$0xff] %v2244_v53  ;;  %v2310_v61 = vmax.f32 %v2244_v53, 0.0  ;;  %v2248_v63 = vadd.f32 %v2247_v59, %v4530_v40  ;;  %v2249_v2 = vpop.f32.mrb[35].mxu0 }
 0x19d   : > { %3586 = vst [vmem:[%s4535_s7 + $0x200] sm:$0xff] %v2287_v54  ;;  %v2312_v62 = vmax.f32 %v2287_v54, 0.0  ;;  %v2291_v1 = vadd.f32 %v2290_v60, %v4530_v40  ;;  %v2292_v3 = vpop.f32.mrb[35].mxu1  ;;  %3585 = vst [vmem:[%s4535_s7 + $0x1f8] sm:$0xff] %v2246_v57  ;;  %v2311_v4 = vmax.f32 %v2246_v57, 0.0  ;;  %v2250_v6 = vadd.f32 %v2249_v2, %v4530_v40 }
 0x19e   : > { %3587 = vst.msk [vmem:[%s4535_s7 + $0x208] sm:$0xff] %vm561_vm2, %v2289_v58  ;;  %v2313_v5 = vmax.f32 %v2289_v58, 0.0  ;;  %v2293_v7 = vadd.f32 %v2292_v3, %v4530_v40  ;;  %3596 = vst [vmem:[%s4542_s10 + $0x1f0] sm:$0xff] %v2310_v61  ;;  %v2316_v8 = vmax.f32 %v2248_v63, 0.0 }
 0x19f   : > { %3598 = vst [vmem:[%s4542_s10 + $0x200] sm:$0xff] %v2312_v62  ;;  %3590 = vst [vmem:[%s4535_s7 + $0x220] sm:$0xff] %v2248_v63  ;;  %v2318_v9 = vmax.f32 %v2291_v1, 0.0  ;;  %v2317_v10 = vmax.f32 %v2250_v6, 0.0 }
 0x1a0   : > { %3592 = vst [vmem:[%s4535_s7 + $0x230] sm:$0xff] %v2291_v1  ;;  %3597 = vst [vmem:[%s4542_s10 + $0x1f8] sm:$0xff] %v2311_v4  ;;  %v2319_v11 = vmax.f32 %v2293_v7, 0.0 }
 0x1a1   : > { %3599 = vst.msk [vmem:[%s4542_s10 + $0x208] sm:$0xff] %vm561_vm2, %v2313_v5  ;;  %3591 = vst [vmem:[%s4535_s7 + $0x228] sm:$0xff] %v2250_v6 }
 0x1a2   : > { %3593 = vst.msk [vmem:[%s4535_s7 + $0x238] sm:$0xff] %vm561_vm2, %v2293_v7  ;;  %3602 = vst [vmem:[%s4542_s10 + $0x220] sm:$0xff] %v2316_v8 }
 0x1a3   : > { %3604 = vst [vmem:[%s4542_s10 + $0x230] sm:$0xff] %v2318_v9  ;;  %3603 = vst [vmem:[%s4542_s10 + $0x228] sm:$0xff] %v2317_v10 }
 0x1a4   : > { %3605 = vst.msk [vmem:[%s4542_s10 + $0x238] sm:$0xff] %vm561_vm2, %v2319_v11 }
 0x1ad   : > { %v2548_v12 = vpop.f32.mrb[36].mxu0 }
 0x1ae   : > { %v2591_v13 = vpop.f32.mrb[36].mxu1  ;;  %v2549_v14 = vadd.f32 %v2548_v12, %v4519_v28  ;;  %v2550_v39 = vpop.f32.mrb[37].mxu0 }
 0x1af   : > { %v2592_v15 = vadd.f32 %v2591_v13, %v4519_v28  ;;  %v2593_v16 = vpop.f32.mrb[37].mxu1  ;;  %v2551_v17 = vadd.f32 %v2550_v39, %v4519_v28  ;;  %v2552_v29 = vpop.f32.mrb[38].mxu0 }
 0x1b0   : > { %v2594_v18 = vadd.f32 %v2593_v16, %v4519_v28  ;;  %v2595_v19 = vpop.f32.mrb[38].mxu1  ;;  %3669 = vst [vmem:[%s4535_s7 + $0x240] sm:$0xff] %v2549_v14  ;;  %v2656_v20 = vmax.f32 %v2549_v14, 0.0  ;;  %v2553_v22 = vadd.f32 %v2552_v29, %v4530_v40  ;;  %v2554_v24 = vpop.f32.mrb[39].mxu0 }
 0x1b1   : > { %3671 = vst [vmem:[%s4535_s7 + $0x250] sm:$0xff] %v2592_v15  ;;  %v2658_v21 = vmax.f32 %v2592_v15, 0.0  ;;  %v2596_v23 = vadd.f32 %v2595_v19, %v4530_v40  ;;  %v2597_v25 = vpop.f32.mrb[39].mxu1  ;;  %3670 = vst [vmem:[%s4535_s7 + $0x248] sm:$0xff] %v2551_v17  ;;  %v2657_v26 = vmax.f32 %v2551_v17, 0.0  ;;  %v2555_v30 = vadd.f32 %v2554_v24, %v4530_v40 }
 0x1b2   : > { %3672 = vst [vmem:[%s4535_s7 + $0x258] sm:$0xff] %v2594_v18  ;;  %v2659_v27 = vmax.f32 %v2594_v18, 0.0  ;;  %v2598_v31 = vadd.f32 %v2597_v25, %v4530_v40  ;;  %3681 = vst [vmem:[%s4542_s10 + $0x240] sm:$0xff] %v2656_v20  ;;  %v2662_v32 = vmax.f32 %v2553_v22, 0.0 }
 0x1b3   : > { %3683 = vst [vmem:[%s4542_s10 + $0x250] sm:$0xff] %v2658_v21  ;;  %3675 = vst [vmem:[%s4535_s7 + $0x270] sm:$0xff] %v2553_v22  ;;  %v2664_v33 = vmax.f32 %v2596_v23, 0.0  ;;  %v2663_v34 = vmax.f32 %v2555_v30, 0.0 }
 0x1b4   : > { %3677 = vst [vmem:[%s4535_s7 + $0x280] sm:$0xff] %v2596_v23  ;;  %3682 = vst [vmem:[%s4542_s10 + $0x248] sm:$0xff] %v2657_v26  ;;  %v2665_v35 = vmax.f32 %v2598_v31, 0.0 }
 0x1b5   : > { %3684 = vst [vmem:[%s4542_s10 + $0x258] sm:$0xff] %v2659_v27  ;;  %3676 = vst [vmem:[%s4535_s7 + $0x278] sm:$0xff] %v2555_v30 }
 0x1b6   : > { %3678 = vst [vmem:[%s4535_s7 + $0x288] sm:$0xff] %v2598_v31  ;;  %3687 = vst [vmem:[%s4542_s10 + $0x270] sm:$0xff] %v2662_v32 }
 0x1b7   : > { %3689 = vst [vmem:[%s4542_s10 + $0x280] sm:$0xff] %v2664_v33  ;;  %3688 = vst [vmem:[%s4542_s10 + $0x278] sm:$0xff] %v2663_v34 }
 0x1b8   : > { %3690 = vst [vmem:[%s4542_s10 + $0x288] sm:$0xff] %v2665_v35 }
 0x1c1   : > { %v2634_v36 = vpop.f32.mrb[40].mxu0 }
 0x1c2   : > { %v2896_v37 = vpop.f32.mrb[40].mxu1  ;;  %v2635_v38 = vadd.f32 %v2634_v36, %v4519_v28  ;;  %v2636_v41 = vpop.f32.mrb[41].mxu0 }
 0x1c3   : > { %v2897_v0 = vadd.f32 %v2896_v37, %v4519_v28  ;;  %v2898_v42 = vpop.f32.mrb[41].mxu1  ;;  %v2637_v43 = vadd.f32 %v2636_v41, %v4519_v28  ;;  %v2638_v45 = vpop.f32.mrb[42].mxu0 }
 0x1c4   : > { %v2899_v44 = vadd.f32 %v2898_v42, %v4519_v28  ;;  %v2900_v46 = vpop.f32.mrb[42].mxu1  ;;  %3673 = vst [vmem:[%s4535_s7 + $0x260] sm:$0xff] %v2635_v38  ;;  %v2660_v47 = vmax.f32 %v2635_v38, 0.0  ;;  %v2639_v49 = vadd.f32 %v2638_v45, %v4530_v40  ;;  %v2640_v51 = vpop.f32.mrb[43].mxu0 }
 0x1c5   : > { %3756 = vst [vmem:[%s4535_s7 + $0x2a0] sm:$0xff] %v2897_v0  ;;  %v3004_v48 = vmax.f32 %v2897_v0, 0.0  ;;  %v2901_v50 = vadd.f32 %v2900_v46, %v4530_v40  ;;  %v2902_v52 = vpop.f32.mrb[43].mxu1  ;;  %3674 = vst.msk [vmem:[%s4535_s7 + $0x268] sm:$0xff] %vm561_vm2, %v2637_v43  ;;  %v2661_v53 = vmax.f32 %v2637_v43, 0.0  ;;  %v2641_v55 = vadd.f32 %v2640_v51, %v4530_v40 }
 0x1c6   : > { %3757 = vst [vmem:[%s4535_s7 + $0x2a8] sm:$0xff] %v2899_v44  ;;  %v3005_v54 = vmax.f32 %v2899_v44, 0.0  ;;  %v2903_v56 = vadd.f32 %v2902_v52, %v4530_v40  ;;  %3685 = vst [vmem:[%s4542_s10 + $0x260] sm:$0xff] %v2660_v47  ;;  %v2666_v57 = vmax.f32 %v2639_v49, 0.0 }
 0x1c7   : > { %3768 = vst [vmem:[%s4542_s10 + $0x2a0] sm:$0xff] %v3004_v48  ;;  %3679 = vst [vmem:[%s4535_s7 + $0x290] sm:$0xff] %v2639_v49  ;;  %v3010_v58 = vmax.f32 %v2901_v50, 0.0  ;;  %v2667_v59 = vmax.f32 %v2641_v55, 0.0 }
 0x1c8   : > { %3762 = vst [vmem:[%s4535_s7 + $0x2d0] sm:$0xff] %v2901_v50  ;;  %3686 = vst.msk [vmem:[%s4542_s10 + $0x268] sm:$0xff] %vm561_vm2, %v2661_v53  ;;  %v3011_v60 = vmax.f32 %v2903_v56, 0.0 }
 0x1c9   : > { %3769 = vst [vmem:[%s4542_s10 + $0x2a8] sm:$0xff] %v3005_v54  ;;  %3680 = vst.msk [vmem:[%s4535_s7 + $0x298] sm:$0xff] %vm561_vm2, %v2641_v55 }
 0x1ca   : > { %3763 = vst [vmem:[%s4535_s7 + $0x2d8] sm:$0xff] %v2903_v56  ;;  %3691 = vst [vmem:[%s4542_s10 + $0x290] sm:$0xff] %v2666_v57 }
 0x1cb   : > { %3774 = vst [vmem:[%s4542_s10 + $0x2d0] sm:$0xff] %v3010_v58  ;;  %3692 = vst.msk [vmem:[%s4542_s10 + $0x298] sm:$0xff] %vm561_vm2, %v2667_v59 }
 0x1cc   : > { %3775 = vst [vmem:[%s4542_s10 + $0x2d8] sm:$0xff] %v3011_v60 }
 0x1d5   : > { %v2939_v61 = vpop.f32.mrb[44].mxu0 }
 0x1d6   : > { %v2982_v62 = vpop.f32.mrb[44].mxu1  ;;  %v2940_v63 = vadd.f32 %v2939_v61, %v4519_v28  ;;  %v2941_v2 = vpop.f32.mrb[45].mxu0 }
 0x1d7   : > { %v2983_v1 = vadd.f32 %v2982_v62, %v4519_v28  ;;  %v2984_v3 = vpop.f32.mrb[45].mxu1  ;;  %v2942_v4 = vadd.f32 %v2941_v2, %v4519_v28  ;;  %v2943_v6 = vpop.f32.mrb[46].mxu0 }
 0x1d8   : > { %v2985_v5 = vadd.f32 %v2984_v3, %v4519_v28  ;;  %v2986_v7 = vpop.f32.mrb[46].mxu1  ;;  %3758 = vst [vmem:[%s4535_s7 + $0x2b0] sm:$0xff] %v2940_v63  ;;  %v3006_v8 = vmax.f32 %v2940_v63, 0.0  ;;  %v2944_v10 = vadd.f32 %v2943_v6, %v4530_v40  ;;  %v2945_v12 = vpop.f32.mrb[47].mxu0 }
 0x1d9   : > { %3760 = vst [vmem:[%s4535_s7 + $0x2c0] sm:$0xff] %v2983_v1  ;;  %v3008_v9 = vmax.f32 %v2983_v1, 0.0  ;;  %v2987_v11 = vadd.f32 %v2986_v7, %v4530_v40  ;;  %v2988_v13 = vpop.f32.mrb[47].mxu1  ;;  %3759 = vst [vmem:[%s4535_s7 + $0x2b8] sm:$0xff] %v2942_v4  ;;  %v3007_v28 = vmax.f32 %v2942_v4, 0.0  ;;  %v2946_v15 = vadd.f32 %v2945_v12, %v4530_v40 }
 0x1da   : > { %3761 = vst.msk [vmem:[%s4535_s7 + $0x2c8] sm:$0xff] %vm561_vm2, %v2985_v5  ;;  %v3009_v14 = vmax.f32 %v2985_v5, 0.0  ;;  %v2989_v39 = vadd.f32 %v2988_v13, %v4530_v40  ;;  %3770 = vst [vmem:[%s4542_s10 + $0x2b0] sm:$0xff] %v3006_v8  ;;  %v3012_v16 = vmax.f32 %v2944_v10, 0.0 }
 0x1db   : > { %3772 = vst [vmem:[%s4542_s10 + $0x2c0] sm:$0xff] %v3008_v9  ;;  %3764 = vst [vmem:[%s4535_s7 + $0x2e0] sm:$0xff] %v2944_v10  ;;  %v3014_v17 = vmax.f32 %v2987_v11, 0.0  ;;  %v3013_v18 = vmax.f32 %v2946_v15, 0.0 }
 0x1dc   : > { %3766 = vst [vmem:[%s4535_s7 + $0x2f0] sm:$0xff] %v2987_v11  ;;  %3771 = vst [vmem:[%s4542_s10 + $0x2b8] sm:$0xff] %v3007_v28  ;;  %v3015_v29 = vmax.f32 %v2989_v39, 0.0 }
 0x1dd   : > { %3773 = vst.msk [vmem:[%s4542_s10 + $0x2c8] sm:$0xff] %vm561_vm2, %v3009_v14  ;;  %3765 = vst [vmem:[%s4535_s7 + $0x2e8] sm:$0xff] %v2946_v15 }
 0x1de   : > { %3767 = vst.msk [vmem:[%s4535_s7 + $0x2f8] sm:$0xff] %vm561_vm2, %v2989_v39  ;;  %3776 = vst [vmem:[%s4542_s10 + $0x2e0] sm:$0xff] %v3012_v16 }
 0x1df   : > { %3778 = vst [vmem:[%s4542_s10 + $0x2f0] sm:$0xff] %v3014_v17  ;;  %3777 = vst [vmem:[%s4542_s10 + $0x2e8] sm:$0xff] %v3013_v18 }
 0x1e0   : > { %3779 = vst.msk [vmem:[%s4542_s10 + $0x2f8] sm:$0xff] %vm561_vm2, %v3015_v29 }
 0x1e1 PF: > { %s15_s15 = sadd.s32 1, %s4138_s15  }
 0x1e2   : > { %p12_p4 = scmp.ge.s32.totalorder %s15_s15, 6  }
 0x1e4   :  { %14 = sbr.rel (!%p12_p4) target bundleno = 1 (0x1), region = 95 }

// kernel: model_n_forward.3
= control target key start
LH: loop header
LB: loop body
LE: loop exit
PB: predicated region body
PF: predicated region fallthrough
CT: control target
= control target key end

     0   :  { %s7678_s0 = inlined_call_operand.vmem [shape: f32[32,11664], index: 0, kind: input, shape index: {}]   ;;  %s7679_s1 = inlined_call_operand.vmem [shape: f32[16,11664], index: 1, kind: input, shape index: {}]   ;;  %s7680_s2 = inlined_call_operand.vmem [shape: f32[16,16], index: 2, kind: input, shape index: {}]   ;;  %s7681_s3 = inlined_call_operand.vmem [shape: f32[1,16], index: 3, kind: input, shape index: {}]   ;;  %s7682_s4 = inlined_call_operand.vmem [shape: f32[2,16], index: 4, kind: input, shape index: {}]   ;;  %s7683_s5 = inlined_call_operand.vmem [shape: f32[1,2], index: 5, kind: input, shape index: {}]   ;;  %s7684_s6 = inlined_call_operand.hbm [shape: f32[32,16], index: 6, kind: output, shape index: {0}]   ;;  %s7685_s7 = inlined_call_operand.vmem [shape: f32[32,2], index: 7, kind: output, shape index: {1}]  }
   0x1   :  { %v395_v0 = vld [vmem:[%s7679_s1 + $0x8] sm:$0xff]  ;;  %v394_v5 = vld [vmem:[%s7679_s1] sm:$0xff]  ;;  %v441_v14 = vld [vmem:[%s7679_s1 + $0x178] sm:$0xff] }
   0x2   :  { %v487_v1 = vld [vmem:[%s7679_s1 + $0x2e8] sm:$0xff]  ;;  %v486_v6 = vld [vmem:[%s7679_s1 + $0x2e0] sm:$0xff]  ;;  %v533_v15 = vld [vmem:[%s7679_s1 + $0x458] sm:$0xff] }
   0x3   :  { %v439_v2 = vld [vmem:[%s7679_s1 + $0x168] sm:$0xff]  ;;  %v5231_v3 = vpack.c.bf16 %v487_v1, %v395_v0  ;;  %v5233_v8 = vpack.c.bf16 %v486_v6, %v394_v5  ;;  %v438_v9 = vld [vmem:[%s7679_s1 + $0x160] sm:$0xff]  ;;  %v5323_v16 = vpack.c.bf16 %v533_v15, %v441_v14  ;;  %v440_v17 = vld [vmem:[%s7679_s1 + $0x170] sm:$0xff] }
   0x4   :  { %v531_v4 = vld [vmem:[%s7679_s1 + $0x448] sm:$0xff]  ;;  %v530_v10 = vld [vmem:[%s7679_s1 + $0x440] sm:$0xff]  ;;  %v532_v18 = vld [vmem:[%s7679_s1 + $0x450] sm:$0xff] }
   0x5   :  { %v5319_v7 = vpack.c.bf16 %v531_v4, %v439_v2  ;;  %v27_v11 = vld [vmem:[%s7678_s0 + $0x8] sm:$0xff]  ;;  %5232 = vmatprep.subr.bf16.mxu1 %v5231_v3  ;;  %v5321_v12 = vpack.c.bf16 %v530_v10, %v438_v9  ;;  %v397_v19 = vld [vmem:[%s7679_s1 + $0x18] sm:$0xff]  ;;  %v26_v20 = vld [vmem:[%s7678_s0] sm:$0xff]  ;;  %v5325_v24 = vpack.c.bf16 %v532_v18, %v440_v17 }
   0x6   :  { %668 = vmatprep.mubr.f32.mxu1 %v27_v11  ;;  %v71_v13 = vld [vmem:[%s7678_s0 + $0x168] sm:$0xff]  ;;  %5234 = vmatpush1.bf16.xpose.msra.mxu1 %v5233_v8  ;;  %v489_v21 = vld [vmem:[%s7679_s1 + $0x2f8] sm:$0xff]  ;;  %v396_v22 = vld [vmem:[%s7679_s1 + $0x10] sm:$0xff] }
   0x7   :  { %5320 = vmatprep.subr.bf16.mxu0 %v5319_v7  ;;  %2538 = vmatprep.mubr.f32.mxu0 %v71_v13  ;;  %v70_v23 = vld [vmem:[%s7678_s0 + $0x160] sm:$0xff]  ;;  %v119_v25 = vld [vmem:[%s7678_s0 + $0x2e8] sm:$0xff]  ;;  %v5235_v26 = vpack.c.bf16 %v489_v21, %v397_v19  ;;  %v488_v27 = vld [vmem:[%s7679_s1 + $0x2f0] sm:$0xff] }
   0x8   :  { %5322 = vmatpush1.bf16.xpose.msra.mxu0 %v5321_v12  ;;  %v163_v28 = vld [vmem:[%s7678_s0 + $0x448] sm:$0xff]  ;;  %v5237_v29 = vpack.c.bf16 %v488_v27, %v396_v22  ;;  %v118_v30 = vld [vmem:[%s7678_s0 + $0x2e0] sm:$0xff]  ;;  %v29_v46 = vld [vmem:[%s7678_s0 + $0x18] sm:$0xff] }
   0x9   :  { %5324 = vmatprep.subr.bf16.mxu0 %v5323_v16  ;;  %5236 = vmatprep.subr.bf16.mxu1 %v5235_v26  ;;  %v443_v31 = vld [vmem:[%s7679_s1 + $0x188] sm:$0xff]  ;;  %v162_v33 = vld [vmem:[%s7678_s0 + $0x440] sm:$0xff]  ;;  %v73_v47 = vld [vmem:[%s7678_s0 + $0x178] sm:$0xff] }
   0xa   :  { %v535_v32 = vld [vmem:[%s7679_s1 + $0x468] sm:$0xff]  ;;  %v210_v38 = vld [vmem:[%s7678_s0 + $0x5c0] sm:$0xff]  ;;  %v445_v52 = vld [vmem:[%s7679_s1 + $0x198] sm:$0xff] }
   0xb   :  { %v211_v34 = vld [vmem:[%s7678_s0 + $0x5c8] sm:$0xff]  ;;  %v5327_v35 = vpack.c.bf16 %v535_v32, %v443_v31  ;;  %v254_v40 = vld [vmem:[%s7678_s0 + $0x720] sm:$0xff]  ;;  %v537_v53 = vld [vmem:[%s7679_s1 + $0x478] sm:$0xff] }
   0xc   :  { %v255_v36 = vld [vmem:[%s7678_s0 + $0x728] sm:$0xff]  ;;  %v302_v44 = vld [vmem:[%s7678_s0 + $0x8a0] sm:$0xff]  ;;  %v28_v54 = vld [vmem:[%s7678_s0 + $0x10] sm:$0xff]  ;;  %v5331_v62 = vpack.c.bf16 %v537_v53, %v445_v52 }
   0xd   :  { %669 = vmatmul.mubr.f32.vlgmr.msra.gmra.mrb[0].mxu1 %v26_v20  ;;  %v399_v37 = vld [vmem:[%s7679_s1 + $0x28] sm:$0xff]  ;;  %v346_v45 = vld [vmem:[%s7678_s0 + $0xa00] sm:$0xff]  ;;  %v401_v55 = vld [vmem:[%s7679_s1 + $0x38] sm:$0xff] }
   0xe   :  { %673 = vmatprep.mubr.f32.mxu1 %v119_v25  ;;  %5238 = vmatpush1.bf16.xpose.msra.mxu1 %v5237_v29  ;;  %v491_v39 = vld [vmem:[%s7679_s1 + $0x308] sm:$0xff]  ;;  %v442_v48 = vld [vmem:[%s7679_s1 + $0x180] sm:$0xff]  ;;  %v493_v56 = vld [vmem:[%s7679_s1 + $0x318] sm:$0xff] }
   0xf   :  { %2539 = vmatmul.mubr.f32.vlgmr.msra.gmra.mrb[0].mxu0 %v70_v23  ;;  %v303_v41 = vld [vmem:[%s7678_s0 + $0x8a8] sm:$0xff]  ;;  %v5239_v42 = vpack.c.bf16 %v491_v39, %v399_v37  ;;  %v534_v49 = vld [vmem:[%s7679_s1 + $0x460] sm:$0xff]  ;;  %v72_v57 = vld [vmem:[%s7678_s0 + $0x170] sm:$0xff]  ;;  %v5243_v63 = vpack.c.bf16 %v493_v56, %v401_v55 }
  0x10   :  { %5326 = vmatpush1.bf16.xpose.msra.mxu0 %v5325_v24  ;;  %2543 = vmatprep.mubr.f32.mxu0 %v163_v28  ;;  %v347_v43 = vld [vmem:[%s7678_s0 + $0xa08] sm:$0xff]  ;;  %v398_v50 = vld [vmem:[%s7679_s1 + $0x20] sm:$0xff]  ;;  %v5329_v58 = vpack.c.bf16 %v534_v49, %v442_v48  ;;  %v121_v59 = vld [vmem:[%s7678_s0 + $0x2f8] sm:$0xff] }
  0x11   :  { %674 = vmatmul.mubr.f32.gmra.mrb[2].mxu1 %v118_v30  ;;  %5328 = vmatprep.subr.bf16.mxu0 %v5327_v35  ;;  %v490_v51 = vld [vmem:[%s7679_s1 + $0x300] sm:$0xff]  ;;  %v165_v60 = vld [vmem:[%s7678_s0 + $0x458] sm:$0xff]  ;;  %v120_v0 = vld [vmem:[%s7678_s0 + $0x2f0] sm:$0xff] }
  0x12   :  { %678 = vmatprep.mubr.f32.mxu1 %v211_v34  ;;  %5240 = vmatprep.subr.bf16.mxu1 %v5239_v42  ;;  %v5241_v61 = vpack.c.bf16 %v490_v51, %v398_v50  ;;  %v164_v1 = vld [vmem:[%s7678_s0 + $0x450] sm:$0xff]  ;;  %v213_v2 = vld [vmem:[%s7678_s0 + $0x5d8] sm:$0xff]  ;;  %v31_v10 = vld [vmem:[%s7678_s0 + $0x28] sm:$0xff] }
  0x13   :  { %2544 = vmatmul.mubr.f32.gmra.mrb[2].mxu0 %v162_v33  ;;  %v257_v3 = vld [vmem:[%s7678_s0 + $0x738] sm:$0xff]  ;;  %v212_v4 = vld [vmem:[%s7678_s0 + $0x5d0] sm:$0xff]  ;;  %v75_v11 = vld [vmem:[%s7678_s0 + $0x188] sm:$0xff] }
  0x14   :  { %2548 = vmatprep.mubr.f32.mxu0 %v255_v36  ;;  %v256_v5 = vld [vmem:[%s7678_s0 + $0x730] sm:$0xff]  ;;  %v305_v6 = vld [vmem:[%s7678_s0 + $0x8b8] sm:$0xff]  ;;  %v447_v16 = vld [vmem:[%s7679_s1 + $0x1a8] sm:$0xff] }
  0x15   :  { %679 = vmatmul.mubr.f32.gmra.mrb[4].mxu1 %v210_v38  ;;  %v349_v7 = vld [vmem:[%s7678_s0 + $0xa18] sm:$0xff]  ;;  %v304_v8 = vld [vmem:[%s7678_s0 + $0x8b0] sm:$0xff]  ;;  %v539_v17 = vld [vmem:[%s7679_s1 + $0x488] sm:$0xff] }
  0x16   :  { %683 = vmatprep.mubr.f32.mxu1 %v303_v41  ;;  %v348_v9 = vld [vmem:[%s7678_s0 + $0xa10] sm:$0xff]  ;;  %v30_v18 = vld [vmem:[%s7678_s0 + $0x20] sm:$0xff]  ;;  %v403_v19 = vld [vmem:[%s7679_s1 + $0x48] sm:$0xff]  ;;  %v5335_v26 = vpack.c.bf16 %v539_v17, %v447_v16 }
  0x17   :  { %2549 = vmatmul.mubr.f32.gmra.mrb[4].mxu0 %v254_v40  ;;  %v444_v12 = vld [vmem:[%s7679_s1 + $0x190] sm:$0xff]  ;;  %v495_v20 = vld [vmem:[%s7679_s1 + $0x328] sm:$0xff]  ;;  %v74_v21 = vld [vmem:[%s7678_s0 + $0x180] sm:$0xff] }
  0x18   :  { %2553 = vmatprep.mubr.f32.mxu0 %v347_v43  ;;  %v536_v13 = vld [vmem:[%s7679_s1 + $0x470] sm:$0xff]  ;;  %v123_v23 = vld [vmem:[%s7678_s0 + $0x308] sm:$0xff]  ;;  %v5247_v27 = vpack.c.bf16 %v495_v20, %v403_v19  ;;  %v122_v28 = vld [vmem:[%s7678_s0 + $0x300] sm:$0xff] }
  0x19   :  { %684 = vmatmul.mubr.f32.gmra.mrb[6].mxu1 %v302_v44  ;;  %v400_v14 = vld [vmem:[%s7679_s1 + $0x30] sm:$0xff]  ;;  %v5333_v22 = vpack.c.bf16 %v536_v13, %v444_v12  ;;  %v167_v24 = vld [vmem:[%s7678_s0 + $0x468] sm:$0xff]  ;;  %v166_v29 = vld [vmem:[%s7678_s0 + $0x460] sm:$0xff] }
  0x1a   :  { %753 = vmatprep.mubr.f32.mxu1 %v29_v46  ;;  %v492_v15 = vld [vmem:[%s7679_s1 + $0x310] sm:$0xff]  ;;  %v215_v30 = vld [vmem:[%s7678_s0 + $0x5e8] sm:$0xff]  ;;  %v214_v32 = vld [vmem:[%s7678_s0 + $0x5e0] sm:$0xff] }
  0x1b   :  { %2554 = vmatmul.mubr.f32.gmra.mrb[6].mxu0 %v346_v45  ;;  %v5245_v25 = vpack.c.bf16 %v492_v15, %v400_v14  ;;  %v259_v31 = vld [vmem:[%s7678_s0 + $0x748] sm:$0xff]  ;;  %v258_v33 = vld [vmem:[%s7678_s0 + $0x740] sm:$0xff]  ;;  %v33_v38 = vld [vmem:[%s7678_s0 + $0x38] sm:$0xff] }
  0x1c   :  { %2623 = vmatprep.mubr.f32.mxu0 %v73_v47  ;;  %v307_v34 = vld [vmem:[%s7678_s0 + $0x8c8] sm:$0xff]  ;;  %v306_v36 = vld [vmem:[%s7678_s0 + $0x8c0] sm:$0xff]  ;;  %v77_v39 = vld [vmem:[%s7678_s0 + $0x198] sm:$0xff] }
  0x1d   :  { %754 = vmatmul.mubr.f32.vlgmr.msra.gmra.mrb[0].mxu1 %v28_v54  ;;  %v351_v35 = vld [vmem:[%s7678_s0 + $0xa28] sm:$0xff]  ;;  %v350_v37 = vld [vmem:[%s7678_s0 + $0xa20] sm:$0xff]  ;;  %v449_v44 = vld [vmem:[%s7679_s1 + $0x1b8] sm:$0xff] }
  0x1e   :  { %758 = vmatprep.mubr.f32.mxu1 %v121_v59  ;;  %5242 = vmatpush1.bf16.xpose.msra.mxu1 %v5241_v61  ;;  %v446_v40 = vld [vmem:[%s7679_s1 + $0x1a0] sm:$0xff]  ;;  %v541_v45 = vld [vmem:[%s7679_s1 + $0x498] sm:$0xff]  ;;  %v32_v46 = vld [vmem:[%s7678_s0 + $0x30] sm:$0xff] }
  0x1f   :  { %2624 = vmatmul.mubr.f32.vlgmr.msra.gmra.mrb[0].mxu0 %v72_v57  ;;  %5244 = vmatprep.subr.bf16.mxu1 %v5243_v63  ;;  %v538_v41 = vld [vmem:[%s7679_s1 + $0x480] sm:$0xff]  ;;  %v405_v47 = vld [vmem:[%s7679_s1 + $0x58] sm:$0xff]  ;;  %v76_v49 = vld [vmem:[%s7678_s0 + $0x190] sm:$0xff]  ;;  %v5339_v54 = vpack.c.bf16 %v541_v45, %v449_v44 }
  0x20   :  { %5330 = vmatpush1.bf16.xpose.msra.mxu0 %v5329_v58  ;;  %2628 = vmatprep.mubr.f32.mxu0 %v165_v60  ;;  %v402_v42 = vld [vmem:[%s7679_s1 + $0x40] sm:$0xff]  ;;  %v497_v48 = vld [vmem:[%s7679_s1 + $0x338] sm:$0xff]  ;;  %v5337_v50 = vpack.c.bf16 %v538_v41, %v446_v40  ;;  %v124_v56 = vld [vmem:[%s7678_s0 + $0x310] sm:$0xff] }
  0x21   :  { %5332 = vmatprep.subr.bf16.mxu0 %v5331_v62  ;;  %759 = vmatmul.mubr.f32.gmra.mrb[2].mxu1 %v120_v0  ;;  %v494_v43 = vld [vmem:[%s7679_s1 + $0x320] sm:$0xff]  ;;  %v125_v51 = vld [vmem:[%s7678_s0 + $0x318] sm:$0xff]  ;;  %v5251_v55 = vpack.c.bf16 %v497_v48, %v405_v47  ;;  %v168_v57 = vld [vmem:[%s7678_s0 + $0x470] sm:$0xff] }
  0x22   :  { %763 = vmatprep.mubr.f32.mxu1 %v213_v2  ;;  %v169_v52 = vld [vmem:[%s7678_s0 + $0x478] sm:$0xff]  ;;  %v5249_v53 = vpack.c.bf16 %v494_v43, %v402_v42  ;;  %v216_v60 = vld [vmem:[%s7678_s0 + $0x5f0] sm:$0xff]  ;;  %v35_v2 = vld [vmem:[%s7678_s0 + $0x48] sm:$0xff] }
  0x23   :  { %2629 = vmatmul.mubr.f32.gmra.mrb[2].mxu0 %v164_v1  ;;  %v217_v58 = vld [vmem:[%s7678_s0 + $0x5f8] sm:$0xff]  ;;  %v260_v61 = vld [vmem:[%s7678_s0 + $0x750] sm:$0xff]  ;;  %v499_v12 = vld [vmem:[%s7679_s1 + $0x348] sm:$0xff] }
  0x24   :  { %2633 = vmatprep.mubr.f32.mxu0 %v257_v3  ;;  %v261_v59 = vld [vmem:[%s7678_s0 + $0x758] sm:$0xff]  ;;  %v308_v0 = vld [vmem:[%s7678_s0 + $0x8d0] sm:$0xff]  ;;  %v79_v3 = vld [vmem:[%s7678_s0 + $0x1a8] sm:$0xff] }
  0x25   :  { %764 = vmatmul.mubr.f32.gmra.mrb[4].mxu1 %v212_v4  ;;  %v309_v62 = vld [vmem:[%s7678_s0 + $0x8d8] sm:$0xff]  ;;  %v352_v1 = vld [vmem:[%s7678_s0 + $0xa30] sm:$0xff]  ;;  %v78_v13 = vld [vmem:[%s7678_s0 + $0x1a0] sm:$0xff] }
  0x26   :  { %768 = vmatprep.mubr.f32.mxu1 %v305_v6  ;;  %v353_v63 = vld [vmem:[%s7678_s0 + $0xa38] sm:$0xff]  ;;  %v448_v4 = vld [vmem:[%s7679_s1 + $0x1b0] sm:$0xff]  ;;  %v127_v15 = vld [vmem:[%s7678_s0 + $0x328] sm:$0xff] }
  0x27   :  { %2634 = vmatmul.mubr.f32.gmra.mrb[4].mxu0 %v256_v5  ;;  %v540_v5 = vld [vmem:[%s7679_s1 + $0x490] sm:$0xff]  ;;  %v171_v16 = vld [vmem:[%s7678_s0 + $0x488] sm:$0xff]  ;;  %v126_v20 = vld [vmem:[%s7678_s0 + $0x320] sm:$0xff] }
  0x28   :  { %2638 = vmatprep.mubr.f32.mxu0 %v349_v7  ;;  %v404_v6 = vld [vmem:[%s7679_s1 + $0x50] sm:$0xff]  ;;  %v5341_v14 = vpack.c.bf16 %v540_v5, %v448_v4  ;;  %v501_v40 = vld [vmem:[%s7679_s1 + $0x358] sm:$0xff]  ;;  %v503_v4 = vld [vmem:[%s7679_s1 + $0x368] sm:$0xff] }
  0x29   :  { %769 = vmatmul.mubr.f32.gmra.mrb[6].mxu1 %v304_v8  ;;  %v496_v7 = vld [vmem:[%s7679_s1 + $0x330] sm:$0xff]  ;;  %v451_v8 = vld [vmem:[%s7679_s1 + $0x1c8] sm:$0xff]  ;;  %v129_v43 = vld [vmem:[%s7678_s0 + $0x338] sm:$0xff] }
  0x2a   :  { %838 = vmatprep.mubr.f32.mxu1 %v31_v10  ;;  %v34_v10 = vld [vmem:[%s7678_s0 + $0x40] sm:$0xff]  ;;  %v5253_v17 = vpack.c.bf16 %v496_v7, %v404_v6  ;;  %v80_v41 = vld [vmem:[%s7678_s0 + $0x1b0] sm:$0xff]  ;;  %v173_v44 = vld [vmem:[%s7678_s0 + $0x498] sm:$0xff] }
  0x2b   :  { %2639 = vmatmul.mubr.f32.gmra.mrb[6].mxu0 %v348_v9  ;;  %v543_v9 = vld [vmem:[%s7679_s1 + $0x4a8] sm:$0xff]  ;;  %v128_v48 = vld [vmem:[%s7678_s0 + $0x330] sm:$0xff]  ;;  %v82_v5 = vld [vmem:[%s7678_s0 + $0x1c0] sm:$0xff] }
  0x2c   :  { %2708 = vmatprep.mubr.f32.mxu0 %v75_v11  ;;  %v407_v11 = vld [vmem:[%s7679_s1 + $0x68] sm:$0xff] }
  0x2d   :  { %839 = vmatmul.mubr.f32.vlgmr.msra.gmra.mrb[0].mxu1 %v30_v18  ;;  %v5343_v18 = vpack.c.bf16 %v543_v9, %v451_v8  ;;  %v5255_v19 = vpack.c.bf16 %v499_v12, %v407_v11  ;;  %v131_v7 = vld [vmem:[%s7678_s0 + $0x348] sm:$0xff]  ;;  %v130_v12 = vld [vmem:[%s7678_s0 + $0x340] sm:$0xff] }
  0x2e   :  { %843 = vmatprep.mubr.f32.mxu1 %v123_v23  ;;  %5246 = vmatpush1.bf16.xpose.msra.mxu1 %v5245_v25  ;;  %v263_v23 = vld [vmem:[%s7678_s0 + $0x768] sm:$0xff]  ;;  %v262_v25 = vld [vmem:[%s7678_s0 + $0x760] sm:$0xff] }
  0x2f   :  { %2709 = vmatmul.mubr.f32.vlgmr.msra.gmra.mrb[0].mxu0 %v74_v21  ;;  %5248 = vmatprep.subr.bf16.mxu1 %v5247_v27  ;;  %v170_v21 = vld [vmem:[%s7678_s0 + $0x480] sm:$0xff]  ;;  %v355_v27 = vld [vmem:[%s7678_s0 + $0xa48] sm:$0xff] }
  0x30   :  { %5334 = vmatpush1.bf16.xpose.msra.mxu0 %v5333_v22  ;;  %2713 = vmatprep.mubr.f32.mxu0 %v167_v24  ;;  %v219_v22 = vld [vmem:[%s7678_s0 + $0x608] sm:$0xff]  ;;  %v218_v24 = vld [vmem:[%s7678_s0 + $0x600] sm:$0xff] }
  0x31   :  { %5336 = vmatprep.subr.bf16.mxu0 %v5335_v26  ;;  %844 = vmatmul.mubr.f32.gmra.mrb[2].mxu1 %v122_v28  ;;  %v311_v26 = vld [vmem:[%s7678_s0 + $0x8e8] sm:$0xff]  ;;  %v310_v28 = vld [vmem:[%s7678_s0 + $0x8e0] sm:$0xff] }
  0x32   :  { %848 = vmatprep.mubr.f32.mxu1 %v215_v30  ;;  %v37_v30 = vld [vmem:[%s7678_s0 + $0x58] sm:$0xff]  ;;  %v175_v8 = vld [vmem:[%s7678_s0 + $0x4a8] sm:$0xff] }
  0x33   :  { %2714 = vmatmul.mubr.f32.gmra.mrb[2].mxu0 %v166_v29  ;;  %v354_v29 = vld [vmem:[%s7678_s0 + $0xa40] sm:$0xff] }
  0x34   :  { %2718 = vmatprep.mubr.f32.mxu0 %v259_v31  ;;  %v81_v31 = vld [vmem:[%s7678_s0 + $0x1b8] sm:$0xff] }
  0x35   :  { %849 = vmatmul.mubr.f32.gmra.mrb[4].mxu1 %v214_v32  ;;  %v450_v32 = vld [vmem:[%s7679_s1 + $0x1c0] sm:$0xff] }
  0x36   :  { %853 = vmatprep.mubr.f32.mxu1 %v307_v34  ;;  %v406_v34 = vld [vmem:[%s7679_s1 + $0x60] sm:$0xff] }
  0x37   :  { %2719 = vmatmul.mubr.f32.gmra.mrb[4].mxu0 %v258_v33  ;;  %v542_v33 = vld [vmem:[%s7679_s1 + $0x4a0] sm:$0xff] }
  0x38   :  { %2723 = vmatprep.mubr.f32.mxu0 %v351_v35  ;;  %v498_v35 = vld [vmem:[%s7679_s1 + $0x340] sm:$0xff]  ;;  %v5345_v42 = vpack.c.bf16 %v542_v33, %v450_v32  ;;  %v505_v32 = vld [vmem:[%s7679_s1 + $0x378] sm:$0xff]  ;;  %v84_v33 = vld [vmem:[%s7678_s0 + $0x1d0] sm:$0xff] }
  0x39   :  { %854 = vmatmul.mubr.f32.gmra.mrb[6].mxu1 %v306_v36  ;;  %v453_v36 = vld [vmem:[%s7679_s1 + $0x1d8] sm:$0xff]  ;;  %v5257_v45 = vpack.c.bf16 %v498_v35, %v406_v34 }
  0x3a   :  { %923 = vmatprep.mubr.f32.mxu1 %v33_v38  ;;  %v36_v38 = vld [vmem:[%s7678_s0 + $0x50] sm:$0xff]  ;;  %v133_v35 = vld [vmem:[%s7678_s0 + $0x358] sm:$0xff] }
  0x3b   :  { %2724 = vmatmul.mubr.f32.gmra.mrb[6].mxu0 %v350_v37  ;;  %v545_v37 = vld [vmem:[%s7679_s1 + $0x4b8] sm:$0xff] }
  0x3c   :  { %2793 = vmatprep.mubr.f32.mxu0 %v77_v39  ;;  %v409_v39 = vld [vmem:[%s7679_s1 + $0x78] sm:$0xff] }
  0x3d   :  { %924 = vmatmul.mubr.f32.vlgmr.msra.gmra.mrb[0].mxu1 %v32_v46  ;;  %v5347_v46 = vpack.c.bf16 %v545_v37, %v453_v36  ;;  %v5259_v47 = vpack.c.bf16 %v501_v40, %v409_v39  ;;  %v177_v36 = vld [vmem:[%s7678_s0 + $0x4b8] sm:$0xff]  ;;  %v132_v40 = vld [vmem:[%s7678_s0 + $0x350] sm:$0xff] }
  0x3e   :  { %928 = vmatprep.mubr.f32.mxu1 %v125_v51  ;;  %5250 = vmatpush1.bf16.xpose.msra.mxu1 %v5249_v53  ;;  %v265_v51 = vld [vmem:[%s7678_s0 + $0x778] sm:$0xff]  ;;  %v264_v53 = vld [vmem:[%s7678_s0 + $0x770] sm:$0xff] }
  0x3f   :  { %2794 = vmatmul.mubr.f32.vlgmr.msra.gmra.mrb[0].mxu0 %v76_v49  ;;  %5252 = vmatprep.subr.bf16.mxu1 %v5251_v55  ;;  %v172_v49 = vld [vmem:[%s7678_s0 + $0x490] sm:$0xff]  ;;  %v357_v55 = vld [vmem:[%s7678_s0 + $0xa58] sm:$0xff] }
  0x40   :  { %5338 = vmatpush1.bf16.xpose.msra.mxu0 %v5337_v50  ;;  %2798 = vmatprep.mubr.f32.mxu0 %v169_v52  ;;  %v221_v50 = vld [vmem:[%s7678_s0 + $0x618] sm:$0xff]  ;;  %v220_v52 = vld [vmem:[%s7678_s0 + $0x610] sm:$0xff] }
  0x41   :  { %5340 = vmatprep.subr.bf16.mxu0 %v5339_v54  ;;  %929 = vmatmul.mubr.f32.gmra.mrb[2].mxu1 %v124_v56  ;;  %v313_v54 = vld [vmem:[%s7678_s0 + $0x8f8] sm:$0xff]  ;;  %v312_v56 = vld [vmem:[%s7678_s0 + $0x8f0] sm:$0xff] }
  0x42   :  { %933 = vmatprep.mubr.f32.mxu1 %v217_v58  ;;  %v39_v58 = vld [vmem:[%s7678_s0 + $0x68] sm:$0xff] }
  0x43   :  { %2799 = vmatmul.mubr.f32.gmra.mrb[2].mxu0 %v168_v57  ;;  %v356_v57 = vld [vmem:[%s7678_s0 + $0xa50] sm:$0xff] }
  0x44   :  { %2803 = vmatprep.mubr.f32.mxu0 %v261_v59  ;;  %v83_v59 = vld [vmem:[%s7678_s0 + $0x1c8] sm:$0xff] }
  0x45   :  { %934 = vmatmul.mubr.f32.gmra.mrb[4].mxu1 %v216_v60  ;;  %v452_v60 = vld [vmem:[%s7679_s1 + $0x1d0] sm:$0xff] }
  0x46   :  { %938 = vmatprep.mubr.f32.mxu1 %v309_v62  ;;  %v408_v62 = vld [vmem:[%s7679_s1 + $0x70] sm:$0xff] }
  0x47   :  { %2804 = vmatmul.mubr.f32.gmra.mrb[4].mxu0 %v260_v61  ;;  %v544_v61 = vld [vmem:[%s7679_s1 + $0x4b0] sm:$0xff] }
  0x48   :  { %2808 = vmatprep.mubr.f32.mxu0 %v353_v63  ;;  %v500_v63 = vld [vmem:[%s7679_s1 + $0x350] sm:$0xff]  ;;  %v5349_v6 = vpack.c.bf16 %v544_v61, %v452_v60 }
  0x49   :  { %939 = vmatmul.mubr.f32.gmra.mrb[6].mxu1 %v308_v0  ;;  %v455_v0 = vld [vmem:[%s7679_s1 + $0x1e8] sm:$0xff]  ;;  %v5261_v9 = vpack.c.bf16 %v500_v63, %v408_v62 }
  0x4a   :  { %1008 = vmatprep.mubr.f32.mxu1 %v35_v2  ;;  %v38_v2 = vld [vmem:[%s7678_s0 + $0x60] sm:$0xff] }
  0x4b   :  { %2809 = vmatmul.mubr.f32.gmra.mrb[6].mxu0 %v352_v1  ;;  %v547_v1 = vld [vmem:[%s7679_s1 + $0x4c8] sm:$0xff] }
  0x4c   :  { %2878 = vmatprep.mubr.f32.mxu0 %v79_v3  ;;  %v411_v3 = vld [vmem:[%s7679_s1 + $0x88] sm:$0xff] }
  0x4d   :  { %1009 = vmatmul.mubr.f32.vlgmr.msra.gmra.mrb[0].mxu1 %v34_v10  ;;  %v5351_v10 = vpack.c.bf16 %v547_v1, %v455_v0  ;;  %v5263_v11 = vpack.c.bf16 %v503_v4, %v411_v3 }
  0x4e   :  { %1013 = vmatprep.mubr.f32.mxu1 %v127_v15  ;;  %5254 = vmatpush1.bf16.xpose.msra.mxu1 %v5253_v17  ;;  %v267_v15 = vld [vmem:[%s7678_s0 + $0x788] sm:$0xff]  ;;  %v266_v17 = vld [vmem:[%s7678_s0 + $0x780] sm:$0xff] }
  0x4f   :  { %2879 = vmatmul.mubr.f32.vlgmr.msra.gmra.mrb[0].mxu0 %v78_v13  ;;  %5256 = vmatprep.subr.bf16.mxu1 %v5255_v19  ;;  %v174_v13 = vld [vmem:[%s7678_s0 + $0x4a0] sm:$0xff]  ;;  %v359_v19 = vld [vmem:[%s7678_s0 + $0xa68] sm:$0xff] }
  0x50   :  { %5342 = vmatpush1.bf16.xpose.msra.mxu0 %v5341_v14  ;;  %2883 = vmatprep.mubr.f32.mxu0 %v171_v16  ;;  %v223_v14 = vld [vmem:[%s7678_s0 + $0x628] sm:$0xff]  ;;  %v222_v16 = vld [vmem:[%s7678_s0 + $0x620] sm:$0xff] }
  0x51   :  { %5344 = vmatprep.subr.bf16.mxu0 %v5343_v18  ;;  %1014 = vmatmul.mubr.f32.gmra.mrb[2].mxu1 %v126_v20  ;;  %v315_v18 = vld [vmem:[%s7678_s0 + $0x908] sm:$0xff]  ;;  %v314_v20 = vld [vmem:[%s7678_s0 + $0x900] sm:$0xff] }
  0x52   :  { %1018 = vmatprep.mubr.f32.mxu1 %v219_v22  ;;  %v41_v22 = vld [vmem:[%s7678_s0 + $0x78] sm:$0xff] }
  0x53   :  { %2884 = vmatmul.mubr.f32.gmra.mrb[2].mxu0 %v170_v21  ;;  %v358_v21 = vld [vmem:[%s7678_s0 + $0xa60] sm:$0xff] }
  0x54   :  { %2888 = vmatprep.mubr.f32.mxu0 %v263_v23  ;;  %v85_v23 = vld [vmem:[%s7678_s0 + $0x1d8] sm:$0xff] }
  0x55   :  { %1019 = vmatmul.mubr.f32.gmra.mrb[4].mxu1 %v218_v24  ;;  %v454_v24 = vld [vmem:[%s7679_s1 + $0x1e0] sm:$0xff] }
  0x56   :  { %1023 = vmatprep.mubr.f32.mxu1 %v311_v26  ;;  %v410_v26 = vld [vmem:[%s7679_s1 + $0x80] sm:$0xff] }
  0x57   :  { %2889 = vmatmul.mubr.f32.gmra.mrb[4].mxu0 %v262_v25  ;;  %v546_v25 = vld [vmem:[%s7679_s1 + $0x4c0] sm:$0xff] }
  0x58   :  { %2893 = vmatprep.mubr.f32.mxu0 %v355_v27  ;;  %v502_v27 = vld [vmem:[%s7679_s1 + $0x360] sm:$0xff]  ;;  %v5353_v34 = vpack.c.bf16 %v546_v25, %v454_v24 }
  0x59   :  { %1024 = vmatmul.mubr.f32.gmra.mrb[6].mxu1 %v310_v28  ;;  %v457_v28 = vld [vmem:[%s7679_s1 + $0x1f8] sm:$0xff]  ;;  %v5265_v37 = vpack.c.bf16 %v502_v27, %v410_v26 }
  0x5a   :  { %1093 = vmatprep.mubr.f32.mxu1 %v37_v30  ;;  %v40_v30 = vld [vmem:[%s7678_s0 + $0x70] sm:$0xff] }
  0x5b   :  { %2894 = vmatmul.mubr.f32.gmra.mrb[6].mxu0 %v354_v29  ;;  %v549_v29 = vld [vmem:[%s7679_s1 + $0x4d8] sm:$0xff] }
  0x5c   :  { %2963 = vmatprep.mubr.f32.mxu0 %v81_v31  ;;  %v413_v31 = vld [vmem:[%s7679_s1 + $0x98] sm:$0xff] }
  0x5d   :  { %1094 = vmatmul.mubr.f32.vlgmr.msra.gmra.mrb[0].mxu1 %v36_v38  ;;  %v5355_v38 = vpack.c.bf16 %v549_v29, %v457_v28  ;;  %v5267_v39 = vpack.c.bf16 %v505_v32, %v413_v31 }
  0x5e   :  { %1098 = vmatprep.mubr.f32.mxu1 %v129_v43  ;;  %5258 = vmatpush1.bf16.xpose.msra.mxu1 %v5257_v45  ;;  %v269_v43 = vld [vmem:[%s7678_s0 + $0x798] sm:$0xff] }
  0x5f   :  { %2964 = vmatmul.mubr.f32.vlgmr.msra.gmra.mrb[0].mxu0 %v80_v41  ;;  %5260 = vmatprep.subr.bf16.mxu1 %v5259_v47  ;;  %v176_v41 = vld [vmem:[%s7678_s0 + $0x4b0] sm:$0xff] }
  0x60   :  { %5346 = vmatpush1.bf16.xpose.msra.mxu0 %v5345_v42  ;;  %2968 = vmatprep.mubr.f32.mxu0 %v173_v44  ;;  %v225_v42 = vld [vmem:[%s7678_s0 + $0x638] sm:$0xff] }
  0x61   :  { %5348 = vmatprep.subr.bf16.mxu0 %v5347_v46  ;;  %1099 = vmatmul.mubr.f32.gmra.mrb[2].mxu1 %v128_v48 }
  0x62   :  { %1103 = vmatprep.mubr.f32.mxu1 %v221_v50 }
  0x63   :  { %2969 = vmatmul.mubr.f32.gmra.mrb[2].mxu0 %v172_v49 }
  0x64   :  { %2973 = vmatprep.mubr.f32.mxu0 %v265_v51 }
  0x65   :  { %1104 = vmatmul.mubr.f32.gmra.mrb[4].mxu1 %v220_v52 }
  0x66   :  { %1108 = vmatprep.mubr.f32.mxu1 %v313_v54 }
  0x67   :  { %2974 = vmatmul.mubr.f32.gmra.mrb[4].mxu0 %v264_v53 }
  0x68   :  { %2978 = vmatprep.mubr.f32.mxu0 %v357_v55 }
  0x69   :  { %1109 = vmatmul.mubr.f32.gmra.mrb[6].mxu1 %v312_v56 }
  0x6a   :  { %1178 = vmatprep.mubr.f32.mxu1 %v39_v58 }
  0x6b   :  { %2979 = vmatmul.mubr.f32.gmra.mrb[6].mxu0 %v356_v57 }
  0x6c   :  { %3048 = vmatprep.mubr.f32.mxu0 %v83_v59 }
  0x6d   :  { %1179 = vmatmul.mubr.f32.vlgmr.msra.gmra.mrb[0].mxu1 %v38_v2 }
  0x6e   :  { %1183 = vmatprep.mubr.f32.mxu1 %v131_v7  ;;  %5262 = vmatpush1.bf16.xpose.msra.mxu1 %v5261_v9 }
  0x6f   :  { %3049 = vmatmul.mubr.f32.vlgmr.msra.gmra.mrb[0].mxu0 %v82_v5  ;;  %5264 = vmatprep.subr.bf16.mxu1 %v5263_v11 }
  0x70   :  { %5350 = vmatpush1.bf16.xpose.msra.mxu0 %v5349_v6  ;;  %3053 = vmatprep.mubr.f32.mxu0 %v175_v8 }
  0x71   :  { %5352 = vmatprep.subr.bf16.mxu0 %v5351_v10  ;;  %1184 = vmatmul.mubr.f32.gmra.mrb[2].mxu1 %v130_v12 }
  0x72   :  { %1188 = vmatprep.mubr.f32.mxu1 %v223_v14 }
  0x73   :  { %3054 = vmatmul.mubr.f32.gmra.mrb[2].mxu0 %v174_v13 }
  0x74   :  { %3058 = vmatprep.mubr.f32.mxu0 %v267_v15 }
  0x75   :  { %1189 = vmatmul.mubr.f32.gmra.mrb[4].mxu1 %v222_v16 }
  0x76   :  { %1193 = vmatprep.mubr.f32.mxu1 %v315_v18 }
  0x77   :  { %3059 = vmatmul.mubr.f32.gmra.mrb[4].mxu0 %v266_v17 }
  0x78   :  { %3063 = vmatprep.mubr.f32.mxu0 %v359_v19 }
  0x79   :  { %1194 = vmatmul.mubr.f32.gmra.mrb[6].mxu1 %v314_v20 }
  0x7a   :  { %1263 = vmatprep.mubr.f32.mxu1 %v41_v22 }
  0x7b   :  { %3064 = vmatmul.mubr.f32.gmra.mrb[6].mxu0 %v358_v21 }
  0x7c   :  { %3133 = vmatprep.mubr.f32.mxu0 %v85_v23 }
  0x7d   :  { %1264 = vmatmul.mubr.f32.vlgmr.msra.gmra.mrb[0].mxu1 %v40_v30 }
  0x7e   :  { %1268 = vmatprep.mubr.f32.mxu1 %v133_v35  ;;  %5266 = vmatpush1.bf16.xpose.msra.mxu1 %v5265_v37 }
  0x7f   :  { %3134 = vmatmul.mubr.f32.vlgmr.msra.gmra.mrb[0].mxu0 %v84_v33 }
  0x80   :  { %5354 = vmatpush1.bf16.xpose.msra.mxu0 %v5353_v34  ;;  %3138 = vmatprep.mubr.f32.mxu0 %v177_v36 }
  0x81   :  { %5356 = vmatprep.subr.bf16.mxu0 %v5355_v38 }
  0x82   :  { %13 = vsyncpa [#allocation4], 0  ;;  %1269 = vmatmul.mubr.f32.gmra.mrb[2].mxu1 %v132_v40  ;;  %5268 = vmatprep.subr.bf16.mxu1 %v5267_v39  ;;  %v224_v44 = vld [vmem:[%s7678_s0 + $0x630] sm:$0xff]  ;;  %v317_v46 = vld [vmem:[%s7678_s0 + $0x918] sm:$0xff]  ;;  %vm585_vm0 = vcmask 130048   ;;  %vm5823_vm2 = vmmov 0  }
  0x83   :  { %3139 = vmatmul.mubr.f32.gmra.mrb[2].mxu0 %v176_v41  ;;  %1273 = vmatprep.mubr.f32.mxu1 %v225_v42  ;;  %v268_v45 = vld [vmem:[%s7678_s0 + $0x790] sm:$0xff]  ;;  %v361_v47 = vld [vmem:[%s7678_s0 + $0xa78] sm:$0xff]  ;;  %v43_v50 = vld [vmem:[%s7678_s0 + $0x88] sm:$0xff]  ;;  %vm4549_vm3 = vcmask 1040384   ;;  %vm4551_vm4 = vcmask 1041408   ;;  %vm4553_vm5 = vcmask 1042432  }
  0x84   :  { %3143 = vmatprep.mubr.f32.mxu0 %v269_v43  ;;  %v316_v48 = vld [vmem:[%s7678_s0 + $0x910] sm:$0xff]  ;;  %v87_v51 = vld [vmem:[%s7678_s0 + $0x1e8] sm:$0xff]  ;;  %v42_v58 = vld [vmem:[%s7678_s0 + $0x80] sm:$0xff]  ;;  %vm4555_vm6 = vcmask 1043456   ;;  %vm4557_vm7 = vcmask 1044480   ;;  %vm4559_vm8 = vcmask 1045504  }
  0x85   :  { %v360_v49 = vld [vmem:[%s7678_s0 + $0xa70] sm:$0xff]  ;;  %v459_v56 = vld [vmem:[%s7679_s1 + $0x208] sm:$0xff]  ;;  %v86_v61 = vld [vmem:[%s7678_s0 + $0x1e0] sm:$0xff]  ;;  %vm4561_vm9 = vcmask 1046528   ;;  %vm4644_vm10 = vcmask 122880   ;;  %vm4646_vm11 = vcmask 123905  }
  0x86   :  { %1274 = vmatmul.mubr.f32.gmra.mrb[4].mxu1 %v224_v44  ;;  %v456_v52 = vld [vmem:[%s7679_s1 + $0x1f0] sm:$0xff]  ;;  %v551_v57 = vld [vmem:[%s7679_s1 + $0x4e8] sm:$0xff]  ;;  %v134_v4 = vld [vmem:[%s7678_s0 + $0x360] sm:$0xff]  ;;  %vm4648_vm12 = vcmask 124930   ;;  %vm4650_vm13 = vcmask 125955   ;;  %vm4652_vm14 = vcmask 126980  }
  0x87   :  { %3144 = vmatmul.mubr.f32.gmra.mrb[4].mxu0 %v268_v45  ;;  %1278 = vmatprep.mubr.f32.mxu1 %v317_v46  ;;  %v548_v53 = vld [vmem:[%s7679_s1 + $0x4d0] sm:$0xff]  ;;  %v415_v59 = vld [vmem:[%s7679_s1 + $0xa8] sm:$0xff]  ;;  %v5359_v2 = vpack.c.bf16 %v551_v57, %v459_v56  ;;  %v178_v5 = vld [vmem:[%s7678_s0 + $0x4c0] sm:$0xff]  ;;  %vm4654_vm15 = vcmask 128005  }
  0x88   :  { %3148 = vmatprep.mubr.f32.mxu0 %v361_v47  ;;  %v412_v54 = vld [vmem:[%s7679_s1 + $0x90] sm:$0xff]  ;;  %v507_v60 = vld [vmem:[%s7679_s1 + $0x388] sm:$0xff]  ;;  %v5357_v62 = vpack.c.bf16 %v548_v53, %v456_v52  ;;  %v226_v8 = vld [vmem:[%s7678_s0 + $0x640] sm:$0xff] }
  0x89   :  { %v504_v55 = vld [vmem:[%s7679_s1 + $0x370] sm:$0xff]  ;;  %v135_v63 = vld [vmem:[%s7678_s0 + $0x368] sm:$0xff]  ;;  %v5271_v3 = vpack.c.bf16 %v507_v60, %v415_v59  ;;  %v270_v9 = vld [vmem:[%s7678_s0 + $0x7a0] sm:$0xff] }
  0x8a   :  { %1279 = vmatmul.mubr.f32.gmra.mrb[6].mxu1 %v316_v48  ;;  %v179_v0 = vld [vmem:[%s7678_s0 + $0x4c8] sm:$0xff]  ;;  %v5269_v1 = vpack.c.bf16 %v504_v55, %v412_v54  ;;  %v318_v12 = vld [vmem:[%s7678_s0 + $0x920] sm:$0xff]  ;;  %v45_v14 = vld [vmem:[%s7678_s0 + $0x98] sm:$0xff] }
  0x8b   :  { %3149 = vmatmul.mubr.f32.gmra.mrb[6].mxu0 %v360_v49  ;;  %1348 = vmatprep.mubr.f32.mxu1 %v43_v50  ;;  %v227_v6 = vld [vmem:[%s7678_s0 + $0x648] sm:$0xff]  ;;  %v362_v13 = vld [vmem:[%s7678_s0 + $0xa80] sm:$0xff]  ;;  %v89_v15 = vld [vmem:[%s7678_s0 + $0x1f8] sm:$0xff] }
  0x8c   :  { %3218 = vmatprep.mubr.f32.mxu0 %v87_v51  ;;  %v271_v7 = vld [vmem:[%s7678_s0 + $0x7a8] sm:$0xff]  ;;  %v458_v16 = vld [vmem:[%s7679_s1 + $0x200] sm:$0xff]  ;;  %v461_v20 = vld [vmem:[%s7679_s1 + $0x218] sm:$0xff] }
  0x8d   :  { %v319_v10 = vld [vmem:[%s7678_s0 + $0x928] sm:$0xff]  ;;  %v550_v17 = vld [vmem:[%s7679_s1 + $0x4e0] sm:$0xff]  ;;  %v553_v21 = vld [vmem:[%s7679_s1 + $0x4f8] sm:$0xff] }
  0x8e   :  { %1349 = vmatmul.mubr.f32.vlgmr.msra.gmra.mrb[0].mxu1 %v42_v58  ;;  %v363_v11 = vld [vmem:[%s7678_s0 + $0xa88] sm:$0xff]  ;;  %v414_v18 = vld [vmem:[%s7679_s1 + $0xa0] sm:$0xff]  ;;  %v44_v22 = vld [vmem:[%s7678_s0 + $0x90] sm:$0xff]  ;;  %v5361_v26 = vpack.c.bf16 %v550_v17, %v458_v16  ;;  %v5363_v30 = vpack.c.bf16 %v553_v21, %v461_v20 }
  0x8f   :  { %3219 = vmatmul.mubr.f32.vlgmr.msra.gmra.mrb[0].mxu0 %v86_v61  ;;  %1353 = vmatprep.mubr.f32.mxu1 %v135_v63  ;;  %v506_v19 = vld [vmem:[%s7679_s1 + $0x380] sm:$0xff]  ;;  %v417_v23 = vld [vmem:[%s7679_s1 + $0xb8] sm:$0xff]  ;;  %v88_v25 = vld [vmem:[%s7678_s0 + $0x1f0] sm:$0xff] }
  0x90   :  { %5358 = vmatpush1.bf16.xpose.msra.mxu0 %v5357_v62  ;;  %3223 = vmatprep.mubr.f32.mxu0 %v179_v0  ;;  %v509_v24 = vld [vmem:[%s7679_s1 + $0x398] sm:$0xff]  ;;  %v5273_v29 = vpack.c.bf16 %v506_v19, %v414_v18  ;;  %v136_v32 = vld [vmem:[%s7678_s0 + $0x370] sm:$0xff]  ;;  %v47_v42 = vld [vmem:[%s7678_s0 + $0xa8] sm:$0xff] }
  0x91   :  { %5270 = vmatpush1.bf16.xpose.msra.mxu1 %v5269_v1  ;;  %5360 = vmatprep.subr.bf16.mxu0 %v5359_v2  ;;  %v137_v27 = vld [vmem:[%s7678_s0 + $0x378] sm:$0xff]  ;;  %v5275_v31 = vpack.c.bf16 %v509_v24, %v417_v23  ;;  %v180_v33 = vld [vmem:[%s7678_s0 + $0x4d0] sm:$0xff]  ;;  %v91_v43 = vld [vmem:[%s7678_s0 + $0x208] sm:$0xff] }
  0x92   :  { %1354 = vmatmul.mubr.f32.gmra.mrb[2].mxu1 %v134_v4  ;;  %5272 = vmatprep.subr.bf16.mxu1 %v5271_v3  ;;  %v181_v28 = vld [vmem:[%s7678_s0 + $0x4d8] sm:$0xff]  ;;  %v228_v36 = vld [vmem:[%s7678_s0 + $0x650] sm:$0xff]  ;;  %v463_v48 = vld [vmem:[%s7679_s1 + $0x228] sm:$0xff] }
  0x93   :  { %3224 = vmatmul.mubr.f32.gmra.mrb[2].mxu0 %v178_v5  ;;  %1358 = vmatprep.mubr.f32.mxu1 %v227_v6  ;;  %v229_v34 = vld [vmem:[%s7678_s0 + $0x658] sm:$0xff]  ;;  %v272_v37 = vld [vmem:[%s7678_s0 + $0x7b0] sm:$0xff]  ;;  %v555_v49 = vld [vmem:[%s7679_s1 + $0x508] sm:$0xff] }
  0x94   :  { %3228 = vmatprep.mubr.f32.mxu0 %v271_v7  ;;  %v273_v35 = vld [vmem:[%s7678_s0 + $0x7b8] sm:$0xff]  ;;  %v320_v40 = vld [vmem:[%s7678_s0 + $0x930] sm:$0xff]  ;;  %v46_v50 = vld [vmem:[%s7678_s0 + $0xa0] sm:$0xff]  ;;  %v5367_v58 = vpack.c.bf16 %v555_v49, %v463_v48 }
  0x95   :  { %v321_v38 = vld [vmem:[%s7678_s0 + $0x938] sm:$0xff]  ;;  %v364_v41 = vld [vmem:[%s7678_s0 + $0xa90] sm:$0xff]  ;;  %v419_v51 = vld [vmem:[%s7679_s1 + $0xc8] sm:$0xff] }
  0x96   :  { %1359 = vmatmul.mubr.f32.gmra.mrb[4].mxu1 %v226_v8  ;;  %v365_v39 = vld [vmem:[%s7678_s0 + $0xa98] sm:$0xff]  ;;  %v460_v44 = vld [vmem:[%s7679_s1 + $0x210] sm:$0xff]  ;;  %v511_v52 = vld [vmem:[%s7679_s1 + $0x3a8] sm:$0xff] }
  0x97   :  { %3229 = vmatmul.mubr.f32.gmra.mrb[4].mxu0 %v270_v9  ;;  %1363 = vmatprep.mubr.f32.mxu1 %v319_v10  ;;  %v552_v45 = vld [vmem:[%s7679_s1 + $0x4f0] sm:$0xff]  ;;  %v90_v53 = vld [vmem:[%s7678_s0 + $0x200] sm:$0xff]  ;;  %v139_v55 = vld [vmem:[%s7678_s0 + $0x388] sm:$0xff]  ;;  %v5279_v59 = vpack.c.bf16 %v511_v52, %v419_v51 }
  0x98   :  { %3233 = vmatprep.mubr.f32.mxu0 %v363_v11  ;;  %v416_v46 = vld [vmem:[%s7679_s1 + $0xb0] sm:$0xff]  ;;  %v5365_v54 = vpack.c.bf16 %v552_v45, %v460_v44  ;;  %v183_v56 = vld [vmem:[%s7678_s0 + $0x4e8] sm:$0xff]  ;;  %v138_v60 = vld [vmem:[%s7678_s0 + $0x380] sm:$0xff] }
  0x99   :  { %v508_v47 = vld [vmem:[%s7679_s1 + $0x390] sm:$0xff]  ;;  %v182_v61 = vld [vmem:[%s7678_s0 + $0x4e0] sm:$0xff]  ;;  %v231_v62 = vld [vmem:[%s7678_s0 + $0x668] sm:$0xff] }
  0x9a   :  { %1364 = vmatmul.mubr.f32.gmra.mrb[6].mxu1 %v318_v12  ;;  %v5277_v57 = vpack.c.bf16 %v508_v47, %v416_v46  ;;  %v275_v63 = vld [vmem:[%s7678_s0 + $0x7c8] sm:$0xff]  ;;  %v230_v0 = vld [vmem:[%s7678_s0 + $0x660] sm:$0xff]  ;;  %v49_v6 = vld [vmem:[%s7678_s0 + $0xb8] sm:$0xff] }
  0x9b   :  { %3234 = vmatmul.mubr.f32.gmra.mrb[6].mxu0 %v362_v13  ;;  %1433 = vmatprep.mubr.f32.mxu1 %v45_v14  ;;  %v274_v1 = vld [vmem:[%s7678_s0 + $0x7c0] sm:$0xff]  ;;  %v323_v2 = vld [vmem:[%s7678_s0 + $0x948] sm:$0xff]  ;;  %v93_v7 = vld [vmem:[%s7678_s0 + $0x218] sm:$0xff] }
  0x9c   :  { %3303 = vmatprep.mubr.f32.mxu0 %v89_v15  ;;  %v367_v3 = vld [vmem:[%s7678_s0 + $0xaa8] sm:$0xff]  ;;  %v322_v4 = vld [vmem:[%s7678_s0 + $0x940] sm:$0xff]  ;;  %v465_v12 = vld [vmem:[%s7679_s1 + $0x238] sm:$0xff] }
  0x9d   :  { %v366_v5 = vld [vmem:[%s7678_s0 + $0xaa0] sm:$0xff]  ;;  %v557_v13 = vld [vmem:[%s7679_s1 + $0x518] sm:$0xff]  ;;  %v48_v14 = vld [vmem:[%s7678_s0 + $0xb0] sm:$0xff] }
  0x9e   :  { %1434 = vmatmul.mubr.f32.vlgmr.msra.gmra.mrb[0].mxu1 %v44_v22  ;;  %v462_v8 = vld [vmem:[%s7679_s1 + $0x220] sm:$0xff]  ;;  %v421_v15 = vld [vmem:[%s7679_s1 + $0xd8] sm:$0xff]  ;;  %v92_v17 = vld [vmem:[%s7678_s0 + $0x210] sm:$0xff]  ;;  %v5371_v22 = vpack.c.bf16 %v557_v13, %v465_v12 }
  0x9f   :  { %3304 = vmatmul.mubr.f32.vlgmr.msra.gmra.mrb[0].mxu0 %v88_v25  ;;  %1438 = vmatprep.mubr.f32.mxu1 %v137_v27  ;;  %v554_v9 = vld [vmem:[%s7679_s1 + $0x500] sm:$0xff]  ;;  %v513_v16 = vld [vmem:[%s7679_s1 + $0x3b8] sm:$0xff]  ;;  %v140_v24 = vld [vmem:[%s7678_s0 + $0x390] sm:$0xff] }
  0xa0   :  { %5362 = vmatpush1.bf16.xpose.msra.mxu0 %v5361_v26  ;;  %3308 = vmatprep.mubr.f32.mxu0 %v181_v28  ;;  %v418_v10 = vld [vmem:[%s7679_s1 + $0xc0] sm:$0xff]  ;;  %v5369_v18 = vpack.c.bf16 %v554_v9, %v462_v8  ;;  %v141_v19 = vld [vmem:[%s7678_s0 + $0x398] sm:$0xff]  ;;  %v5283_v23 = vpack.c.bf16 %v513_v16, %v421_v15  ;;  %v184_v25 = vld [vmem:[%s7678_s0 + $0x4f0] sm:$0xff] }
  0xa1   :  { %5274 = vmatpush1.bf16.xpose.msra.mxu1 %v5273_v29  ;;  %5364 = vmatprep.subr.bf16.mxu0 %v5363_v30  ;;  %v510_v11 = vld [vmem:[%s7679_s1 + $0x3a0] sm:$0xff]  ;;  %v185_v20 = vld [vmem:[%s7678_s0 + $0x4f8] sm:$0xff]  ;;  %v232_v28 = vld [vmem:[%s7678_s0 + $0x670] sm:$0xff] }
  0xa2   :  { %1439 = vmatmul.mubr.f32.gmra.mrb[2].mxu1 %v136_v32  ;;  %5276 = vmatprep.subr.bf16.mxu1 %v5275_v31  ;;  %v5281_v21 = vpack.c.bf16 %v510_v11, %v418_v10  ;;  %v233_v26 = vld [vmem:[%s7678_s0 + $0x678] sm:$0xff]  ;;  %v276_v29 = vld [vmem:[%s7678_s0 + $0x7d0] sm:$0xff]  ;;  %v515_v44 = vld [vmem:[%s7679_s1 + $0x3c8] sm:$0xff] }
  0xa3   :  { %3309 = vmatmul.mubr.f32.gmra.mrb[2].mxu0 %v180_v33  ;;  %1443 = vmatprep.mubr.f32.mxu1 %v229_v34  ;;  %v277_v27 = vld [vmem:[%s7678_s0 + $0x7d8] sm:$0xff]  ;;  %v324_v32 = vld [vmem:[%s7678_s0 + $0x950] sm:$0xff]  ;;  %v51_v34 = vld [vmem:[%s7678_s0 + $0xc8] sm:$0xff] }
  0xa4   :  { %3313 = vmatprep.mubr.f32.mxu0 %v273_v35  ;;  %v325_v30 = vld [vmem:[%s7678_s0 + $0x958] sm:$0xff]  ;;  %v368_v33 = vld [vmem:[%s7678_s0 + $0xab0] sm:$0xff]  ;;  %v95_v35 = vld [vmem:[%s7678_s0 + $0x228] sm:$0xff] }
  0xa5   :  { %v369_v31 = vld [vmem:[%s7678_s0 + $0xab8] sm:$0xff]  ;;  %v94_v45 = vld [vmem:[%s7678_s0 + $0x220] sm:$0xff]  ;;  %v143_v47 = vld [vmem:[%s7678_s0 + $0x3a8] sm:$0xff] }
  0xa6   :  { %1444 = vmatmul.mubr.f32.gmra.mrb[4].mxu1 %v228_v36  ;;  %v464_v36 = vld [vmem:[%s7679_s1 + $0x230] sm:$0xff]  ;;  %v187_v48 = vld [vmem:[%s7678_s0 + $0x508] sm:$0xff]  ;;  %v142_v52 = vld [vmem:[%s7678_s0 + $0x3a0] sm:$0xff] }
  0xa7   :  { %3314 = vmatmul.mubr.f32.gmra.mrb[4].mxu0 %v272_v37  ;;  %1448 = vmatprep.mubr.f32.mxu1 %v321_v38  ;;  %v556_v37 = vld [vmem:[%s7679_s1 + $0x510] sm:$0xff]  ;;  %v517_v8 = vld [vmem:[%s7679_s1 + $0x3d8] sm:$0xff]  ;;  %vm7451_vm1 = vmpackc.low %vm585_vm0, %vm585_vm0 }
  0xa8   :  { %3318 = vmatprep.mubr.f32.mxu0 %v365_v39  ;;  %v420_v38 = vld [vmem:[%s7679_s1 + $0xd0] sm:$0xff]  ;;  %v5373_v46 = vpack.c.bf16 %v556_v37, %v464_v36  ;;  %v145_v11 = vld [vmem:[%s7678_s0 + $0x3b8] sm:$0xff]  ;;  %v519_v36 = vld [vmem:[%s7679_s1 + $0x3e8] sm:$0xff] }
  0xa9   :  { %v512_v39 = vld [vmem:[%s7679_s1 + $0x3b0] sm:$0xff]  ;;  %v189_v12 = vld [vmem:[%s7678_s0 + $0x518] sm:$0xff]  ;;  %v98_v37 = vld [vmem:[%s7678_s0 + $0x240] sm:$0xff] }
  0xaa   :  { %1449 = vmatmul.mubr.f32.gmra.mrb[6].mxu1 %v320_v40  ;;  %v467_v40 = vld [vmem:[%s7679_s1 + $0x248] sm:$0xff]  ;;  %v5285_v49 = vpack.c.bf16 %v512_v39, %v420_v38  ;;  %v96_v9 = vld [vmem:[%s7678_s0 + $0x230] sm:$0xff] }
  0xab   :  { %3319 = vmatmul.mubr.f32.gmra.mrb[6].mxu0 %v364_v41  ;;  %1518 = vmatprep.mubr.f32.mxu1 %v47_v42  ;;  %v559_v41 = vld [vmem:[%s7679_s1 + $0x528] sm:$0xff]  ;;  %v50_v42 = vld [vmem:[%s7678_s0 + $0xc0] sm:$0xff]  ;;  %v144_v16 = vld [vmem:[%s7678_s0 + $0x3b0] sm:$0xff] }
  0xac   :  { %3388 = vmatprep.mubr.f32.mxu0 %v91_v43  ;;  %v423_v43 = vld [vmem:[%s7679_s1 + $0xe8] sm:$0xff] }
  0xad   :  { %v5287_v51 = vpack.c.bf16 %v515_v44, %v423_v43  ;;  %v147_v39 = vld [vmem:[%s7678_s0 + $0x3c8] sm:$0xff]  ;;  %v146_v44 = vld [vmem:[%s7678_s0 + $0x3c0] sm:$0xff] }
  0xae   :  { %1519 = vmatmul.mubr.f32.vlgmr.msra.gmra.mrb[0].mxu1 %v46_v50  ;;  %v5375_v50 = vpack.c.bf16 %v559_v41, %v467_v40  ;;  %v191_v40 = vld [vmem:[%s7678_s0 + $0x528] sm:$0xff] }
  0xaf   :  { %3389 = vmatmul.mubr.f32.vlgmr.msra.gmra.mrb[0].mxu0 %v90_v53  ;;  %1523 = vmatprep.mubr.f32.mxu1 %v139_v55  ;;  %v186_v53 = vld [vmem:[%s7678_s0 + $0x500] sm:$0xff]  ;;  %v279_v55 = vld [vmem:[%s7678_s0 + $0x7e8] sm:$0xff] }
  0xb0   :  { %5366 = vmatpush1.bf16.xpose.msra.mxu0 %v5365_v54  ;;  %3393 = vmatprep.mubr.f32.mxu0 %v183_v56  ;;  %v235_v54 = vld [vmem:[%s7678_s0 + $0x688] sm:$0xff]  ;;  %v234_v56 = vld [vmem:[%s7678_s0 + $0x680] sm:$0xff] }
  0xb1   :  { %5278 = vmatpush1.bf16.xpose.msra.mxu1 %v5277_v57  ;;  %5368 = vmatprep.subr.bf16.mxu0 %v5367_v58  ;;  %v278_v57 = vld [vmem:[%s7678_s0 + $0x7e0] sm:$0xff]  ;;  %v327_v58 = vld [vmem:[%s7678_s0 + $0x968] sm:$0xff] }
  0xb2   :  { %1524 = vmatmul.mubr.f32.gmra.mrb[2].mxu1 %v138_v60  ;;  %5280 = vmatprep.subr.bf16.mxu1 %v5279_v59  ;;  %v371_v59 = vld [vmem:[%s7678_s0 + $0xac8] sm:$0xff]  ;;  %v326_v60 = vld [vmem:[%s7678_s0 + $0x960] sm:$0xff] }
  0xb3   :  { %3394 = vmatmul.mubr.f32.gmra.mrb[2].mxu0 %v182_v61  ;;  %1528 = vmatprep.mubr.f32.mxu1 %v231_v62  ;;  %v370_v61 = vld [vmem:[%s7678_s0 + $0xac0] sm:$0xff]  ;;  %v53_v62 = vld [vmem:[%s7678_s0 + $0xd8] sm:$0xff] }
  0xb4   :  { %3398 = vmatprep.mubr.f32.mxu0 %v275_v63  ;;  %v97_v63 = vld [vmem:[%s7678_s0 + $0x238] sm:$0xff] }
  0xb6   :  { %1529 = vmatmul.mubr.f32.gmra.mrb[4].mxu1 %v230_v0  ;;  %v466_v0 = vld [vmem:[%s7679_s1 + $0x240] sm:$0xff] }
  0xb7   :  { %3399 = vmatmul.mubr.f32.gmra.mrb[4].mxu0 %v274_v1  ;;  %1533 = vmatprep.mubr.f32.mxu1 %v323_v2  ;;  %v558_v1 = vld [vmem:[%s7679_s1 + $0x520] sm:$0xff] }
  0xb8   :  { %3403 = vmatprep.mubr.f32.mxu0 %v367_v3  ;;  %v422_v2 = vld [vmem:[%s7679_s1 + $0xe0] sm:$0xff]  ;;  %v5377_v10 = vpack.c.bf16 %v558_v1, %v466_v0  ;;  %v521_v0 = vld [vmem:[%s7679_s1 + $0x3f8] sm:$0xff]  ;;  %v100_v1 = vld [vmem:[%s7678_s0 + $0x250] sm:$0xff] }
  0xb9   :  { %v514_v3 = vld [vmem:[%s7679_s1 + $0x3c0] sm:$0xff] }
  0xba   :  { %1534 = vmatmul.mubr.f32.gmra.mrb[6].mxu1 %v322_v4  ;;  %v469_v4 = vld [vmem:[%s7679_s1 + $0x258] sm:$0xff]  ;;  %v5289_v13 = vpack.c.bf16 %v514_v3, %v422_v2 }
  0xbb   :  { %3404 = vmatmul.mubr.f32.gmra.mrb[6].mxu0 %v366_v5  ;;  %1603 = vmatprep.mubr.f32.mxu1 %v49_v6  ;;  %v561_v5 = vld [vmem:[%s7679_s1 + $0x538] sm:$0xff]  ;;  %v52_v6 = vld [vmem:[%s7678_s0 + $0xd0] sm:$0xff] }
  0xbc   :  { %3473 = vmatprep.mubr.f32.mxu0 %v93_v7  ;;  %v425_v7 = vld [vmem:[%s7679_s1 + $0xf8] sm:$0xff] }
  0xbd   :  { %v5291_v15 = vpack.c.bf16 %v517_v8, %v425_v7  ;;  %v149_v3 = vld [vmem:[%s7678_s0 + $0x3d8] sm:$0xff]  ;;  %v148_v8 = vld [vmem:[%s7678_s0 + $0x3d0] sm:$0xff] }
  0xbe   :  { %1604 = vmatmul.mubr.f32.vlgmr.msra.gmra.mrb[0].mxu1 %v48_v14  ;;  %v5379_v14 = vpack.c.bf16 %v561_v5, %v469_v4  ;;  %v193_v4 = vld [vmem:[%s7678_s0 + $0x538] sm:$0xff] }
  0xbf   :  { %3474 = vmatmul.mubr.f32.vlgmr.msra.gmra.mrb[0].mxu0 %v92_v17  ;;  %1608 = vmatprep.mubr.f32.mxu1 %v141_v19  ;;  %v188_v17 = vld [vmem:[%s7678_s0 + $0x510] sm:$0xff]  ;;  %v281_v19 = vld [vmem:[%s7678_s0 + $0x7f8] sm:$0xff] }
  0xc0   :  { %5370 = vmatpush1.bf16.xpose.msra.mxu0 %v5369_v18  ;;  %3478 = vmatprep.mubr.f32.mxu0 %v185_v20  ;;  %v237_v18 = vld [vmem:[%s7678_s0 + $0x698] sm:$0xff]  ;;  %v236_v20 = vld [vmem:[%s7678_s0 + $0x690] sm:$0xff] }
  0xc1   :  { %5282 = vmatpush1.bf16.xpose.msra.mxu1 %v5281_v21  ;;  %5372 = vmatprep.subr.bf16.mxu0 %v5371_v22  ;;  %v280_v21 = vld [vmem:[%s7678_s0 + $0x7f0] sm:$0xff]  ;;  %v329_v22 = vld [vmem:[%s7678_s0 + $0x978] sm:$0xff] }
  0xc2   :  { %1609 = vmatmul.mubr.f32.gmra.mrb[2].mxu1 %v140_v24  ;;  %5284 = vmatprep.subr.bf16.mxu1 %v5283_v23  ;;  %v373_v23 = vld [vmem:[%s7678_s0 + $0xad8] sm:$0xff]  ;;  %v328_v24 = vld [vmem:[%s7678_s0 + $0x970] sm:$0xff] }
  0xc3   :  { %3479 = vmatmul.mubr.f32.gmra.mrb[2].mxu0 %v184_v25  ;;  %1613 = vmatprep.mubr.f32.mxu1 %v233_v26  ;;  %v372_v25 = vld [vmem:[%s7678_s0 + $0xad0] sm:$0xff]  ;;  %v55_v26 = vld [vmem:[%s7678_s0 + $0xe8] sm:$0xff] }
  0xc4   :  { %3483 = vmatprep.mubr.f32.mxu0 %v277_v27  ;;  %v99_v27 = vld [vmem:[%s7678_s0 + $0x248] sm:$0xff] }
  0xc6   :  { %1614 = vmatmul.mubr.f32.gmra.mrb[4].mxu1 %v232_v28  ;;  %v468_v28 = vld [vmem:[%s7679_s1 + $0x250] sm:$0xff] }
  0xc7   :  { %3484 = vmatmul.mubr.f32.gmra.mrb[4].mxu0 %v276_v29  ;;  %1618 = vmatprep.mubr.f32.mxu1 %v325_v30  ;;  %v560_v29 = vld [vmem:[%s7679_s1 + $0x530] sm:$0xff] }
  0xc8   :  { %3488 = vmatprep.mubr.f32.mxu0 %v369_v31  ;;  %v424_v30 = vld [vmem:[%s7679_s1 + $0xf0] sm:$0xff]  ;;  %v5381_v38 = vpack.c.bf16 %v560_v29, %v468_v28  ;;  %v523_v28 = vld [vmem:[%s7679_s1 + $0x408] sm:$0xff]  ;;  %v102_v29 = vld [vmem:[%s7678_s0 + $0x260] sm:$0xff] }
  0xc9   :  { %v516_v31 = vld [vmem:[%s7679_s1 + $0x3d0] sm:$0xff] }
  0xca   :  { %1619 = vmatmul.mubr.f32.gmra.mrb[6].mxu1 %v324_v32  ;;  %v471_v32 = vld [vmem:[%s7679_s1 + $0x268] sm:$0xff]  ;;  %v5293_v41 = vpack.c.bf16 %v516_v31, %v424_v30 }
  0xcb   :  { %3489 = vmatmul.mubr.f32.gmra.mrb[6].mxu0 %v368_v33  ;;  %1688 = vmatprep.mubr.f32.mxu1 %v51_v34  ;;  %v563_v33 = vld [vmem:[%s7679_s1 + $0x548] sm:$0xff]  ;;  %v54_v34 = vld [vmem:[%s7678_s0 + $0xe0] sm:$0xff] }
  0xcc   :  { %3558 = vmatprep.mubr.f32.mxu0 %v95_v35  ;;  %v427_v35 = vld [vmem:[%s7679_s1 + $0x108] sm:$0xff] }
  0xcd   :  { %v5295_v43 = vpack.c.bf16 %v519_v36, %v427_v35  ;;  %v151_v31 = vld [vmem:[%s7678_s0 + $0x3e8] sm:$0xff]  ;;  %v150_v36 = vld [vmem:[%s7678_s0 + $0x3e0] sm:$0xff] }
  0xce   :  { %1689 = vmatmul.mubr.f32.vlgmr.msra.gmra.mrb[0].mxu1 %v50_v42  ;;  %v5383_v42 = vpack.c.bf16 %v563_v33, %v471_v32  ;;  %v195_v32 = vld [vmem:[%s7678_s0 + $0x548] sm:$0xff] }
  0xcf   :  { %3559 = vmatmul.mubr.f32.vlgmr.msra.gmra.mrb[0].mxu0 %v94_v45  ;;  %1693 = vmatprep.mubr.f32.mxu1 %v143_v47  ;;  %v190_v45 = vld [vmem:[%s7678_s0 + $0x520] sm:$0xff]  ;;  %v283_v47 = vld [vmem:[%s7678_s0 + $0x808] sm:$0xff] }
  0xd0   :  { %5374 = vmatpush1.bf16.xpose.msra.mxu0 %v5373_v46  ;;  %3563 = vmatprep.mubr.f32.mxu0 %v187_v48  ;;  %v239_v46 = vld [vmem:[%s7678_s0 + $0x6a8] sm:$0xff]  ;;  %v238_v48 = vld [vmem:[%s7678_s0 + $0x6a0] sm:$0xff] }
  0xd1   :  { %5286 = vmatpush1.bf16.xpose.msra.mxu1 %v5285_v49  ;;  %5376 = vmatprep.subr.bf16.mxu0 %v5375_v50  ;;  %v282_v49 = vld [vmem:[%s7678_s0 + $0x800] sm:$0xff]  ;;  %v331_v50 = vld [vmem:[%s7678_s0 + $0x988] sm:$0xff] }
  0xd2   :  { %1694 = vmatmul.mubr.f32.gmra.mrb[2].mxu1 %v142_v52  ;;  %5288 = vmatprep.subr.bf16.mxu1 %v5287_v51  ;;  %v375_v51 = vld [vmem:[%s7678_s0 + $0xae8] sm:$0xff]  ;;  %v330_v52 = vld [vmem:[%s7678_s0 + $0x980] sm:$0xff] }
  0xd3   :  { %3564 = vmatmul.mubr.f32.gmra.mrb[2].mxu0 %v186_v53  ;;  %1698 = vmatprep.mubr.f32.mxu1 %v235_v54  ;;  %v374_v53 = vld [vmem:[%s7678_s0 + $0xae0] sm:$0xff]  ;;  %v57_v54 = vld [vmem:[%s7678_s0 + $0xf8] sm:$0xff] }
  0xd4   :  { %3568 = vmatprep.mubr.f32.mxu0 %v279_v55  ;;  %v101_v55 = vld [vmem:[%s7678_s0 + $0x258] sm:$0xff] }
  0xd6   :  { %1699 = vmatmul.mubr.f32.gmra.mrb[4].mxu1 %v234_v56  ;;  %v470_v56 = vld [vmem:[%s7679_s1 + $0x260] sm:$0xff] }
  0xd7   :  { %3569 = vmatmul.mubr.f32.gmra.mrb[4].mxu0 %v278_v57  ;;  %1703 = vmatprep.mubr.f32.mxu1 %v327_v58  ;;  %v562_v57 = vld [vmem:[%s7679_s1 + $0x540] sm:$0xff] }
  0xd8   :  { %3573 = vmatprep.mubr.f32.mxu0 %v371_v59  ;;  %v426_v58 = vld [vmem:[%s7679_s1 + $0x100] sm:$0xff]  ;;  %v5385_v2 = vpack.c.bf16 %v562_v57, %v470_v56  ;;  %v525_v56 = vld [vmem:[%s7679_s1 + $0x418] sm:$0xff]  ;;  %v104_v57 = vld [vmem:[%s7678_s0 + $0x270] sm:$0xff] }
  0xd9   :  { %v518_v59 = vld [vmem:[%s7679_s1 + $0x3e0] sm:$0xff] }
  0xda   :  { %1704 = vmatmul.mubr.f32.gmra.mrb[6].mxu1 %v326_v60  ;;  %v473_v60 = vld [vmem:[%s7679_s1 + $0x278] sm:$0xff]  ;;  %v5297_v5 = vpack.c.bf16 %v518_v59, %v426_v58 }
  0xdb   :  { %3574 = vmatmul.mubr.f32.gmra.mrb[6].mxu0 %v370_v61  ;;  %1773 = vmatprep.mubr.f32.mxu1 %v53_v62  ;;  %v565_v61 = vld [vmem:[%s7679_s1 + $0x558] sm:$0xff]  ;;  %v56_v62 = vld [vmem:[%s7678_s0 + $0xf0] sm:$0xff] }
  0xdc   :  { %3643 = vmatprep.mubr.f32.mxu0 %v97_v63  ;;  %v429_v63 = vld [vmem:[%s7679_s1 + $0x118] sm:$0xff] }
  0xdd   :  { %v5299_v7 = vpack.c.bf16 %v521_v0, %v429_v63  ;;  %v153_v59 = vld [vmem:[%s7678_s0 + $0x3f8] sm:$0xff]  ;;  %v152_v0 = vld [vmem:[%s7678_s0 + $0x3f0] sm:$0xff] }
  0xde   :  { %1774 = vmatmul.mubr.f32.vlgmr.msra.gmra.mrb[0].mxu1 %v52_v6  ;;  %v5387_v6 = vpack.c.bf16 %v565_v61, %v473_v60  ;;  %v197_v60 = vld [vmem:[%s7678_s0 + $0x558] sm:$0xff] }
  0xdf   :  { %3644 = vmatmul.mubr.f32.vlgmr.msra.gmra.mrb[0].mxu0 %v96_v9  ;;  %1778 = vmatprep.mubr.f32.mxu1 %v145_v11  ;;  %v192_v9 = vld [vmem:[%s7678_s0 + $0x530] sm:$0xff]  ;;  %v285_v11 = vld [vmem:[%s7678_s0 + $0x818] sm:$0xff] }
  0xe0   :  { %5378 = vmatpush1.bf16.xpose.msra.mxu0 %v5377_v10  ;;  %3648 = vmatprep.mubr.f32.mxu0 %v189_v12  ;;  %v241_v10 = vld [vmem:[%s7678_s0 + $0x6b8] sm:$0xff]  ;;  %v240_v12 = vld [vmem:[%s7678_s0 + $0x6b0] sm:$0xff] }
  0xe1   :  { %5290 = vmatpush1.bf16.xpose.msra.mxu1 %v5289_v13  ;;  %5380 = vmatprep.subr.bf16.mxu0 %v5379_v14  ;;  %v284_v13 = vld [vmem:[%s7678_s0 + $0x810] sm:$0xff]  ;;  %v333_v14 = vld [vmem:[%s7678_s0 + $0x998] sm:$0xff] }
  0xe2   :  { %1779 = vmatmul.mubr.f32.gmra.mrb[2].mxu1 %v144_v16  ;;  %5292 = vmatprep.subr.bf16.mxu1 %v5291_v15  ;;  %v377_v15 = vld [vmem:[%s7678_s0 + $0xaf8] sm:$0xff]  ;;  %v332_v16 = vld [vmem:[%s7678_s0 + $0x990] sm:$0xff] }
  0xe3   :  { %3649 = vmatmul.mubr.f32.gmra.mrb[2].mxu0 %v188_v17  ;;  %1783 = vmatprep.mubr.f32.mxu1 %v237_v18  ;;  %v376_v17 = vld [vmem:[%s7678_s0 + $0xaf0] sm:$0xff]  ;;  %v59_v18 = vld [vmem:[%s7678_s0 + $0x108] sm:$0xff] }
  0xe4   :  { %3653 = vmatprep.mubr.f32.mxu0 %v281_v19  ;;  %v103_v19 = vld [vmem:[%s7678_s0 + $0x268] sm:$0xff] }
  0xe6   :  { %1784 = vmatmul.mubr.f32.gmra.mrb[4].mxu1 %v236_v20  ;;  %v472_v20 = vld [vmem:[%s7679_s1 + $0x270] sm:$0xff] }
  0xe7   :  { %3654 = vmatmul.mubr.f32.gmra.mrb[4].mxu0 %v280_v21  ;;  %1788 = vmatprep.mubr.f32.mxu1 %v329_v22  ;;  %v564_v21 = vld [vmem:[%s7679_s1 + $0x550] sm:$0xff] }
  0xe8   :  { %3658 = vmatprep.mubr.f32.mxu0 %v373_v23  ;;  %v428_v22 = vld [vmem:[%s7679_s1 + $0x110] sm:$0xff]  ;;  %v5389_v30 = vpack.c.bf16 %v564_v21, %v472_v20  ;;  %v527_v20 = vld [vmem:[%s7679_s1 + $0x428] sm:$0xff]  ;;  %v106_v21 = vld [vmem:[%s7678_s0 + $0x280] sm:$0xff] }
  0xe9   :  { %v520_v23 = vld [vmem:[%s7679_s1 + $0x3f0] sm:$0xff] }
  0xea   :  { %1789 = vmatmul.mubr.f32.gmra.mrb[6].mxu1 %v328_v24  ;;  %v475_v24 = vld [vmem:[%s7679_s1 + $0x288] sm:$0xff]  ;;  %v5301_v33 = vpack.c.bf16 %v520_v23, %v428_v22 }
  0xeb   :  { %3659 = vmatmul.mubr.f32.gmra.mrb[6].mxu0 %v372_v25  ;;  %1858 = vmatprep.mubr.f32.mxu1 %v55_v26  ;;  %v567_v25 = vld [vmem:[%s7679_s1 + $0x568] sm:$0xff]  ;;  %v58_v26 = vld [vmem:[%s7678_s0 + $0x100] sm:$0xff] }
  0xec   :  { %3728 = vmatprep.mubr.f32.mxu0 %v99_v27  ;;  %v431_v27 = vld [vmem:[%s7679_s1 + $0x128] sm:$0xff] }
  0xed   :  { %v5303_v35 = vpack.c.bf16 %v523_v28, %v431_v27  ;;  %v155_v23 = vld [vmem:[%s7678_s0 + $0x408] sm:$0xff]  ;;  %v154_v28 = vld [vmem:[%s7678_s0 + $0x400] sm:$0xff] }
  0xee   :  { %1859 = vmatmul.mubr.f32.vlgmr.msra.gmra.mrb[0].mxu1 %v54_v34  ;;  %v5391_v34 = vpack.c.bf16 %v567_v25, %v475_v24  ;;  %v199_v24 = vld [vmem:[%s7678_s0 + $0x568] sm:$0xff] }
  0xef   :  { %3729 = vmatmul.mubr.f32.vlgmr.msra.gmra.mrb[0].mxu0 %v98_v37  ;;  %1863 = vmatprep.mubr.f32.mxu1 %v147_v39  ;;  %v194_v37 = vld [vmem:[%s7678_s0 + $0x540] sm:$0xff]  ;;  %v287_v39 = vld [vmem:[%s7678_s0 + $0x828] sm:$0xff] }
  0xf0   :  { %5382 = vmatpush1.bf16.xpose.msra.mxu0 %v5381_v38  ;;  %3733 = vmatprep.mubr.f32.mxu0 %v191_v40  ;;  %v243_v38 = vld [vmem:[%s7678_s0 + $0x6c8] sm:$0xff]  ;;  %v242_v40 = vld [vmem:[%s7678_s0 + $0x6c0] sm:$0xff] }
  0xf1   :  { %5294 = vmatpush1.bf16.xpose.msra.mxu1 %v5293_v41  ;;  %5384 = vmatprep.subr.bf16.mxu0 %v5383_v42  ;;  %v286_v41 = vld [vmem:[%s7678_s0 + $0x820] sm:$0xff]  ;;  %v335_v42 = vld [vmem:[%s7678_s0 + $0x9a8] sm:$0xff] }
  0xf2   :  { %1864 = vmatmul.mubr.f32.gmra.mrb[2].mxu1 %v146_v44  ;;  %5296 = vmatprep.subr.bf16.mxu1 %v5295_v43  ;;  %v379_v43 = vld [vmem:[%s7678_s0 + $0xb08] sm:$0xff]  ;;  %v334_v44 = vld [vmem:[%s7678_s0 + $0x9a0] sm:$0xff] }
  0xf3   :  { %3734 = vmatmul.mubr.f32.gmra.mrb[2].mxu0 %v190_v45  ;;  %1868 = vmatprep.mubr.f32.mxu1 %v239_v46  ;;  %v378_v45 = vld [vmem:[%s7678_s0 + $0xb00] sm:$0xff]  ;;  %v61_v46 = vld [vmem:[%s7678_s0 + $0x118] sm:$0xff] }
  0xf4   :  { %3738 = vmatprep.mubr.f32.mxu0 %v283_v47  ;;  %v105_v47 = vld [vmem:[%s7678_s0 + $0x278] sm:$0xff] }
  0xf6   :  { %1869 = vmatmul.mubr.f32.gmra.mrb[4].mxu1 %v238_v48  ;;  %v474_v48 = vld [vmem:[%s7679_s1 + $0x280] sm:$0xff] }
  0xf7   :  { %3739 = vmatmul.mubr.f32.gmra.mrb[4].mxu0 %v282_v49  ;;  %1873 = vmatprep.mubr.f32.mxu1 %v331_v50  ;;  %v566_v49 = vld [vmem:[%s7679_s1 + $0x560] sm:$0xff] }
  0xf8   :  { %3743 = vmatprep.mubr.f32.mxu0 %v375_v51  ;;  %v430_v50 = vld [vmem:[%s7679_s1 + $0x120] sm:$0xff]  ;;  %v5393_v58 = vpack.c.bf16 %v566_v49, %v474_v48  ;;  %v529_v48 = vld [vmem:[%s7679_s1 + $0x438] sm:$0xff]  ;;  %v108_v49 = vld [vmem:[%s7678_s0 + $0x290] sm:$0xff] }
  0xf9   :  { %v522_v51 = vld [vmem:[%s7679_s1 + $0x400] sm:$0xff] }
  0xfa   :  { %1874 = vmatmul.mubr.f32.gmra.mrb[6].mxu1 %v330_v52  ;;  %v477_v52 = vld [vmem:[%s7679_s1 + $0x298] sm:$0xff]  ;;  %v5305_v61 = vpack.c.bf16 %v522_v51, %v430_v50 }
  0xfb   :  { %3744 = vmatmul.mubr.f32.gmra.mrb[6].mxu0 %v374_v53  ;;  %1943 = vmatprep.mubr.f32.mxu1 %v57_v54  ;;  %v569_v53 = vld [vmem:[%s7679_s1 + $0x578] sm:$0xff]  ;;  %v60_v54 = vld [vmem:[%s7678_s0 + $0x110] sm:$0xff] }
  0xfc   :  { %3813 = vmatprep.mubr.f32.mxu0 %v101_v55  ;;  %v433_v55 = vld [vmem:[%s7679_s1 + $0x138] sm:$0xff] }
  0xfd   :  { %v5307_v63 = vpack.c.bf16 %v525_v56, %v433_v55  ;;  %v157_v51 = vld [vmem:[%s7678_s0 + $0x418] sm:$0xff]  ;;  %v156_v56 = vld [vmem:[%s7678_s0 + $0x410] sm:$0xff] }
  0xfe   :  { %1944 = vmatmul.mubr.f32.vlgmr.msra.gmra.mrb[0].mxu1 %v56_v62  ;;  %v5395_v62 = vpack.c.bf16 %v569_v53, %v477_v52  ;;  %v201_v52 = vld [vmem:[%s7678_s0 + $0x578] sm:$0xff] }
  0xff   :  { %3814 = vmatmul.mubr.f32.vlgmr.msra.gmra.mrb[0].mxu0 %v100_v1  ;;  %1948 = vmatprep.mubr.f32.mxu1 %v149_v3  ;;  %v196_v1 = vld [vmem:[%s7678_s0 + $0x550] sm:$0xff]  ;;  %v289_v3 = vld [vmem:[%s7678_s0 + $0x838] sm:$0xff] }
 0x100   :  { %5386 = vmatpush1.bf16.xpose.msra.mxu0 %v5385_v2  ;;  %3818 = vmatprep.mubr.f32.mxu0 %v193_v4  ;;  %v245_v2 = vld [vmem:[%s7678_s0 + $0x6d8] sm:$0xff]  ;;  %v244_v4 = vld [vmem:[%s7678_s0 + $0x6d0] sm:$0xff] }
 0x101   :  { %5298 = vmatpush1.bf16.xpose.msra.mxu1 %v5297_v5  ;;  %5388 = vmatprep.subr.bf16.mxu0 %v5387_v6  ;;  %v288_v5 = vld [vmem:[%s7678_s0 + $0x830] sm:$0xff]  ;;  %v337_v6 = vld [vmem:[%s7678_s0 + $0x9b8] sm:$0xff] }
 0x102   :  { %1949 = vmatmul.mubr.f32.gmra.mrb[2].mxu1 %v148_v8  ;;  %5300 = vmatprep.subr.bf16.mxu1 %v5299_v7  ;;  %v381_v7 = vld [vmem:[%s7678_s0 + $0xb18] sm:$0xff]  ;;  %v336_v8 = vld [vmem:[%s7678_s0 + $0x9b0] sm:$0xff] }
 0x103   :  { %3819 = vmatmul.mubr.f32.gmra.mrb[2].mxu0 %v192_v9  ;;  %1953 = vmatprep.mubr.f32.mxu1 %v241_v10  ;;  %v380_v9 = vld [vmem:[%s7678_s0 + $0xb10] sm:$0xff]  ;;  %v63_v10 = vld [vmem:[%s7678_s0 + $0x128] sm:$0xff] }
 0x104   :  { %3823 = vmatprep.mubr.f32.mxu0 %v285_v11  ;;  %v107_v11 = vld [vmem:[%s7678_s0 + $0x288] sm:$0xff] }
 0x106   :  { %1954 = vmatmul.mubr.f32.gmra.mrb[4].mxu1 %v240_v12  ;;  %v476_v12 = vld [vmem:[%s7679_s1 + $0x290] sm:$0xff] }
 0x107   :  { %3824 = vmatmul.mubr.f32.gmra.mrb[4].mxu0 %v284_v13  ;;  %1958 = vmatprep.mubr.f32.mxu1 %v333_v14  ;;  %v568_v13 = vld [vmem:[%s7679_s1 + $0x570] sm:$0xff] }
 0x108   :  { %3828 = vmatprep.mubr.f32.mxu0 %v377_v15  ;;  %v432_v14 = vld [vmem:[%s7679_s1 + $0x130] sm:$0xff]  ;;  %v5397_v22 = vpack.c.bf16 %v568_v13, %v476_v12  ;;  %v159_v13 = vld [vmem:[%s7678_s0 + $0x428] sm:$0xff] }
 0x109   :  { %v524_v15 = vld [vmem:[%s7679_s1 + $0x410] sm:$0xff] }
 0x10a   :  { %1959 = vmatmul.mubr.f32.gmra.mrb[6].mxu1 %v332_v16  ;;  %v479_v16 = vld [vmem:[%s7679_s1 + $0x2a8] sm:$0xff]  ;;  %v5309_v25 = vpack.c.bf16 %v524_v15, %v432_v14 }
 0x10b   :  { %3829 = vmatmul.mubr.f32.gmra.mrb[6].mxu0 %v376_v17  ;;  %2028 = vmatprep.mubr.f32.mxu1 %v59_v18  ;;  %v571_v17 = vld [vmem:[%s7679_s1 + $0x588] sm:$0xff]  ;;  %v62_v18 = vld [vmem:[%s7678_s0 + $0x120] sm:$0xff] }
 0x10c   :  { %3898 = vmatprep.mubr.f32.mxu0 %v103_v19  ;;  %v435_v19 = vld [vmem:[%s7679_s1 + $0x148] sm:$0xff] }
 0x10d   :  { %v5311_v27 = vpack.c.bf16 %v527_v20, %v435_v19  ;;  %v203_v14 = vld [vmem:[%s7678_s0 + $0x588] sm:$0xff] }
 0x10e   :  { %2029 = vmatmul.mubr.f32.vlgmr.msra.gmra.mrb[0].mxu1 %v58_v26  ;;  %v5399_v26 = vpack.c.bf16 %v571_v17, %v479_v16  ;;  %v158_v17 = vld [vmem:[%s7678_s0 + $0x420] sm:$0xff]  ;;  %v251_v19 = vld [vmem:[%s7678_s0 + $0x708] sm:$0xff] }
 0x10f   :  { %3899 = vmatmul.mubr.f32.vlgmr.msra.gmra.mrb[0].mxu0 %v102_v29  ;;  %2033 = vmatprep.mubr.f32.mxu1 %v151_v31  ;;  %v198_v29 = vld [vmem:[%s7678_s0 + $0x560] sm:$0xff]  ;;  %v291_v31 = vld [vmem:[%s7678_s0 + $0x848] sm:$0xff] }
 0x110   :  { %5390 = vmatpush1.bf16.xpose.msra.mxu0 %v5389_v30  ;;  %3903 = vmatprep.mubr.f32.mxu0 %v195_v32  ;;  %v247_v30 = vld [vmem:[%s7678_s0 + $0x6e8] sm:$0xff]  ;;  %v246_v32 = vld [vmem:[%s7678_s0 + $0x6e0] sm:$0xff] }
 0x111   :  { %5302 = vmatpush1.bf16.xpose.msra.mxu1 %v5301_v33  ;;  %5392 = vmatprep.subr.bf16.mxu0 %v5391_v34  ;;  %v290_v33 = vld [vmem:[%s7678_s0 + $0x840] sm:$0xff]  ;;  %v339_v34 = vld [vmem:[%s7678_s0 + $0x9c8] sm:$0xff] }
 0x112   :  { %2034 = vmatmul.mubr.f32.gmra.mrb[2].mxu1 %v150_v36  ;;  %5304 = vmatprep.subr.bf16.mxu1 %v5303_v35  ;;  %v383_v35 = vld [vmem:[%s7678_s0 + $0xb28] sm:$0xff]  ;;  %v338_v36 = vld [vmem:[%s7678_s0 + $0x9c0] sm:$0xff] }
 0x113   :  { %3904 = vmatmul.mubr.f32.gmra.mrb[2].mxu0 %v194_v37  ;;  %2038 = vmatprep.mubr.f32.mxu1 %v243_v38  ;;  %v382_v37 = vld [vmem:[%s7678_s0 + $0xb20] sm:$0xff]  ;;  %v65_v38 = vld [vmem:[%s7678_s0 + $0x138] sm:$0xff]  ;;  %v295_v20 = vld [vmem:[%s7678_s0 + $0x868] sm:$0xff] }
 0x114   :  { %3908 = vmatprep.mubr.f32.mxu0 %v287_v39  ;;  %v109_v39 = vld [vmem:[%s7678_s0 + $0x298] sm:$0xff] }
 0x116   :  { %2039 = vmatmul.mubr.f32.gmra.mrb[4].mxu1 %v242_v40  ;;  %v478_v40 = vld [vmem:[%s7679_s1 + $0x2a0] sm:$0xff] }
 0x117   :  { %3909 = vmatmul.mubr.f32.gmra.mrb[4].mxu0 %v286_v41  ;;  %2043 = vmatprep.mubr.f32.mxu1 %v335_v42  ;;  %v570_v41 = vld [vmem:[%s7679_s1 + $0x580] sm:$0xff] }
 0x118   :  { %3913 = vmatprep.mubr.f32.mxu0 %v379_v43  ;;  %v434_v42 = vld [vmem:[%s7679_s1 + $0x140] sm:$0xff]  ;;  %v5401_v50 = vpack.c.bf16 %v570_v41, %v478_v40  ;;  %v205_v40 = vld [vmem:[%s7678_s0 + $0x598] sm:$0xff] }
 0x119   :  { %v526_v43 = vld [vmem:[%s7679_s1 + $0x420] sm:$0xff] }
 0x11a   :  { %2044 = vmatmul.mubr.f32.gmra.mrb[6].mxu1 %v334_v44  ;;  %v481_v44 = vld [vmem:[%s7679_s1 + $0x2b8] sm:$0xff]  ;;  %v5313_v53 = vpack.c.bf16 %v526_v43, %v434_v42 }
 0x11b   :  { %3914 = vmatmul.mubr.f32.gmra.mrb[6].mxu0 %v378_v45  ;;  %2113 = vmatprep.mubr.f32.mxu1 %v61_v46  ;;  %v573_v45 = vld [vmem:[%s7679_s1 + $0x598] sm:$0xff]  ;;  %v64_v46 = vld [vmem:[%s7678_s0 + $0x130] sm:$0xff] }
 0x11c   :  { %3983 = vmatprep.mubr.f32.mxu0 %v105_v47  ;;  %v437_v47 = vld [vmem:[%s7679_s1 + $0x158] sm:$0xff] }
 0x11d   :  { %v5315_v55 = vpack.c.bf16 %v529_v48, %v437_v47  ;;  %v297_v47 = vld [vmem:[%s7678_s0 + $0x878] sm:$0xff]  ;;  %v252_v48 = vld [vmem:[%s7678_s0 + $0x710] sm:$0xff] }
 0x11e   :  { %2114 = vmatmul.mubr.f32.vlgmr.msra.gmra.mrb[0].mxu1 %v60_v54  ;;  %v5403_v54 = vpack.c.bf16 %v573_v45, %v481_v44  ;;  %v160_v44 = vld [vmem:[%s7678_s0 + $0x430] sm:$0xff] }
 0x11f   :  { %3984 = vmatmul.mubr.f32.vlgmr.msra.gmra.mrb[0].mxu0 %v104_v57  ;;  %2118 = vmatprep.mubr.f32.mxu1 %v153_v59  ;;  %v200_v57 = vld [vmem:[%s7678_s0 + $0x570] sm:$0xff]  ;;  %v293_v59 = vld [vmem:[%s7678_s0 + $0x858] sm:$0xff] }
 0x120   :  { %5394 = vmatpush1.bf16.xpose.msra.mxu0 %v5393_v58  ;;  %3988 = vmatprep.mubr.f32.mxu0 %v197_v60  ;;  %v249_v58 = vld [vmem:[%s7678_s0 + $0x6f8] sm:$0xff]  ;;  %v248_v60 = vld [vmem:[%s7678_s0 + $0x6f0] sm:$0xff] }
 0x121   :  { %5306 = vmatpush1.bf16.xpose.msra.mxu1 %v5305_v61  ;;  %5396 = vmatprep.subr.bf16.mxu0 %v5395_v62  ;;  %v292_v61 = vld [vmem:[%s7678_s0 + $0x850] sm:$0xff]  ;;  %v341_v62 = vld [vmem:[%s7678_s0 + $0x9d8] sm:$0xff] }
 0x122   :  { %2119 = vmatmul.mubr.f32.gmra.mrb[2].mxu1 %v152_v0  ;;  %5308 = vmatprep.subr.bf16.mxu1 %v5307_v63  ;;  %v385_v63 = vld [vmem:[%s7678_s0 + $0xb38] sm:$0xff]  ;;  %v340_v0 = vld [vmem:[%s7678_s0 + $0x9d0] sm:$0xff] }
 0x123   :  { %3989 = vmatmul.mubr.f32.gmra.mrb[2].mxu0 %v196_v1  ;;  %2123 = vmatprep.mubr.f32.mxu1 %v245_v2  ;;  %v384_v1 = vld [vmem:[%s7678_s0 + $0xb30] sm:$0xff]  ;;  %v67_v2 = vld [vmem:[%s7678_s0 + $0x148] sm:$0xff] }
 0x124   :  { %3993 = vmatprep.mubr.f32.mxu0 %v289_v3  ;;  %v111_v3 = vld [vmem:[%s7678_s0 + $0x2a8] sm:$0xff]  ;;  %v204_v45 = vld [vmem:[%s7678_s0 + $0x590] sm:$0xff] }
 0x126   :  { %2124 = vmatmul.mubr.f32.gmra.mrb[4].mxu1 %v244_v4  ;;  %v480_v4 = vld [vmem:[%s7679_s1 + $0x2b0] sm:$0xff] }
 0x127   :  { %3994 = vmatmul.mubr.f32.gmra.mrb[4].mxu0 %v288_v5  ;;  %2128 = vmatprep.mubr.f32.mxu1 %v337_v6  ;;  %v572_v5 = vld [vmem:[%s7679_s1 + $0x590] sm:$0xff] }
 0x128   :  { %3998 = vmatprep.mubr.f32.mxu0 %v381_v7  ;;  %v436_v6 = vld [vmem:[%s7679_s1 + $0x150] sm:$0xff]  ;;  %v5405_v12 = vpack.c.bf16 %v572_v5, %v480_v4  ;;  %v209_v4 = vld [vmem:[%s7678_s0 + $0x5b8] sm:$0xff] }
 0x129   :  { %v528_v7 = vld [vmem:[%s7679_s1 + $0x430] sm:$0xff] }
 0x12a   :  { %2129 = vmatmul.mubr.f32.gmra.mrb[6].mxu1 %v336_v8  ;;  %v483_v8 = vld [vmem:[%s7679_s1 + $0x2c8] sm:$0xff]  ;;  %v5317_v15 = vpack.c.bf16 %v528_v7, %v436_v6  ;;  %v208_v5 = vld [vmem:[%s7678_s0 + $0x5b0] sm:$0xff]  ;;  %v301_v6 = vld [vmem:[%s7678_s0 + $0x898] sm:$0xff] }
 0x12b   :  { %3999 = vmatmul.mubr.f32.gmra.mrb[6].mxu0 %v380_v9  ;;  %2198 = vmatprep.mubr.f32.mxu1 %v63_v10  ;;  %v575_v9 = vld [vmem:[%s7679_s1 + $0x5a8] sm:$0xff]  ;;  %v66_v10 = vld [vmem:[%s7678_s0 + $0x140] sm:$0xff]  ;;  %v300_v7 = vld [vmem:[%s7678_s0 + $0x890] sm:$0xff] }
 0x12c   :  { %4068 = vmatprep.mubr.f32.mxu0 %v107_v11  ;;  %v110_v11 = vld [vmem:[%s7678_s0 + $0x2a0] sm:$0xff]  ;;  %v5407_v16 = vpack.c.bf16 %v575_v9, %v483_v8  ;;  %v393_v8 = vld [vmem:[%s7678_s0 + $0xb78] sm:$0xff]  ;;  %v392_v9 = vld [vmem:[%s7678_s0 + $0xb70] sm:$0xff] }
 0x12e   :  { %2199 = vmatmul.mubr.f32.vlgmr.msra.gmra.mrb[0].mxu1 %v62_v18  ;;  %v202_v18 = vld [vmem:[%s7678_s0 + $0x580] sm:$0xff] }
 0x12f   :  { %4069 = vmatmul.mubr.f32.vlgmr.msra.gmra.mrb[0].mxu0 %v106_v21  ;;  %2203 = vmatprep.mubr.f32.mxu1 %v155_v23  ;;  %v5822_v21 = vmov 0.0|0.0   ;;  %v294_v23 = vld [vmem:[%s7678_s0 + $0x860] sm:$0xff] }
 0x130   :  { %5398 = vmatpush1.bf16.xpose.msra.mxu0 %v5397_v22  ;;  %4073 = vmatprep.mubr.f32.mxu0 %v199_v24  ;;  %v250_v22 = vld [vmem:[%s7678_s0 + $0x700] sm:$0xff]  ;;  %v343_v24 = vld [vmem:[%s7678_s0 + $0x9e8] sm:$0xff] }
 0x131   :  { %5310 = vmatpush1.bf16.xpose.msra.mxu1 %v5309_v25  ;;  %5400 = vmatprep.subr.bf16.mxu0 %v5399_v26  ;;  %v387_v25 = vld [vmem:[%s7678_s0 + $0xb48] sm:$0xff]  ;;  %v342_v26 = vld [vmem:[%s7678_s0 + $0x9e0] sm:$0xff] }
 0x132   :  { %2204 = vmatmul.mubr.f32.gmra.mrb[2].mxu1 %v154_v28  ;;  %5312 = vmatprep.subr.bf16.mxu1 %v5311_v27  ;;  %v386_v27 = vld [vmem:[%s7678_s0 + $0xb40] sm:$0xff]  ;;  %v69_v28 = vld [vmem:[%s7678_s0 + $0x158] sm:$0xff] }
 0x133   :  { %4074 = vmatmul.mubr.f32.gmra.mrb[2].mxu0 %v198_v29  ;;  %2208 = vmatprep.mubr.f32.mxu1 %v247_v30  ;;  %v113_v29 = vld [vmem:[%s7678_s0 + $0x2b8] sm:$0xff]  ;;  %v482_v30 = vld [vmem:[%s7679_s1 + $0x2c0] sm:$0xff] }
 0x134   :  { %4078 = vmatprep.mubr.f32.mxu0 %v291_v31  ;;  %v574_v31 = vld [vmem:[%s7679_s1 + $0x5a0] sm:$0xff] }
 0x136   :  { %2209 = vmatmul.mubr.f32.gmra.mrb[4].mxu1 %v246_v32  ;;  %v485_v32 = vld [vmem:[%s7679_s1 + $0x2d8] sm:$0xff] }
 0x137   :  { %4079 = vmatmul.mubr.f32.gmra.mrb[4].mxu0 %v290_v33  ;;  %2213 = vmatprep.mubr.f32.mxu1 %v339_v34  ;;  %v577_v33 = vld [vmem:[%s7679_s1 + $0x5b8] sm:$0xff]  ;;  %v4518_v34 = vld [vmem:[%s7680_s2] sm:$0xff] }
 0x138   :  { %4083 = vmatprep.mubr.f32.mxu0 %v383_v35  ;;  %v4519_v35 = vld [vmem:[%s7680_s2 + $0x8] sm:$0xff]  ;;  %v5411_v41 = vpack.c.bf16 %v577_v33, %v485_v32 }
 0x139   :  { %v7447_v42 = vpack.c.bf16 %v4519_v35, %v4518_v34 }
 0x13a   :  { %2214 = vmatmul.mubr.f32.gmra.mrb[6].mxu1 %v338_v36  ;;  %v68_v36 = vld [vmem:[%s7678_s0 + $0x150] sm:$0xff] }
 0x13b   :  { %4084 = vmatmul.mubr.f32.gmra.mrb[6].mxu0 %v382_v37  ;;  %2283 = vmatprep.mubr.f32.mxu1 %v65_v38  ;;  %v112_v37 = vld [vmem:[%s7678_s0 + $0x2b0] sm:$0xff]  ;;  %v5409_v38 = vpack.c.bf16 %v574_v31, %v482_v30 }
 0x13c   :  { %4153 = vmatprep.mubr.f32.mxu0 %v109_v39  ;;  %v161_v39 = vld [vmem:[%s7678_s0 + $0x438] sm:$0xff] }
 0x13e   :  { %2284 = vmatmul.mubr.f32.vlgmr.msra.gmra.mrb[0].mxu1 %v64_v46  ;;  %v253_v46 = vld [vmem:[%s7678_s0 + $0x718] sm:$0xff] }
 0x13f   :  { %4154 = vmatmul.mubr.f32.vlgmr.msra.gmra.mrb[0].mxu0 %v108_v49  ;;  %2288 = vmatprep.mubr.f32.mxu1 %v157_v51  ;;  %v296_v49 = vld [vmem:[%s7678_s0 + $0x870] sm:$0xff]  ;;  %v389_v51 = vld [vmem:[%s7678_s0 + $0xb58] sm:$0xff] }
 0x140   :  { %5402 = vmatpush1.bf16.xpose.msra.mxu0 %v5401_v50  ;;  %4158 = vmatprep.mubr.f32.mxu0 %v201_v52  ;;  %v345_v50 = vld [vmem:[%s7678_s0 + $0x9f8] sm:$0xff]  ;;  %v344_v52 = vld [vmem:[%s7678_s0 + $0x9f0] sm:$0xff] }
 0x141   :  { %5314 = vmatpush1.bf16.xpose.msra.mxu1 %v5313_v53  ;;  %5404 = vmatprep.subr.bf16.mxu0 %v5403_v54  ;;  %v388_v53 = vld [vmem:[%s7678_s0 + $0xb50] sm:$0xff]  ;;  %v115_v54 = vld [vmem:[%s7678_s0 + $0x2c8] sm:$0xff] }
 0x142   :  { %2289 = vmatmul.mubr.f32.gmra.mrb[2].mxu1 %v156_v56  ;;  %5316 = vmatprep.subr.bf16.mxu1 %v5315_v55  ;;  %v484_v55 = vld [vmem:[%s7679_s1 + $0x2d0] sm:$0xff] }
 0x143   :  { %4159 = vmatmul.mubr.f32.gmra.mrb[2].mxu0 %v200_v57  ;;  %2293 = vmatprep.mubr.f32.mxu1 %v249_v58  ;;  %v576_v56 = vld [vmem:[%s7679_s1 + $0x5b0] sm:$0xff]  ;;  %v5824_v57 = vmov 0.0   ;;  %v114_v58 = vld [vmem:[%s7678_s0 + $0x2c0] sm:$0xff] }
 0x144   :  { %4163 = vmatprep.mubr.f32.mxu0 %v293_v59  ;;  %v5414_v59 = vpack.c.bf16 %v576_v56, %v484_v55 }
 0x146   :  { %2294 = vmatmul.mubr.f32.gmra.mrb[4].mxu1 %v248_v60  ;;  %v207_v60 = vld [vmem:[%s7678_s0 + $0x5a8] sm:$0xff] }
 0x147   :  { %4164 = vmatmul.mubr.f32.gmra.mrb[4].mxu0 %v292_v61  ;;  %2298 = vmatprep.mubr.f32.mxu1 %v341_v62  ;;  %v206_v61 = vld [vmem:[%s7678_s0 + $0x5a0] sm:$0xff]  ;;  %v299_v62 = vld [vmem:[%s7678_s0 + $0x888] sm:$0xff] }
 0x148   :  { %4168 = vmatprep.mubr.f32.mxu0 %v385_v63  ;;  %v298_v63 = vld [vmem:[%s7678_s0 + $0x880] sm:$0xff] }
 0x14a   :  { %2299 = vmatmul.mubr.f32.gmra.mrb[6].mxu1 %v340_v0  ;;  %v391_v0 = vld [vmem:[%s7678_s0 + $0xb68] sm:$0xff] }
 0x14b   :  { %4169 = vmatmul.mubr.f32.gmra.mrb[6].mxu0 %v384_v1  ;;  %2368 = vmatprep.mubr.f32.mxu1 %v67_v2  ;;  %v390_v1 = vld [vmem:[%s7678_s0 + $0xb60] sm:$0xff]  ;;  %v117_v2 = vld [vmem:[%s7678_s0 + $0x2d8] sm:$0xff] }
 0x14c   :  { %4238 = vmatprep.mubr.f32.mxu0 %v111_v3  ;;  %v116_v3 = vld [vmem:[%s7678_s0 + $0x2d0] sm:$0xff] }
 0x14e   :  { %2369 = vmatmul.mubr.f32.vlgmr.msra.gmra.mrb[0].mxu1 %v66_v10 }
 0x14f   :  { %4239 = vmatmul.mubr.f32.vlgmr.msra.gmra.mrb[0].mxu0 %v110_v11  ;;  %2373 = vmatprep.mubr.f32.mxu1 %v159_v13 }
 0x150   :  { %5406 = vmatpush1.bf16.xpose.msra.mxu0 %v5405_v12  ;;  %4243 = vmatprep.mubr.f32.mxu0 %v203_v14 }
 0x151   :  { %5318 = vmatpush1.bf16.xpose.msra.mxu1 %v5317_v15  ;;  %5408 = vmatprep.subr.bf16.mxu0 %v5407_v16 }
 0x152   :  { %2374 = vmatmul.mubr.f32.gmra.mrb[2].mxu1 %v158_v17  ;;  %5416 = vmatprep.subr.bf16.mxu1 %v5822_v21 }
 0x153   :  { %4244 = vmatmul.mubr.f32.gmra.mrb[2].mxu0 %v202_v18  ;;  %2378 = vmatprep.mubr.f32.mxu1 %v251_v19 }
 0x154   :  { %4248 = vmatprep.mubr.f32.mxu0 %v295_v20  ;;  %v5154_v20 = vld [vmem:[%s7681_s3] ss:$0 sm:$0xff] }
 0x156   :  { %2379 = vmatmul.mubr.f32.gmra.mrb[4].mxu1 %v250_v22 }
 0x157   :  { %4249 = vmatmul.mubr.f32.gmra.mrb[4].mxu0 %v294_v23  ;;  %2383 = vmatprep.mubr.f32.mxu1 %v343_v24 }
 0x158   :  { %4253 = vmatprep.mubr.f32.mxu0 %v387_v25 }
 0x15a   :  { %2384 = vmatmul.mubr.f32.gmra.mrb[6].mxu1 %v342_v26 }
 0x15b   :  { %4254 = vmatmul.mubr.f32.gmra.mrb[6].mxu0 %v386_v27  ;;  %2453 = vmatprep.mubr.f32.mxu1 %v69_v28 }
 0x15c   :  { %4323 = vmatprep.mubr.f32.mxu0 %v113_v29 }
 0x15e   :  { %2454 = vmatmul.mubr.f32.vlgmr.msra.gmra.mrb[0].mxu1 %v68_v36 }
 0x15f   :  { %4324 = vmatmul.mubr.f32.vlgmr.msra.gmra.mrb[0].mxu0 %v112_v37  ;;  %2458 = vmatprep.mubr.f32.mxu1 %v161_v39 }
 0x160   :  { %5410 = vmatpush1.bf16.xpose.msra.mxu0 %v5409_v38  ;;  %4328 = vmatprep.mubr.f32.mxu0 %v205_v40 }
 0x161   :  { %5413 = vmatprep.subr.msk.bf16.mxu0 %vm7451_vm1, %v5411_v41  ;;  %5419 = vmatpush3.bf16.xpose.msk.msra.mxu1 %vm7451_vm1, %v7447_v42 }
 0x162   :  { %2459 = vmatmul.mubr.f32.gmra.mrb[2].mxu1 %v160_v44  ;;  %5420 = vmatprep.subr.bf16.mxu1 %v5822_v21 }
 0x163   :  { %4329 = vmatmul.mubr.f32.gmra.mrb[2].mxu0 %v204_v45  ;;  %2463 = vmatprep.mubr.f32.mxu1 %v253_v46 }
 0x164   :  { %4333 = vmatprep.mubr.f32.mxu0 %v297_v47 }
 0x166   :  { %2464 = vmatmul.mubr.f32.gmra.mrb[4].mxu1 %v252_v48 }
 0x167   :  { %4334 = vmatmul.mubr.f32.gmra.mrb[4].mxu0 %v296_v49  ;;  %2468 = vmatprep.mubr.f32.mxu1 %v345_v50 }
 0x168   :  { %4338 = vmatprep.mubr.f32.mxu0 %v389_v51 }
 0x16a   :  { %2469 = vmatmul.mubr.f32.gmra.mrb[6].mxu1 %v344_v52 }
 0x16b   :  { %4339 = vmatmul.mubr.f32.gmra.mrb[6].mxu0 %v388_v53  ;;  %5199 = vmatprep.mubr.msk.f32.mxu1 %vm5823_vm2, %v5824_v57 }
 0x16c   :  { %4408 = vmatprep.mubr.f32.mxu0 %v115_v54 }
 0x16e   :  { %5200 = vmatmul.mubr.f32.vlgmr.msra.gmra.mrb[8].mxu1 %v5824_v57 }
 0x16f   :  { %4409 = vmatmul.mubr.f32.vlgmr.msra.gmra.mrb[0].mxu0 %v114_v58  ;;  %5423 = vmatpush3.bf16.xpose.msk.msra.mxu1 %vm7451_vm1, %v7447_v42 }
 0x170   :  { %5415 = vmatpush1.bf16.xpose.msra.mxu0 %v5414_v59  ;;  %4413 = vmatprep.mubr.f32.mxu0 %v207_v60 }
 0x171   :  { %5206 = vmatprep.mubr.msk.f32.mxu1 %vm5823_vm2, %v5824_v57  ;;  %5424 = vmatprep.subr.bf16.mxu1 %v5822_v21 }
 0x173   :  { %4414 = vmatmul.mubr.f32.gmra.mrb[2].mxu0 %v206_v61 }
 0x174   :  { %4418 = vmatprep.mubr.f32.mxu0 %v299_v62 }
 0x177   :  { %4419 = vmatmul.mubr.f32.gmra.mrb[4].mxu0 %v298_v63 }
 0x178   :  { %4423 = vmatprep.mubr.f32.mxu0 %v391_v0 }
 0x17b   :  { %4424 = vmatmul.mubr.f32.gmra.mrb[6].mxu0 %v390_v1 }
 0x17c   :  { %5157 = vmatprep.mubr.msk.f32.mxu0 %vm585_vm0, %v117_v2 }
 0x17f   :  { %4494 = vmatmul.mubr.f32.vlgmr.msra.gmra.mrb[0].mxu0 %v116_v3 }
 0x180   :  { %5158 = vmatprep.mubr.msk.f32.mxu0 %vm585_vm0, %v209_v4 }
 0x183   :  { %4499 = vmatmul.mubr.f32.gmra.mrb[2].mxu0 %v208_v5 }
 0x184   :  { %5159 = vmatprep.mubr.msk.f32.mxu0 %vm585_vm0, %v301_v6 }
 0x187   :  { %4504 = vmatmul.mubr.f32.gmra.mrb[4].mxu0 %v300_v7 }
 0x188   :  { %5160 = vmatprep.mubr.msk.f32.mxu0 %vm585_vm0, %v393_v8 }
 0x18b   :  { %4509 = vmatmul.mubr.f32.gmra.mrb[6].mxu0 %v392_v9 }
 0x231   :  { %v2455_v10 = vpop.f32.mrb[0].mxu1 }
 0x232   :  { %v2457_v11 = vpop.f32.mrb[1].mxu1  ;;  %v5432_v22 = vadd.f32 %v5154_v20, %v2455_v10 }
 0x235   :  { %v2460_v12 = vpop.f32.mrb[2].mxu1 }
 0x236   :  { %v2462_v13 = vpop.f32.mrb[3].mxu1  ;;  %v5434_v26 = vadd.f32 %v5154_v20, %v2460_v12 }
 0x239   :  { %v2465_v14 = vpop.f32.mrb[4].mxu1 }
 0x23a   :  { %v2467_v15 = vpop.f32.mrb[5].mxu1  ;;  %v5436_v30 = vadd.f32 %v5154_v20, %v2465_v14 }
 0x23d   :  { %v2470_v16 = vpop.f32.mrb[6].mxu1 }
 0x23e   :  { %v2472_v17 = vpop.f32.mrb[7].mxu1  ;;  %v5438_v35 = vadd.f32 %v5154_v20, %v2470_v16 }
 0x241   :  { %v7558_v18 = vpop.f32.mrb[8].mxu1 }
 0x242   :  { %v5201_v19 = vpop.f32.mrb[9].mxu1 }
 0x252   :  { %v4495_v23 = vpop.f32.mrb[0].mxu0 }
 0x253   :  { %v5433_v24 = vadd.f32 %v5432_v22, %v4495_v23  ;;  %v4497_v25 = vpop.f32.mrb[1].mxu0 }
 0x255   :  { %4514 = vst.msk [vmem:[#allocation2] sm:$0xff] %vm585_vm0, %v5433_v24 }
 0x256   :  { %v4500_v27 = vpop.f32.mrb[2].mxu0 }
 0x257   :  { %v5435_v28 = vadd.f32 %v5434_v26, %v4500_v27  ;;  %v4502_v29 = vpop.f32.mrb[3].mxu0 }
 0x259   :  { %4515 = vst.msk [vmem:[#allocation2 + $0x8] sm:$0xff] %vm585_vm0, %v5435_v28 }
 0x25a   :  { %v4505_v31 = vpop.f32.mrb[4].mxu0 }
 0x25b   :  { %v5437_v32 = vadd.f32 %v5436_v30, %v4505_v31  ;;  %v4507_v33 = vpop.f32.mrb[5].mxu0 }
 0x25c   :  { %v4521_v34 = vld [vmem:[#allocation2 + $0x4] sm:$0x1]  ;;  %v4661_v36 = vld [vmem:[#allocation2 + $0x5] sm:$0x1]  ;;  %v4780_v40 = vld [vmem:[#allocation2 + $0x6] sm:$0x1] }
 0x25d   :  { %4516 = vst.msk [vmem:[#allocation2 + $0x10] sm:$0xff] %vm585_vm0, %v5437_v32  ;;  %v4529_v38 = vrot.slane %v4521_v34, 7  ;;  %v4669_v39 = vrot.slane %v4661_v36, 7  ;;  %v4520_v45 = vld [vmem:[#allocation2] sm:$0x1]  ;;  %v4788_v47 = vrot.slane %v4780_v40, 7 }
 0x25e   :  { %v4510_v37 = vpop.f32.mrb[6].mxu0  ;;  %v4660_v46 = vld [vmem:[#allocation2 + $0x1] sm:$0x1]  ;;  %v4899_v48 = vld [vmem:[#allocation2 + $0x7] sm:$0x1] }
 0x25f   :  { %v5439_v41 = vadd.f32 %v5438_v35, %v4510_v37  ;;  %v4512_v44 = vpop.f32.mrb[7].mxu0  ;;  %v4779_v56 = vld [vmem:[#allocation2 + $0x2] sm:$0x1]  ;;  %v4550_v58 = vsel %vm4549_vm3, %v4520_v45, %v4529_v38  ;;  %v4689_v60 = vsel %vm4549_vm3, %v4660_v46, %v4669_v39  ;;  %v4907_v63 = vrot.slane %v4899_v48, 7  ;;  %v4898_v4 = vld [vmem:[#allocation2 + $0x3] sm:$0x1] }
 0x260   :  { %v4522_v49 = vld [vmem:[#allocation2 + $0x8] sm:$0x1]  ;;  %v4523_v50 = vld [vmem:[#allocation2 + $0xc] sm:$0x1]  ;;  %v4662_v51 = vld [vmem:[#allocation2 + $0x9] sm:$0x1]  ;;  %v4808_v11 = vsel %vm4549_vm3, %v4779_v56, %v4788_v47 }
 0x261   :  { %4517 = vst.msk [vmem:[#allocation2 + $0x18] sm:$0xff] %vm585_vm0, %v5439_v41  ;;  %v4532_v52 = vrot.slane %v4522_v49, 6  ;;  %v4535_v53 = vrot.slane %v4523_v50, 5  ;;  %v4663_v54 = vld [vmem:[#allocation2 + $0xd] sm:$0x1]  ;;  %v4672_v55 = vrot.slane %v4662_v51, 6  ;;  %v4927_v25 = vsel %vm4549_vm3, %v4898_v4, %v4907_v63 }
 0x262   :  { %v4675_v59 = vrot.slane %v4663_v54, 5  ;;  %v4781_v61 = vld [vmem:[#allocation2 + $0xa] sm:$0x1]  ;;  %v4782_v62 = vld [vmem:[#allocation2 + $0xe] sm:$0x1]  ;;  %vm4656_vm3 = vcmask 129030  }
 0x263   :  { %v4552_v0 = vsel %vm4551_vm4, %v4550_v58, %v4532_v52  ;;  %v4690_v1 = vsel %vm4551_vm4, %v4689_v60, %v4672_v55  ;;  %v4791_v2 = vrot.slane %v4781_v61, 6  ;;  %v4794_v3 = vrot.slane %v4782_v62, 5  ;;  %v4900_v5 = vld [vmem:[#allocation2 + $0xb] sm:$0x1]  ;;  %v4901_v17 = vld [vmem:[#allocation2 + $0xf] sm:$0x1] }
 0x264   :  { %v4524_v6 = vld [vmem:[#allocation2 + $0x10] sm:$0x1]  ;;  %v4525_v7 = vld [vmem:[#allocation2 + $0x14] sm:$0x1]  ;;  %v4554_v8 = vsel %vm4553_vm5, %v4552_v0, %v4535_v53  ;;  %v4664_v9 = vld [vmem:[#allocation2 + $0x11] sm:$0x1]  ;;  %v4691_v10 = vsel %vm4553_vm5, %v4690_v1, %v4675_v59 }
 0x265   :  { %v4538_v12 = vrot.slane %v4524_v6, 4  ;;  %v4541_v13 = vrot.slane %v4525_v7, 3  ;;  %v4665_v14 = vld [vmem:[#allocation2 + $0x15] sm:$0x1]  ;;  %v4678_v15 = vrot.slane %v4664_v9, 4  ;;  %v4809_v16 = vsel %vm4551_vm4, %v4808_v11, %v4791_v2 }
 0x266   :  { %v4681_v19 = vrot.slane %v4665_v14, 3  ;;  %v4783_v20 = vld [vmem:[#allocation2 + $0x12] sm:$0x1]  ;;  %v4784_v22 = vld [vmem:[#allocation2 + $0x16] sm:$0x1]  ;;  %v4810_v23 = vsel %vm4553_vm5, %v4809_v16, %v4794_v3  ;;  %v4910_v24 = vrot.slane %v4900_v5, 6 }
 0x267   :  { %v4556_v26 = vsel %vm4555_vm6, %v4554_v8, %v4538_v12  ;;  %v4692_v27 = vsel %vm4555_vm6, %v4691_v10, %v4678_v15  ;;  %v4797_v28 = vrot.slane %v4783_v20, 4  ;;  %v4800_v29 = vrot.slane %v4784_v22, 3  ;;  %v4902_v30 = vld [vmem:[#allocation2 + $0x13] sm:$0x1]  ;;  %v4903_v31 = vld [vmem:[#allocation2 + $0x17] sm:$0x1] }
 0x268   :  { %v4526_v32 = vld [vmem:[#allocation2 + $0x18] sm:$0x1]  ;;  %v4527_v33 = vld [vmem:[#allocation2 + $0x1c] sm:$0x1]  ;;  %v4666_v34 = vld [vmem:[#allocation2 + $0x19] sm:$0x1]  ;;  %v4693_v35 = vsel %vm4557_vm7, %v4692_v27, %v4681_v19  ;;  %v4928_v36 = vsel %vm4551_vm4, %v4927_v25, %v4910_v24  ;;  %v4558_v44 = vsel %vm4557_vm7, %v4556_v26, %v4541_v13 }
 0x269   :  { %v4544_v37 = vrot.slane %v4526_v32, 2  ;;  %v4547_v38 = vrot.slane %v4527_v33, 1  ;;  %v4667_v39 = vld [vmem:[#allocation2 + $0x1d] sm:$0x1]  ;;  %v4684_v40 = vrot.slane %v4666_v34, 2  ;;  %v4811_v41 = vsel %vm4555_vm6, %v4810_v23, %v4797_v28 }
 0x26a   :  { %v4687_v45 = vrot.slane %v4667_v39, 1  ;;  %v4785_v46 = vld [vmem:[#allocation2 + $0x1a] sm:$0x1]  ;;  %v4786_v47 = vld [vmem:[#allocation2 + $0x1e] sm:$0x1]  ;;  %v4812_v48 = vsel %vm4557_vm7, %v4811_v41, %v4800_v29  ;;  %v4913_v49 = vrot.slane %v4901_v17, 5 }
 0x26b   :  { %v4560_v50 = vsel %vm4559_vm8, %v4558_v44, %v4544_v37  ;;  %v4694_v51 = vsel %vm4559_vm8, %v4693_v35, %v4684_v40  ;;  %v4803_v52 = vrot.slane %v4785_v46, 2  ;;  %v4806_v53 = vrot.slane %v4786_v47, 1  ;;  %v4904_v54 = vld [vmem:[#allocation2 + $0x1b] sm:$0x1]  ;;  %v4905_v55 = vld [vmem:[#allocation2 + $0x1f] sm:$0x1] }
 0x26c   :  { %v4562_v56 = vsel %vm4561_vm9, %v4560_v50, %v4547_v38  ;;  %v4695_v58 = vsel %vm4561_vm9, %v4694_v51, %v4687_v45  ;;  %v4916_v59 = vrot.slane %v4902_v30, 4  ;;  %v4919_v60 = vrot.slane %v4903_v31, 3 }
 0x26d   :  { %v4642_v61 = vadd.f32 %v7558_v18, %v4562_v56  ;;  %v4813_v62 = vsel %vm4559_vm8, %v4812_v48, %v4803_v52  ;;  %v4922_v63 = vrot.slane %v4904_v54, 2  ;;  %vm4658_vm4 = vcmask 130055  }
 0x26e   :  { %v4814_v0 = vsel %vm4561_vm9, %v4813_v62, %v4806_v53  ;;  %v4925_v1 = vrot.slane %v4905_v55, 1  ;;  %v4929_v2 = vsel %vm4553_vm5, %v4928_v36, %v4913_v49 }
 0x26f   :  { %v4643_v3 = vmax.f32 %v4642_v61, 0.0  ;;  %v4930_v4 = vsel %vm4555_vm6, %v4929_v2, %v4916_v59 }
 0x270   :  { %v4931_v5 = vsel %vm4557_vm7, %v4930_v4, %v4919_v60 }
 0x271   :  { %5207 = vmatmul.mubr.msk.f32.vlgmr.msra.gmra.mrb[10].mxu1 %vm585_vm0, %v4643_v3  ;;  %v4932_v6 = vsel %vm4559_vm8, %v4931_v5, %v4922_v63  ;;  %4645 = vst.msk [vmem:[#allocation3] sm:$0x1] %vm4644_vm10, %v4643_v3 }
 0x272   :  { %4647 = vst.msk [vmem:[#allocation3 + $0x3] sm:$0x2] %vm4646_vm11, %v4643_v3  ;;  %5427 = vmatpush3.bf16.xpose.msk.msra.mxu1 %vm7451_vm1, %v7447_v42  ;;  %5213 = vmatprep.mubr.msk.f32.mxu1 %vm5823_vm2, %v5824_v57  ;;  %v4933_v18 = vsel %vm4561_vm9, %v4932_v6, %v4925_v1 }
 0x273   :  { %4649 = vst.msk [vmem:[#allocation3 + $0x6] sm:$0x4] %vm4648_vm12, %v4643_v3  ;;  %5428 = vmatprep.subr.bf16.mxu1 %v5822_v21 }
 0x274   :  { %4651 = vst.msk [vmem:[#allocation3 + $0x9] sm:$0x8] %vm4650_vm13, %v4643_v3 }
 0x275   :  { %4653 = vst.msk [vmem:[#allocation3 + $0xc] sm:$0x10] %vm4652_vm14, %v4643_v3 }
 0x276   :  { %4655 = vst.msk [vmem:[#allocation3 + $0xf] sm:$0x20] %vm4654_vm15, %v4643_v3 }
 0x277   :  { %4657 = vst.msk [vmem:[#allocation3 + $0x12] sm:$0x40] %vm4656_vm3, %v4643_v3 }
 0x278   :  { %4659 = vst.msk [vmem:[#allocation3 + $0x15] sm:$0x80] %vm4658_vm4, %v4643_v3 }
 0x344   :  { %v4765_v7 = vpop.f32.mrb[10].mxu1 }
 0x345   :  { %v4769_v8 = vadd.f32 %v4765_v7, %v4695_v58  ;;  %v5208_v9 = vpop.f32.mrb[11].mxu1 }
 0x347   :  { %v4770_v10 = vmax.f32 %v4769_v8, 0.0 }
 0x349   :  { %5214 = vmatmul.mubr.msk.f32.vlgmr.msra.gmra.mrb[12].mxu1 %vm585_vm0, %v4770_v10  ;;  %4771 = vst.msk [vmem:[#allocation3 + $0x1] sm:$0x1] %vm4644_vm10, %v4770_v10 }
 0x34a   :  { %4772 = vst.msk [vmem:[#allocation3 + $0x4] sm:$0x2] %vm4646_vm11, %v4770_v10  ;;  %5431 = vmatpush3.bf16.xpose.msk.msra.mxu1 %vm7451_vm1, %v7447_v42  ;;  %5220 = vmatprep.mubr.msk.f32.mxu1 %vm5823_vm2, %v5824_v57  ;;  %v5021_v42 = vld [vmem:[%s7682_s4] sm:$0x3]  ;;  %s5825_s4 = smov [#allocation3]  }
 0x34b   :  { %4773 = vst.msk [vmem:[#allocation3 + $0x7] sm:$0x4] %vm4648_vm12, %v4770_v10  ;;  %5223 = vmatprep.subr.msk.mxu1 %vm585_vm0, %v5021_v42  ;;  %s5139_s25 = sshll.u32 %s5825_s4, 4  ;;  %s5140_s25 = int_to_ptr.vmem [resolvable:$true] %s5139_s25 }
 0x34c   :  { %4774 = vst.msk [vmem:[#allocation3 + $0xa] sm:$0x8] %vm4650_vm13, %v4770_v10  ;;  %s5798_s26 = scalar_lea.vmem %s5140_s25, 512  ;;  %p5803_p1 = scmp.lt.s32.totalorder %s5140_s25, %s5140_s25 }
 0x34d   :  { %4775 = vst.msk [vmem:[#allocation3 + $0xd] sm:$0x10] %vm4652_vm14, %v4770_v10  ;;  %p5799_p0 = scmp.ne.s32.totalorder %s5140_s25, %s5798_s26  ;;  %p5804_p2 = scmp.lt.s32.totalorder %s5798_s26, %s5798_s26 }
 0x34e   :  { %4776 = vst.msk [vmem:[#allocation3 + $0x10] sm:$0x20] %vm4654_vm15, %v4770_v10 }
 0x34f   :  { %4777 = vst.msk [vmem:[#allocation3 + $0x13] sm:$0x40] %vm4656_vm3, %v4770_v10  ;;  %p5805_p3 = por %p5804_p2, %p5803_p1 }
 0x350   :  { %4778 = vst.msk [vmem:[#allocation3 + $0x16] sm:$0x80] %vm4658_vm4, %v4770_v10 }
 0x351   :  { %p5806_p4 = pnand %p5805_p3, %p5799_p0 }
 0x41c   :  { %v4884_v21 = vpop.f32.mrb[12].mxu1 }
 0x41d   :  { %v4888_v11 = vadd.f32 %v4884_v21, %v4814_v0  ;;  %v5215_v12 = vpop.f32.mrb[13].mxu1 }
 0x41f   :  { %v4889_v13 = vmax.f32 %v4888_v11, 0.0 }
 0x421   :  { %5221 = vmatmul.mubr.msk.f32.vlgmr.msra.gmra.mrb[14].mxu1 %vm585_vm0, %v4889_v13  ;;  %4890 = vst.msk [vmem:[#allocation3 + $0x2] sm:$0x1] %vm4644_vm10, %v4889_v13 }
 0x422   :  { %4891 = vst.msk [vmem:[#allocation3 + $0x5] sm:$0x2] %vm4646_vm11, %v4889_v13  ;;  %5224 = vmatpush3.xpose.msk.msra.mxu1 %vm585_vm0, %v5021_v42 }
 0x423   :  { %4892 = vst.msk [vmem:[#allocation3 + $0x8] sm:$0x4] %vm4648_vm12, %v4889_v13 }
 0x424   :  { %4893 = vst.msk [vmem:[#allocation3 + $0xb] sm:$0x8] %vm4650_vm13, %v4889_v13 }
 0x425   :  { %4894 = vst.msk [vmem:[#allocation3 + $0xe] sm:$0x10] %vm4652_vm14, %v4889_v13 }
 0x426   :  { %4895 = vst.msk [vmem:[#allocation3 + $0x11] sm:$0x20] %vm4654_vm15, %v4889_v13 }
 0x427   :  { %4896 = vst.msk [vmem:[#allocation3 + $0x14] sm:$0x40] %vm4656_vm3, %v4889_v13 }
 0x428   :  { %4897 = vst.msk [vmem:[#allocation3 + $0x17] sm:$0x80] %vm4658_vm4, %v4889_v13 }
 0x4f4   :  { %v5003_v43 = vpop.f32.mrb[14].mxu1 }
 0x4f5   :  { %v5007_v57 = vadd.f32 %v5003_v43, %v4933_v18  ;;  %v5222_v14 = vpop.f32.mrb[15].mxu1 }
 0x4f7   :  { %v5008_v15 = vmax.f32 %v5007_v57, 0.0 }
 0x4f9   :  { %5009 = vst.msk [vmem:[#allocation3 + $0x3] sm:$0x1] %vm4644_vm10, %v5008_v15 }
 0x4fa   :  { %5010 = vst.msk [vmem:[#allocation3 + $0x6] sm:$0x2] %vm4646_vm11, %v5008_v15 }
 0x4fb   :  { %5011 = vst.msk [vmem:[#allocation3 + $0x9] sm:$0x4] %vm4648_vm12, %v5008_v15 }
 0x4fc   :  { %5012 = vst.msk [vmem:[#allocation3 + $0xc] sm:$0x8] %vm4650_vm13, %v5008_v15 }
 0x4fd   :  { %5013 = vst.msk [vmem:[#allocation3 + $0xf] sm:$0x10] %vm4652_vm14, %v5008_v15 }
 0x4fe   :  { %5014 = vst.msk [vmem:[#allocation3 + $0x12] sm:$0x20] %vm4654_vm15, %v5008_v15 }
 0x4ff   :  { %5015 = vst.msk [vmem:[#allocation3 + $0x15] sm:$0x40] %vm4656_vm3, %v5008_v15 }
 0x500   :  { %5016 = vst.msk [vmem:[#allocation3 + $0x18] sm:$0x80] %vm4658_vm4, %v5008_v15 }
 0x501   :  { %v5017_v16 = vld [vmem:[#allocation3] sm:$0xff] }
 0x502   :  { %5225 = vmatprep.mubr.msk.f32.mxu1 %vm585_vm0, %v5017_v16 }
 0x503   :  { %v5018_v17 = vld [vmem:[#allocation3 + $0x8] sm:$0xff] }
 0x504   :  { %5226 = vmatmul.mubr.msk.f32.vlgmr.msra.gmra.mrb[16].mxu1 %vm585_vm0, %v5018_v17 }
 0x505   :  { %v5019_v19 = vld [vmem:[#allocation3 + $0x10] sm:$0xff] }
 0x506   :  { %5228 = vmatprep.mubr.msk.f32.mxu1 %vm585_vm0, %v5019_v19 }
 0x507   :  { %v5020_v20 = vld [vmem:[#allocation3 + $0x18] sm:$0xff] }
 0x508   :  { %5229 = vmatmul.mubr.msk.f32.gmra.mrb[18].mxu1 %vm585_vm0, %v5020_v20 }
 0x509   :  { %5809 = shalt.err (!%p5806_p4)
}
 0x50a   :  { %s5810_s29 = scalar_lea.hbm %s7684_s6, 512 }
 0x50b   :  { %p5811_p5 = scmp.ne.s32.totalorder %s7684_s6, %s5810_s29  ;;  %p5814_p6 = scmp.lt.u32.totalorder %s5810_s29, %s7684_s6 }
 0x50d   :  { %p5816_p7 = pnand %p5814_p6, %p5811_p5 }
 0x50f   :  { %5819 = shalt.err (!%p5816_p7)
}
 0x510   :  { %s5826_s11 = smov 128   ;;  %s5827_s12 = smov 8   ;;  %v5172_v22 = vld [vmem:[%s7683_s5] ss:$0 sm:$0xff]  ;;  %vm5129_vm0 = vcmask 15360  }
 0x511   :  { %5145 = dma.vmem_to_hbm [thread:$0]  %s5140_s25, 512, %s7684_s6, [#allocation4], %s5826_s11, %s5826_s11, %s5827_s12  }
 0x5d7   :  { %v5227_v23 = vpop.f32.mrb[16].mxu1 }
 0x5d8   :  { %v5116_v24 = vadd.f32 %v5227_v23, %v5172_v22  ;;  %v5110_v25 = vpop.f32.mrb[17].mxu1 }
 0x5d9   :  { %v5111_v26 = vadd.f32 %v5172_v22, %v5110_v25 }
 0x5da   :  { %5131 = vst.msk [vmem:[%s7685_s7 + $0x8] sm:$0xff] %vm5129_vm0, %v5116_v24 }
 0x5db   :  { %5130 = vst.msk [vmem:[%s7685_s7] sm:$0xff] %vm5129_vm0, %v5111_v26  ;;  %v5230_v27 = vpop.f32.mrb[18].mxu1 }
 0x5dc   :  { %v5126_v28 = vadd.f32 %v5230_v27, %v5172_v22  ;;  %v5120_v29 = vpop.f32.mrb[19].mxu1 }
 0x5dd   :  { %v5121_v30 = vadd.f32 %v5172_v22, %v5120_v29 }
 0x5de   :  { %5133 = vst.msk [vmem:[%s7685_s7 + $0x18] sm:$0xff] %vm5129_vm0, %v5126_v28 }
 0x5df   :  { %5132 = vst.msk [vmem:[%s7685_s7 + $0x10] sm:$0xff] %vm5129_vm0, %v5121_v30 }
 0x5e0   :  { %5820 = dma.done.wait [#allocation4], 512  }
 0x5e1   :  { %5821 = vsyncadd [#allocation4], 4294966784 }
 0x5e2   :  { %5153 = vsyncpa [#allocation4], 1 }

</bundles_post_ra>
